<compile_context>
chip_gen: v5e
topology: v5e:2x2
jax: 0.10.0
libtpu: 0.0.40
codegen_flags: <defaults>
</compile_context>

<pallas_src>
import functools
import math

import jax
import jax.numpy as jnp
from jax import lax
from jax.experimental import pallas as pl
from jax.experimental.pallas import tpu as pltpu


# ----------------------------- in-kernel helpers -----------------------------

def _layer_norm(z, gamma, beta, eps=1e-3):
    # LaMP LayerNormalization: unbiased std, eps added to sigma.  Exact divide
    # (approx reciprocal is reserved for the softmax denominator).
    mu = jnp.mean(z, axis=-1, keepdims=True)
    var = jnp.sum((z - mu) ** 2, axis=-1, keepdims=True) / (z.shape[-1] - 1)
    return (z - mu) / (jnp.sqrt(var) + eps) * gamma + beta


def _softmax(x):
    m = jnp.max(x, axis=-1, keepdims=True)
    e = jnp.exp(x - m)
    return e * pl.reciprocal(jnp.sum(e, axis=-1, keepdims=True), approx=True)


def _mha_proj(q_all, k_all, v_all, wo16, nb, lq, lk, n_head, d_k, d_v):
    """Multi-head attention + output projection with per-head accumulation.

    q_all: (nb*lq, H*d_k) f32, k_all: (nb*lk, H*d_k) f32,
    v_all: (nb*lk, H*d_v) f32, wo16: (H*d_v, D) bf16.
    The attention temperature is already folded into the Q weights.
    Returns (nb*lq, D) f32 == concat(heads) @ W_o, but accumulated head by
    head into a lane-dense (rows, D) f32 buffer (no lane-sparse concat).
    """
    q16 = q_all.astype(jnp.bfloat16)   # cast once per attention, not per head
    k16 = k_all.astype(jnp.bfloat16)
    v16 = v_all.astype(jnp.bfloat16)
    blocks = []
    for b in range(nb):                # static, small batch tile
        qb = q16[b * lq:(b + 1) * lq]
        kb = k16[b * lk:(b + 1) * lk]
        vb = v16[b * lk:(b + 1) * lk]
        acc = None
        for h in range(n_head):        # static, small head count
            qh = qb[:, h * d_k:(h + 1) * d_k]
            kh = kb[:, h * d_k:(h + 1) * d_k]
            vh = vb[:, h * d_v:(h + 1) * d_v]
            # QK^T via dot_general (transpose folded into the MXU feed).
            s = lax.dot_general(qh, kh, (((1,), (1,)), ((), ())),
                                preferred_element_type=jnp.float32)
            a = _softmax(s)
            # bf16 probabilities feed the MXU (documented source of the loose
            # tolerance; acceptable for inference).
            av = jnp.dot(a.astype(jnp.bfloat16), vh,
                         preferred_element_type=jnp.float32)
            contrib = jnp.dot(av.astype(jnp.bfloat16),
                              wo16[h * d_v:(h + 1) * d_v, :],
                              preferred_element_type=jnp.float32)
            acc = contrib if acc is None else acc + contrib
        blocks.append(acc)
    return blocks[0] if nb == 1 else jnp.concatenate(blocks, axis=0)


def _self_attn_sublayer(x, wqkv16, wo16, bo, g, b, nb, seq, n_head2, d_k, d_v):
    qkv = jnp.dot(x.astype(jnp.bfloat16), wqkv16,
                  preferred_element_type=jnp.float32)   # (nb*seq, H2*(2dk+dv))
    h2 = n_head2
    proj = _mha_proj(qkv[:, :h2 * d_k],
                     qkv[:, h2 * d_k:2 * h2 * d_k],
                     qkv[:, 2 * h2 * d_k:],
                     wo16, nb, seq, seq, h2, d_k, d_v)
    return _layer_norm(proj + bo + x, g, b)


def _enc_attn_sublayer(x, enc16, wq16, wkv16, wo16, bo, g, b,
                       nb, lq, lk, n_head, d_k, d_v):
    q_all = jnp.dot(x.astype(jnp.bfloat16), wq16,
                    preferred_element_type=jnp.float32)        # (nb*lq, H*dk)
    kv = jnp.dot(enc16, wkv16,
                 preferred_element_type=jnp.float32)           # (nb*lk, H*(dk+dv))
    proj = _mha_proj(q_all, kv[:, :n_head * d_k], kv[:, n_head * d_k:],
                     wo16, nb, lq, lk, n_head, d_k, d_v)
    return _layer_norm(proj + bo + x, g, b)


def _ffn_sublayer(x, w1, b1, w2, b2, g, b):
    h1 = jnp.maximum(
        jnp.dot(x.astype(jnp.bfloat16), w1,
                preferred_element_type=jnp.float32) + b1, 0.0)
    y = jnp.dot(h1.astype(jnp.bfloat16), w2,
                preferred_element_type=jnp.float32) + b2
    return _layer_norm(y + x, g, b)


# ------------------------------- fused kernel --------------------------------

def graph_decoder_kernel(
    emb_ref, enc_ref,
    slf_wqkv_ref, slf_wo_ref, slf_bo_ref, slf_g_ref, slf_b_ref,
    enc_wq_ref, enc_wkv_ref, enc_wo_ref, enc_bo_ref, enc_g_ref, enc_b_ref,
    ffn_w1_ref, ffn_b1_ref, ffn_w2_ref, ffn_b2_ref, ffn_g_ref, ffn_b_ref,
    out_ref,
    *, tb, seq_l, seq_k, n_head, n_head2, d_k, d_v):
    """One (batch_tile, layer) grid step of the GraphDecoder stack.

    out_ref's block index is constant along the layer grid axis, so it stays
    resident in VMEM and carries the decoder state between layers.
    """
    layer = pl.program_id(1)

    def self_attn(x, nb):
        return _self_attn_sublayer(
            x, slf_wqkv_ref[...], slf_wo_ref[...], slf_bo_ref[...],
            slf_g_ref[...], slf_b_ref[...], nb, seq_l, n_head2, d_k, d_v)

    # ---- 1. self-attention over label nodes (n_head2 heads) ----
    @pl.when(layer == 0)
    def _():
        # Layer-0 self-attention is batch invariant (every batch element's
        # input is the same label-embedding table): compute it once on (L, D)
        # and replicate across the batch tile.
        y0 = self_attn(emb_ref[...], 1)
        out_ref[...] = y0 if tb == 1 else jnp.concatenate([y0] * tb, axis=0)

    @pl.when(layer > 0)
    def _():
        out_ref[...] = self_attn(out_ref[...], tb)

    x = out_ref[...]

    # ---- 2. attention over encoder output (n_head heads) ----
    enc16 = enc_ref[...].astype(jnp.bfloat16)
    x = _enc_attn_sublayer(
        x, enc16, enc_wq_ref[...], enc_wkv_ref[...], enc_wo_ref[...],
        enc_bo_ref[...], enc_g_ref[...], enc_b_ref[...],
        tb, seq_l, seq_k, n_head, d_k, d_v)

    # ---- 3. position-wise FFN (Conv1d k=1 == linear, ReLU) ----
    x = _ffn_sublayer(x, ffn_w1_ref[...], ffn_b1_ref[...],
                      ffn_w2_ref[...], ffn_b2_ref[...],
                      ffn_g_ref[...], ffn_b_ref[...])

    out_ref[...] = x


# ------------------------------- host wrapper ---------------------------------

_WEIGHT_ORDER = (
    "slf_wqkv", "slf_wo", "slf_bo", "slf_g", "slf_b",
    "enc_wq", "enc_wkv", "enc_wo", "enc_bo", "enc_g", "enc_b",
    "ffn_w1", "ffn_b1", "ffn_w2", "ffn_b2", "ffn_g", "ffn_b",
)


def _pick_batch_tile(batch, seq_l, target_rows=256):
    """Choose the batch chunk so tb*L rows feed the MXU densely; prefer >= 2
    grid steps along the 'parallel' axis (v7x megacore) when that does not
    drop below the row target."""
    tb = max(1, min(batch, -(-target_rows // max(seq_l, 1))))
    while batch % tb:
        tb -= 1
    if batch // tb < 2 and tb % 2 == 0 and (tb // 2) * seq_l >= target_rows:
        tb //= 2
    return tb


def graph_decoder_forward(params, tgt, src_seq, enc_output, *,
                          d_model, n_head, n_head2, d_k, d_v):
    """Mirrors GraphDecoder.forward with enc_vec=True, label_mask='none',
    graph_conv=False, eval mode (dropout identity)."""
    del tgt  # unused by the reference forward
    # TODO(synk): label_adj_matrix / label_mask='eye'/'inveye' self-attention
    # masks and the enc_vec=False src_seq padding-mask branch are config paths
    # not implemented here; callers must not request them.
    batch = src_seq.shape[0]
    seq_l, d = params["emb"].shape
    assert d == d_model
    seq_k = enc_output.shape[1]
    n_layers = params["slf_wqkv"].shape[0]

    tb = _pick_batch_tile(batch, seq_l)
    n_bt = batch // tb

    # Wrapper-side reshape = layout plumbing: present lane/sublane-dense
    # (rows, D) slabs so the kernel's projections run on folded rows.
    enc_flat = enc_output.reshape(batch * seq_k, d)

    kernel = functools.partial(
        graph_decoder_kernel, tb=tb, seq_l=seq_l, seq_k=seq_k,
        n_head=n_head, n_head2=n_head2, d_k=d_k, d_v=d_v)

    def layer_spec(w):
        trailing = tuple(w.shape[1:])
        return pl.BlockSpec((None,) + trailing,
                            lambda bt, l, _n=len(trailing): (l,) + (0,) * _n)

    weights = [params[k] for k in _WEIGHT_ORDER]

    dec_flat = pl.pallas_call(
        kernel,
        out_shape=jax.ShapeDtypeStruct((batch * seq_l, d), jnp.float32),
        grid=(n_bt, n_layers),
        in_specs=[pl.BlockSpec((seq_l, d), lambda bt, l: (0, 0)),
                  pl.BlockSpec((tb * seq_k, d), lambda bt, l: (bt, 0))]
                 + [layer_spec(w) for w in weights],
        out_specs=pl.BlockSpec((tb * seq_l, d), lambda bt, l: (bt, 0)),
        compiler_params=pltpu.CompilerParams(
            dimension_semantics=("parallel", "arbitrary")),
    )(params["emb"], enc_flat, *weights)

    # TODO(synk): at real LaMP label counts (L in the thousands) the (L, L)
    # self-attention scores and the (rows, d_inner) FFN hidden need row tiling
    # (flash-style online softmax) to stay within VMEM.
    return dec_flat.reshape(batch, seq_l, d), None


# ------------------------------ parameter init --------------------------------

def init_params(key, *, n_tgt_vocab, d_model, d_inner, n_head, n_head2,
                d_k, d_v, n_layers):
    keys = iter(jax.random.split(key, 8))
    inv_temper = 1.0 / math.sqrt(d_model)   # attention temperature

    def nrm(shape, scale):
        return jax.random.normal(next(keys), shape, jnp.float32) * scale

    qkv2 = n_head2 * (2 * d_k + d_v)     # packed self-attn Q|K|V width
    kv1 = n_head * (d_k + d_v)           # packed enc-attn   K|V   width
    z = lambda *s: jnp.zeros(s, jnp.float32)
    o = lambda *s: jnp.ones(s, jnp.float32)
    bf = lambda a: a.astype(jnp.bfloat16)

    # One-time init transform: fold 1/sqrt(d_model) into the Q columns so the
    # kernel never multiplies the score tiles by the temperature.
    slf_wqkv = nrm((n_layers, d_model, qkv2), 1.0 / math.sqrt(d_model))
    slf_wqkv = slf_wqkv.at[:, :, :n_head2 * d_k].multiply(inv_temper)
    enc_wq = nrm((n_layers, d_model, n_head * d_k),
                 1.0 / math.sqrt(d_model)) * inv_temper

    return {
        "emb": nrm((n_tgt_vocab, d_model), 1.0),
        # self-attention (n_head2 heads), packed lane-dense weights
        "slf_wqkv": bf(slf_wqkv),
        "slf_wo": bf(nrm((n_layers, n_head2 * d_v, d_model),
                         1.0 / math.sqrt(n_head2 * d_v))),
        "slf_bo": z(n_layers, 1, d_model),
        "slf_g": o(n_layers, 1, d_model),
        "slf_b": z(n_layers, 1, d_model),
        # encoder attention (n_head heads)
        "enc_wq": bf(enc_wq),
        "enc_wkv": bf(nrm((n_layers, d_model, kv1), 1.0 / math.sqrt(d_model))),
        "enc_wo": bf(nrm((n_layers, n_head * d_v, d_model),
                         1.0 / math.sqrt(n_head * d_v))),
        "enc_bo": z(n_layers, 1, d_model),
        "enc_g": o(n_layers, 1, d_model),
        "enc_b": z(n_layers, 1, d_model),
        # position-wise FFN
        "ffn_w1": bf(nrm((n_layers, d_model, d_inner), 1.0 / math.sqrt(d_model))),
        "ffn_b1": z(n_layers, 1, d_inner),
        "ffn_w2": bf(nrm((n_layers, d_inner, d_model), 1.0 / math.sqrt(d_inner))),
        "ffn_b2": z(n_layers, 1, d_model),
        "ffn_g": o(n_layers, 1, d_model),
        "ffn_b": z(n_layers, 1, d_model),
    }


# --------------------------- pure-JAX reference -------------------------------

def _reference_forward(params, enc_output, *, n_head, n_head2, d_k, d_v):
    # NOTE: the 1/sqrt(d_model) temperature is folded into the stored Q
    # weights at init, so it is not reapplied here.
    f32 = lambda a: a.astype(jnp.float32)
    emb = params["emb"]
    seq_l, d = emb.shape
    batch = enc_output.shape[0]
    n_layers = params["slf_wqkv"].shape[0]

    def ln(z, g, b, eps=1e-3):
        mu = jnp.mean(z, -1, keepdims=True)
        var = jnp.sum((z - mu) ** 2, -1, keepdims=True) / (z.shape[-1] - 1)
        return (z - mu) / (jnp.sqrt(var) + eps) * g + b

    def attend(q_all, k_all, v_all, heads):
        outs = []
        for h in range(heads):
            qh = q_all[..., h * d_k:(h + 1) * d_k]
            kh = k_all[..., h * d_k:(h + 1) * d_k]
            vh = v_all[..., h * d_v:(h + 1) * d_v]
            s = jnp.einsum("bqd,bkd->bqk", qh, kh)
            a = jax.nn.softmax(s, axis=-1)
            outs.append(jnp.einsum("bqk,bkd->bqd", a, vh))
        return jnp.concatenate(outs, axis=-1)

    x = jnp.broadcast_to(emb[None], (batch, seq_l, d))
    for l in range(n_layers):
        h2 = n_head2
        qkv = x @ f32(params["slf_wqkv"][l])
        c = attend(qkv[..., :h2 * d_k], qkv[..., h2 * d_k:2 * h2 * d_k],
                   qkv[..., 2 * h2 * d_k:], h2)
        x = ln(c @ f32(params["slf_wo"][l]) + params["slf_bo"][l] + x,
               params["slf_g"][l], params["slf_b"][l])
        h = n_head
        qa = x @ f32(params["enc_wq"][l])
        kv = enc_output @ f32(params["enc_wkv"][l])
        c = attend(qa, kv[..., :h * d_k], kv[..., h * d_k:], h)
        x = ln(c @ f32(params["enc_wo"][l]) + params["enc_bo"][l] + x,
               params["enc_g"][l], params["enc_b"][l])
        h1 = jax.nn.relu(x @ f32(params["ffn_w1"][l]) + params["ffn_b1"][l])
        y = h1 @ f32(params["ffn_w2"][l]) + params["ffn_b2"][l]
        x = ln(y + x, params["ffn_g"][l], params["ffn_b"][l])
    return x


# ---------------------------------- main ---------------------------------------

if __name__ == "__main__":
    # small shapes consistent with the module
    n_tgt_vocab = 16   # number of labels / decoder "sequence" length
    d_model = 32
    d_inner = 64
    n_head = 4
    n_head2 = 4
    d_k = d_v = 8
    n_layers = 2
    batch = 2
    src_len = 8

    key = jax.random.PRNGKey(0)
    kp, ke, ks = jax.random.split(key, 3)

    params = init_params(kp, n_tgt_vocab=n_tgt_vocab, d_model=d_model,
                         d_inner=d_inner, n_head=n_head, n_head2=n_head2,
                         d_k=d_k, d_v=d_v, n_layers=n_layers)

    enc_output = jax.random.normal(ke, (batch, src_len, d_model), jnp.float32)
    src_seq = jax.random.randint(ks, (batch, src_len), 1, 100, jnp.int32)
    tgt = jnp.zeros((batch, n_tgt_vocab), jnp.int32)  # unused by forward

    dec_out, _ = graph_decoder_forward(params, tgt, src_seq, enc_output,
                                       d_model=d_model, n_head=n_head,
                                       n_head2=n_head2, d_k=d_k, d_v=d_v)
    dec_out = jax.block_until_ready(dec_out)

    assert dec_out.shape == (batch, n_tgt_vocab, d_model)
    assert bool(jnp.all(jnp.isfinite(dec_out)))

    # tolerance-based check vs. pure-JAX reference (bf16 MXU inputs + approx
    # softmax reciprocal in the kernel).
    ref = _reference_forward(params, enc_output, n_head=n_head,
                             n_head2=n_head2, d_k=d_k, d_v=d_v)
    assert bool(jnp.allclose(dec_out, ref, atol=0.1, rtol=0.1))

    print("KERNEL_OK")
</pallas_src>

<mosaic_0001>
module attributes {stable_mosaic.version = 11 : i64} {
  func.func @graph_decoder_kernel(%arg0: i32, %arg1: i32, %arg2: memref<16x32xf32, #tpu.memory_space<vmem>>, %arg3: memref<16x32xf32, #tpu.memory_space<vmem>>, %arg4: memref<1x32x96xbf16, #tpu.memory_space<vmem>>, %arg5: memref<1x32x32xbf16, #tpu.memory_space<vmem>>, %arg6: memref<1x1x32xf32, #tpu.memory_space<vmem>>, %arg7: memref<1x1x32xf32, #tpu.memory_space<vmem>>, %arg8: memref<1x1x32xf32, #tpu.memory_space<vmem>>, %arg9: memref<1x32x32xbf16, #tpu.memory_space<vmem>>, %arg10: memref<1x32x64xbf16, #tpu.memory_space<vmem>>, %arg11: memref<1x32x32xbf16, #tpu.memory_space<vmem>>, %arg12: memref<1x1x32xf32, #tpu.memory_space<vmem>>, %arg13: memref<1x1x32xf32, #tpu.memory_space<vmem>>, %arg14: memref<1x1x32xf32, #tpu.memory_space<vmem>>, %arg15: memref<1x32x64xbf16, #tpu.memory_space<vmem>>, %arg16: memref<1x1x64xf32, #tpu.memory_space<vmem>>, %arg17: memref<1x64x32xbf16, #tpu.memory_space<vmem>>, %arg18: memref<1x1x32xf32, #tpu.memory_space<vmem>>, %arg19: memref<1x1x32xf32, #tpu.memory_space<vmem>>, %arg20: memref<1x1x32xf32, #tpu.memory_space<vmem>>, %arg21: memref<32x32xf32, #tpu.memory_space<vmem>>) attributes {dimension_semantics = [#tpu.dimension_semantics<parallel>, #tpu.dimension_semantics<arbitrary>], iteration_bounds = array<i64: 1, 2>, scalar_prefetch = 0 : i64, scratch_operands = 0 : i64, tpu.core_type = #tpu.core_type<tc>, window_params = [{pipeline_mode = #tpu.pipeline_mode<synchronous>, transform_indices = @transform_0, window_bounds = array<i64: 16, 32>}, {transform_indices = @transform_1, window_bounds = array<i64: 16, 32>}, {transform_indices = @transform_2, window_bounds = array<i64: 1, 32, 96>}, {transform_indices = @transform_3, window_bounds = array<i64: 1, 32, 32>}, {transform_indices = @transform_4, window_bounds = array<i64: 1, 1, 32>}, {transform_indices = @transform_5, window_bounds = array<i64: 1, 1, 32>}, {transform_indices = @transform_6, window_bounds = array<i64: 1, 1, 32>}, {transform_indices = @transform_7, window_bounds = array<i64: 1, 32, 32>}, {transform_indices = @transform_8, window_bounds = array<i64: 1, 32, 64>}, {transform_indices = @transform_9, window_bounds = array<i64: 1, 32, 32>}, {transform_indices = @transform_10, window_bounds = array<i64: 1, 1, 32>}, {transform_indices = @transform_11, window_bounds = array<i64: 1, 1, 32>}, {transform_indices = @transform_12, window_bounds = array<i64: 1, 1, 32>}, {transform_indices = @transform_13, window_bounds = array<i64: 1, 32, 64>}, {transform_indices = @transform_14, window_bounds = array<i64: 1, 1, 64>}, {transform_indices = @transform_15, window_bounds = array<i64: 1, 64, 32>}, {transform_indices = @transform_16, window_bounds = array<i64: 1, 1, 32>}, {transform_indices = @transform_17, window_bounds = array<i64: 1, 1, 32>}, {transform_indices = @transform_18, window_bounds = array<i64: 1, 1, 32>}, {transform_indices = @transform_19, window_bounds = array<i64: 32, 32>}]} {
    %c0_i32 = arith.constant 0 : i32
    %0 = arith.cmpi eq, %arg1, %c0_i32 : i32
    %1 = arith.extui %0 : i1 to i32
    %c0_i32_0 = arith.constant 0 : i32
    %2 = arith.cmpi ne, %1, %c0_i32_0 : i32
    scf.if %2 {
      %c0_98 = arith.constant 0 : index
      %c0_99 = arith.constant 0 : index
      %265 = vector.load %arg2[%c0_98, %c0_99] : memref<16x32xf32, #tpu.memory_space<vmem>>, vector<16x32xf32>
      %c0_100 = arith.constant 0 : index
      %c0_101 = arith.constant 0 : index
      %c0_102 = arith.constant 0 : index
      %266 = vector.load %arg4[%c0_100, %c0_101, %c0_102] : memref<1x32x96xbf16, #tpu.memory_space<vmem>>, vector<1x32x96xbf16>
      %267 = vector.shape_cast %266 : vector<1x32x96xbf16> to vector<32x96xbf16>
      %c0_103 = arith.constant 0 : index
      %c0_104 = arith.constant 0 : index
      %c0_105 = arith.constant 0 : index
      %268 = vector.load %arg5[%c0_103, %c0_104, %c0_105] : memref<1x32x32xbf16, #tpu.memory_space<vmem>>, vector<1x32x32xbf16>
      %269 = vector.shape_cast %268 : vector<1x32x32xbf16> to vector<32x32xbf16>
      %c0_106 = arith.constant 0 : index
      %c0_107 = arith.constant 0 : index
      %c0_108 = arith.constant 0 : index
      %270 = vector.load %arg6[%c0_106, %c0_107, %c0_108] : memref<1x1x32xf32, #tpu.memory_space<vmem>>, vector<1x1x32xf32>
      %271 = vector.shape_cast %270 : vector<1x1x32xf32> to vector<1x32xf32>
      %c0_109 = arith.constant 0 : index
      %c0_110 = arith.constant 0 : index
      %c0_111 = arith.constant 0 : index
      %272 = vector.load %arg7[%c0_109, %c0_110, %c0_111] : memref<1x1x32xf32, #tpu.memory_space<vmem>>, vector<1x1x32xf32>
      %273 = vector.shape_cast %272 : vector<1x1x32xf32> to vector<1x32xf32>
      %c0_112 = arith.constant 0 : index
      %c0_113 = arith.constant 0 : index
      %c0_114 = arith.constant 0 : index
      %274 = vector.load %arg8[%c0_112, %c0_113, %c0_114] : memref<1x1x32xf32, #tpu.memory_space<vmem>>, vector<1x1x32xf32>
      %275 = vector.shape_cast %274 : vector<1x1x32xf32> to vector<1x32xf32>
      %276 = arith.truncf %265 : vector<16x32xf32> to vector<16x32xbf16>
      %cst_115 = arith.constant dense<0.000000e+00> : vector<16x96xf32>
      %277 = tpu.matmul %276, %267, %cst_115 {dimension_numbers = #tpu.dot_dimension_numbers<[1], [0], [0], [1], [0, 0, 1, 1], [], []>} : vector<16x32xbf16>, vector<32x96xbf16>, vector<16x96xf32> -> vector<16x96xf32>
      %278 = vector.extract_strided_slice %277 {offsets = [0, 0], sizes = [16, 32], strides = [1, 1]} : vector<16x96xf32> to vector<16x32xf32>
      %279 = vector.extract_strided_slice %277 {offsets = [0, 32], sizes = [16, 32], strides = [1, 1]} : vector<16x96xf32> to vector<16x32xf32>
      %280 = vector.extract_strided_slice %277 {offsets = [0, 64], sizes = [16, 32], strides = [1, 1]} : vector<16x96xf32> to vector<16x32xf32>
      %281 = arith.truncf %278 : vector<16x32xf32> to vector<16x32xbf16>
      %282 = arith.truncf %279 : vector<16x32xf32> to vector<16x32xbf16>
      %283 = arith.truncf %280 : vector<16x32xf32> to vector<16x32xbf16>
      %284 = vector.extract_strided_slice %281 {offsets = [0, 0], sizes = [16, 8], strides = [1, 1]} : vector<16x32xbf16> to vector<16x8xbf16>
      %285 = vector.extract_strided_slice %282 {offsets = [0, 0], sizes = [16, 8], strides = [1, 1]} : vector<16x32xbf16> to vector<16x8xbf16>
      %286 = vector.extract_strided_slice %283 {offsets = [0, 0], sizes = [16, 8], strides = [1, 1]} : vector<16x32xbf16> to vector<16x8xbf16>
      %cst_116 = arith.constant dense<0.000000e+00> : vector<16x16xf32>
      %287 = tpu.matmul %284, %285, %cst_116 {dimension_numbers = #tpu.dot_dimension_numbers<[1], [1], [0], [0], [0, 0, 1, 0], [], []>} : vector<16x8xbf16>, vector<16x8xbf16>, vector<16x16xf32> -> vector<16x16xf32>
      %cst_117 = arith.constant dense<0xFF800000> : vector<16xf32>
      %288 = vector.multi_reduction <maximumf>, %287, %cst_117 [1] : vector<16x16xf32> to vector<16xf32>
      %289 = vector.shape_cast %288 : vector<16xf32> to vector<16x1xf32>
      %290 = vector.broadcast %289 : vector<16x1xf32> to vector<16x16xf32>
      %291 = arith.subf %287, %290 : vector<16x16xf32>
      %292 = math.exp %291 : vector<16x16xf32>
      %cst_118 = arith.constant dense<0.000000e+00> : vector<16xf32>
      %293 = vector.multi_reduction <add>, %292, %cst_118 [1] : vector<16x16xf32> to vector<16xf32>
      %294 = vector.shape_cast %293 : vector<16xf32> to vector<16x1xf32>
      %295 = tpu.reciprocal %294 {approx = true} : vector<16x1xf32> -> vector<16x1xf32>
      %296 = vector.broadcast %295 : vector<16x1xf32> to vector<16x16xf32>
      %297 = arith.mulf %292, %296 : vector<16x16xf32>
      %298 = arith.truncf %297 : vector<16x16xf32> to vector<16x16xbf16>
      %cst_119 = arith.constant dense<0.000000e+00> : vector<16x8xf32>
      %299 = tpu.matmul %298, %286, %cst_119 {dimension_numbers = #tpu.dot_dimension_numbers<[1], [0], [0], [1], [0, 0, 1, 1], [], []>} : vector<16x16xbf16>, vector<16x8xbf16>, vector<16x8xf32> -> vector<16x8xf32>
      %300 = arith.truncf %299 : vector<16x8xf32> to vector<16x8xbf16>
      %301 = vector.extract_strided_slice %269 {offsets = [0, 0], sizes = [8, 32], strides = [1, 1]} : vector<32x32xbf16> to vector<8x32xbf16>
      %cst_120 = arith.constant dense<0.000000e+00> : vector<16x32xf32>
      %302 = tpu.matmul %300, %301, %cst_120 {dimension_numbers = #tpu.dot_dimension_numbers<[1], [0], [0], [1], [0, 0, 1, 1], [], []>} : vector<16x8xbf16>, vector<8x32xbf16>, vector<16x32xf32> -> vector<16x32xf32>
      %303 = vector.extract_strided_slice %281 {offsets = [0, 8], sizes = [16, 8], strides = [1, 1]} : vector<16x32xbf16> to vector<16x8xbf16>
      %304 = vector.extract_strided_slice %282 {offsets = [0, 8], sizes = [16, 8], strides = [1, 1]} : vector<16x32xbf16> to vector<16x8xbf16>
      %305 = vector.extract_strided_slice %283 {offsets = [0, 8], sizes = [16, 8], strides = [1, 1]} : vector<16x32xbf16> to vector<16x8xbf16>
      %cst_121 = arith.constant dense<0.000000e+00> : vector<16x16xf32>
      %306 = tpu.matmul %303, %304, %cst_121 {dimension_numbers = #tpu.dot_dimension_numbers<[1], [1], [0], [0], [0, 0, 1, 0], [], []>} : vector<16x8xbf16>, vector<16x8xbf16>, vector<16x16xf32> -> vector<16x16xf32>
      %cst_122 = arith.constant dense<0xFF800000> : vector<16xf32>
      %307 = vector.multi_reduction <maximumf>, %306, %cst_122 [1] : vector<16x16xf32> to vector<16xf32>
      %308 = vector.shape_cast %307 : vector<16xf32> to vector<16x1xf32>
      %309 = vector.broadcast %308 : vector<16x1xf32> to vector<16x16xf32>
      %310 = arith.subf %306, %309 : vector<16x16xf32>
      %311 = math.exp %310 : vector<16x16xf32>
      %cst_123 = arith.constant dense<0.000000e+00> : vector<16xf32>
      %312 = vector.multi_reduction <add>, %311, %cst_123 [1] : vector<16x16xf32> to vector<16xf32>
      %313 = vector.shape_cast %312 : vector<16xf32> to vector<16x1xf32>
      %314 = tpu.reciprocal %313 {approx = true} : vector<16x1xf32> -> vector<16x1xf32>
      %315 = vector.broadcast %314 : vector<16x1xf32> to vector<16x16xf32>
      %316 = arith.mulf %311, %315 : vector<16x16xf32>
      %317 = arith.truncf %316 : vector<16x16xf32> to vector<16x16xbf16>
      %cst_124 = arith.constant dense<0.000000e+00> : vector<16x8xf32>
      %318 = tpu.matmul %317, %305, %cst_124 {dimension_numbers = #tpu.dot_dimension_numbers<[1], [0], [0], [1], [0, 0, 1, 1], [], []>} : vector<16x16xbf16>, vector<16x8xbf16>, vector<16x8xf32> -> vector<16x8xf32>
      %319 = arith.truncf %318 : vector<16x8xf32> to vector<16x8xbf16>
      %320 = vector.extract_strided_slice %269 {offsets = [8, 0], sizes = [8, 32], strides = [1, 1]} : vector<32x32xbf16> to vector<8x32xbf16>
      %cst_125 = arith.constant dense<0.000000e+00> : vector<16x32xf32>
      %321 = tpu.matmul %319, %320, %cst_125 {dimension_numbers = #tpu.dot_dimension_numbers<[1], [0], [0], [1], [0, 0, 1, 1], [], []>} : vector<16x8xbf16>, vector<8x32xbf16>, vector<16x32xf32> -> vector<16x32xf32>
      %322 = arith.addf %302, %321 : vector<16x32xf32>
      %323 = vector.extract_strided_slice %281 {offsets = [0, 16], sizes = [16, 8], strides = [1, 1]} : vector<16x32xbf16> to vector<16x8xbf16>
      %324 = vector.extract_strided_slice %282 {offsets = [0, 16], sizes = [16, 8], strides = [1, 1]} : vector<16x32xbf16> to vector<16x8xbf16>
      %325 = vector.extract_strided_slice %283 {offsets = [0, 16], sizes = [16, 8], strides = [1, 1]} : vector<16x32xbf16> to vector<16x8xbf16>
      %cst_126 = arith.constant dense<0.000000e+00> : vector<16x16xf32>
      %326 = tpu.matmul %323, %324, %cst_126 {dimension_numbers = #tpu.dot_dimension_numbers<[1], [1], [0], [0], [0, 0, 1, 0], [], []>} : vector<16x8xbf16>, vector<16x8xbf16>, vector<16x16xf32> -> vector<16x16xf32>
      %cst_127 = arith.constant dense<0xFF800000> : vector<16xf32>
      %327 = vector.multi_reduction <maximumf>, %326, %cst_127 [1] : vector<16x16xf32> to vector<16xf32>
      %328 = vector.shape_cast %327 : vector<16xf32> to vector<16x1xf32>
      %329 = vector.broadcast %328 : vector<16x1xf32> to vector<16x16xf32>
      %330 = arith.subf %326, %329 : vector<16x16xf32>
      %331 = math.exp %330 : vector<16x16xf32>
      %cst_128 = arith.constant dense<0.000000e+00> : vector<16xf32>
      %332 = vector.multi_reduction <add>, %331, %cst_128 [1] : vector<16x16xf32> to vector<16xf32>
      %333 = vector.shape_cast %332 : vector<16xf32> to vector<16x1xf32>
      %334 = tpu.reciprocal %333 {approx = true} : vector<16x1xf32> -> vector<16x1xf32>
      %335 = vector.broadcast %334 : vector<16x1xf32> to vector<16x16xf32>
      %336 = arith.mulf %331, %335 : vector<16x16xf32>
      %337 = arith.truncf %336 : vector<16x16xf32> to vector<16x16xbf16>
      %cst_129 = arith.constant dense<0.000000e+00> : vector<16x8xf32>
      %338 = tpu.matmul %337, %325, %cst_129 {dimension_numbers = #tpu.dot_dimension_numbers<[1], [0], [0], [1], [0, 0, 1, 1], [], []>} : vector<16x16xbf16>, vector<16x8xbf16>, vector<16x8xf32> -> vector<16x8xf32>
      %339 = arith.truncf %338 : vector<16x8xf32> to vector<16x8xbf16>
      %340 = vector.extract_strided_slice %269 {offsets = [16, 0], sizes = [8, 32], strides = [1, 1]} : vector<32x32xbf16> to vector<8x32xbf16>
      %cst_130 = arith.constant dense<0.000000e+00> : vector<16x32xf32>
      %341 = tpu.matmul %339, %340, %cst_130 {dimension_numbers = #tpu.dot_dimension_numbers<[1], [0], [0], [1], [0, 0, 1, 1], [], []>} : vector<16x8xbf16>, vector<8x32xbf16>, vector<16x32xf32> -> vector<16x32xf32>
      %342 = arith.addf %322, %341 : vector<16x32xf32>
      %343 = vector.extract_strided_slice %281 {offsets = [0, 24], sizes = [16, 8], strides = [1, 1]} : vector<16x32xbf16> to vector<16x8xbf16>
      %344 = vector.extract_strided_slice %282 {offsets = [0, 24], sizes = [16, 8], strides = [1, 1]} : vector<16x32xbf16> to vector<16x8xbf16>
      %345 = vector.extract_strided_slice %283 {offsets = [0, 24], sizes = [16, 8], strides = [1, 1]} : vector<16x32xbf16> to vector<16x8xbf16>
      %cst_131 = arith.constant dense<0.000000e+00> : vector<16x16xf32>
      %346 = tpu.matmul %343, %344, %cst_131 {dimension_numbers = #tpu.dot_dimension_numbers<[1], [1], [0], [0], [0, 0, 1, 0], [], []>} : vector<16x8xbf16>, vector<16x8xbf16>, vector<16x16xf32> -> vector<16x16xf32>
      %cst_132 = arith.constant dense<0xFF800000> : vector<16xf32>
      %347 = vector.multi_reduction <maximumf>, %346, %cst_132 [1] : vector<16x16xf32> to vector<16xf32>
      %348 = vector.shape_cast %347 : vector<16xf32> to vector<16x1xf32>
      %349 = vector.broadcast %348 : vector<16x1xf32> to vector<16x16xf32>
      %350 = arith.subf %346, %349 : vector<16x16xf32>
      %351 = math.exp %350 : vector<16x16xf32>
      %cst_133 = arith.constant dense<0.000000e+00> : vector<16xf32>
      %352 = vector.multi_reduction <add>, %351, %cst_133 [1] : vector<16x16xf32> to vector<16xf32>
      %353 = vector.shape_cast %352 : vector<16xf32> to vector<16x1xf32>
      %354 = tpu.reciprocal %353 {approx = true} : vector<16x1xf32> -> vector<16x1xf32>
      %355 = vector.broadcast %354 : vector<16x1xf32> to vector<16x16xf32>
      %356 = arith.mulf %351, %355 : vector<16x16xf32>
      %357 = arith.truncf %356 : vector<16x16xf32> to vector<16x16xbf16>
      %cst_134 = arith.constant dense<0.000000e+00> : vector<16x8xf32>
      %358 = tpu.matmul %357, %345, %cst_134 {dimension_numbers = #tpu.dot_dimension_numbers<[1], [0], [0], [1], [0, 0, 1, 1], [], []>} : vector<16x16xbf16>, vector<16x8xbf16>, vector<16x8xf32> -> vector<16x8xf32>
      %359 = arith.truncf %358 : vector<16x8xf32> to vector<16x8xbf16>
      %360 = vector.extract_strided_slice %269 {offsets = [24, 0], sizes = [8, 32], strides = [1, 1]} : vector<32x32xbf16> to vector<8x32xbf16>
      %cst_135 = arith.constant dense<0.000000e+00> : vector<16x32xf32>
      %361 = tpu.matmul %359, %360, %cst_135 {dimension_numbers = #tpu.dot_dimension_numbers<[1], [0], [0], [1], [0, 0, 1, 1], [], []>} : vector<16x8xbf16>, vector<8x32xbf16>, vector<16x32xf32> -> vector<16x32xf32>
      %362 = arith.addf %342, %361 : vector<16x32xf32>
      %363 = vector.broadcast %271 : vector<1x32xf32> to vector<16x32xf32>
      %364 = arith.addf %362, %363 : vector<16x32xf32>
      %365 = arith.addf %364, %265 : vector<16x32xf32>
      %cst_136 = arith.constant dense<0.000000e+00> : vector<16xf32>
      %366 = vector.multi_reduction <add>, %365, %cst_136 [1] : vector<16x32xf32> to vector<16xf32>
      %367 = vector.shape_cast %366 : vector<16xf32> to vector<16x1xf32>
      %cst_137 = arith.constant 3.200000e+01 : f32
      %368 = vector.broadcast %cst_137 : f32 to vector<16x1xf32>
      %369 = arith.divf %367, %368 : vector<16x1xf32>
      %370 = vector.broadcast %369 : vector<16x1xf32> to vector<16x32xf32>
      %371 = arith.subf %365, %370 : vector<16x32xf32>
      %372 = arith.mulf %371, %371 : vector<16x32xf32>
      %cst_138 = arith.constant dense<0.000000e+00> : vector<16xf32>
      %373 = vector.multi_reduction <add>, %372, %cst_138 [1] : vector<16x32xf32> to vector<16xf32>
      %374 = vector.shape_cast %373 : vector<16xf32> to vector<16x1xf32>
      %cst_139 = arith.constant 3.100000e+01 : f32
      %375 = vector.broadcast %cst_139 : f32 to vector<16x1xf32>
      %376 = arith.divf %374, %375 : vector<16x1xf32>
      %377 = vector.broadcast %369 : vector<16x1xf32> to vector<16x32xf32>
      %378 = arith.subf %365, %377 : vector<16x32xf32>
      %379 = math.sqrt %376 : vector<16x1xf32>
      %cst_140 = arith.constant 1.000000e-03 : f32
      %380 = vector.broadcast %cst_140 : f32 to vector<16x1xf32>
      %381 = arith.addf %379, %380 : vector<16x1xf32>
      %382 = vector.broadcast %381 : vector<16x1xf32> to vector<16x32xf32>
      %383 = arith.divf %378, %382 : vector<16x32xf32>
      %384 = vector.broadcast %273 : vector<1x32xf32> to vector<16x32xf32>
      %385 = arith.mulf %383, %384 : vector<16x32xf32>
      %386 = vector.broadcast %275 : vector<1x32xf32> to vector<16x32xf32>
      %387 = arith.addf %385, %386 : vector<16x32xf32>
      %388 = tpu.concatenate %387, %387 in 0 : vector<16x32xf32>, vector<16x32xf32> -> vector<32x32xf32>
      %c0_141 = arith.constant 0 : index
      %c0_142 = arith.constant 0 : index
      %389 = vector.load %arg21[%c0_141, %c0_142] : memref<32x32xf32, #tpu.memory_space<vmem>>, vector<32x32xf32>
      tpu.vector_store %arg21[%c0_141, %c0_142], %388 {strides = array<i32>} : memref<32x32xf32, #tpu.memory_space<vmem>>, vector<32x32xf32>,
    } else {
    }
    %c0_i32_1 = arith.constant 0 : i32
    %3 = arith.cmpi sgt, %arg1, %c0_i32_1 : i32
    %4 = arith.extui %3 : i1 to i32
    %c0_i32_2 = arith.constant 0 : i32
    %5 = arith.cmpi ne, %4, %c0_i32_2 : i32
    scf.if %5 {
      %c0_98 = arith.constant 0 : index
      %c0_99 = arith.constant 0 : index
      %265 = vector.load %arg21[%c0_98, %c0_99] : memref<32x32xf32, #tpu.memory_space<vmem>>, vector<32x32xf32>
      %c0_100 = arith.constant 0 : index
      %c0_101 = arith.constant 0 : index
      %c0_102 = arith.constant 0 : index
      %266 = vector.load %arg4[%c0_100, %c0_101, %c0_102] : memref<1x32x96xbf16, #tpu.memory_space<vmem>>, vector<1x32x96xbf16>
      %267 = vector.shape_cast %266 : vector<1x32x96xbf16> to vector<32x96xbf16>
      %c0_103 = arith.constant 0 : index
      %c0_104 = arith.constant 0 : index
      %c0_105 = arith.constant 0 : index
      %268 = vector.load %arg5[%c0_103, %c0_104, %c0_105] : memref<1x32x32xbf16, #tpu.memory_space<vmem>>, vector<1x32x32xbf16>
      %269 = vector.shape_cast %268 : vector<1x32x32xbf16> to vector<32x32xbf16>
      %c0_106 = arith.constant 0 : index
      %c0_107 = arith.constant 0 : index
      %c0_108 = arith.constant 0 : index
      %270 = vector.load %arg6[%c0_106, %c0_107, %c0_108] : memref<1x1x32xf32, #tpu.memory_space<vmem>>, vector<1x1x32xf32>
      %271 = vector.shape_cast %270 : vector<1x1x32xf32> to vector<1x32xf32>
      %c0_109 = arith.constant 0 : index
      %c0_110 = arith.constant 0 : index
      %c0_111 = arith.constant 0 : index
      %272 = vector.load %arg7[%c0_109, %c0_110, %c0_111] : memref<1x1x32xf32, #tpu.memory_space<vmem>>, vector<1x1x32xf32>
      %273 = vector.shape_cast %272 : vector<1x1x32xf32> to vector<1x32xf32>
      %c0_112 = arith.constant 0 : index
      %c0_113 = arith.constant 0 : index
      %c0_114 = arith.constant 0 : index
      %274 = vector.load %arg8[%c0_112, %c0_113, %c0_114] : memref<1x1x32xf32, #tpu.memory_space<vmem>>, vector<1x1x32xf32>
      %275 = vector.shape_cast %274 : vector<1x1x32xf32> to vector<1x32xf32>
      %276 = arith.truncf %265 : vector<32x32xf32> to vector<32x32xbf16>
      %cst_115 = arith.constant dense<0.000000e+00> : vector<32x96xf32>
      %277 = tpu.matmul %276, %267, %cst_115 {dimension_numbers = #tpu.dot_dimension_numbers<[1], [0], [0], [1], [0, 0, 1, 1], [], []>} : vector<32x32xbf16>, vector<32x96xbf16>, vector<32x96xf32> -> vector<32x96xf32>
      %278 = vector.extract_strided_slice %277 {offsets = [0, 0], sizes = [32, 32], strides = [1, 1]} : vector<32x96xf32> to vector<32x32xf32>
      %279 = vector.extract_strided_slice %277 {offsets = [0, 32], sizes = [32, 32], strides = [1, 1]} : vector<32x96xf32> to vector<32x32xf32>
      %280 = vector.extract_strided_slice %277 {offsets = [0, 64], sizes = [32, 32], strides = [1, 1]} : vector<32x96xf32> to vector<32x32xf32>
      %281 = arith.truncf %278 : vector<32x32xf32> to vector<32x32xbf16>
      %282 = arith.truncf %279 : vector<32x32xf32> to vector<32x32xbf16>
      %283 = arith.truncf %280 : vector<32x32xf32> to vector<32x32xbf16>
      %284 = vector.extract_strided_slice %281 {offsets = [0, 0], sizes = [16, 32], strides = [1, 1]} : vector<32x32xbf16> to vector<16x32xbf16>
      %285 = vector.extract_strided_slice %282 {offsets = [0, 0], sizes = [16, 32], strides = [1, 1]} : vector<32x32xbf16> to vector<16x32xbf16>
      %286 = vector.extract_strided_slice %283 {offsets = [0, 0], sizes = [16, 32], strides = [1, 1]} : vector<32x32xbf16> to vector<16x32xbf16>
      %287 = vector.extract_strided_slice %284 {offsets = [0, 0], sizes = [16, 8], strides = [1, 1]} : vector<16x32xbf16> to vector<16x8xbf16>
      %288 = vector.extract_strided_slice %285 {offsets = [0, 0], sizes = [16, 8], strides = [1, 1]} : vector<16x32xbf16> to vector<16x8xbf16>
      %289 = vector.extract_strided_slice %286 {offsets = [0, 0], sizes = [16, 8], strides = [1, 1]} : vector<16x32xbf16> to vector<16x8xbf16>
      %cst_116 = arith.constant dense<0.000000e+00> : vector<16x16xf32>
      %290 = tpu.matmul %287, %288, %cst_116 {dimension_numbers = #tpu.dot_dimension_numbers<[1], [1], [0], [0], [0, 0, 1, 0], [], []>} : vector<16x8xbf16>, vector<16x8xbf16>, vector<16x16xf32> -> vector<16x16xf32>
      %cst_117 = arith.constant dense<0xFF800000> : vector<16xf32>
      %291 = vector.multi_reduction <maximumf>, %290, %cst_117 [1] : vector<16x16xf32> to vector<16xf32>
      %292 = vector.shape_cast %291 : vector<16xf32> to vector<16x1xf32>
      %293 = vector.broadcast %292 : vector<16x1xf32> to vector<16x16xf32>
      %294 = arith.subf %290, %293 : vector<16x16xf32>
      %295 = math.exp %294 : vector<16x16xf32>
      %cst_118 = arith.constant dense<0.000000e+00> : vector<16xf32>
      %296 = vector.multi_reduction <add>, %295, %cst_118 [1] : vector<16x16xf32> to vector<16xf32>
      %297 = vector.shape_cast %296 : vector<16xf32> to vector<16x1xf32>
      %298 = tpu.reciprocal %297 {approx = true} : vector<16x1xf32> -> vector<16x1xf32>
      %299 = vector.broadcast %298 : vector<16x1xf32> to vector<16x16xf32>
      %300 = arith.mulf %295, %299 : vector<16x16xf32>
      %301 = arith.truncf %300 : vector<16x16xf32> to vector<16x16xbf16>
      %cst_119 = arith.constant dense<0.000000e+00> : vector<16x8xf32>
      %302 = tpu.matmul %301, %289, %cst_119 {dimension_numbers = #tpu.dot_dimension_numbers<[1], [0], [0], [1], [0, 0, 1, 1], [], []>} : vector<16x16xbf16>, vector<16x8xbf16>, vector<16x8xf32> -> vector<16x8xf32>
      %303 = arith.truncf %302 : vector<16x8xf32> to vector<16x8xbf16>
      %304 = vector.extract_strided_slice %269 {offsets = [0, 0], sizes = [8, 32], strides = [1, 1]} : vector<32x32xbf16> to vector<8x32xbf16>
      %cst_120 = arith.constant dense<0.000000e+00> : vector<16x32xf32>
      %305 = tpu.matmul %303, %304, %cst_120 {dimension_numbers = #tpu.dot_dimension_numbers<[1], [0], [0], [1], [0, 0, 1, 1], [], []>} : vector<16x8xbf16>, vector<8x32xbf16>, vector<16x32xf32> -> vector<16x32xf32>
      %306 = vector.extract_strided_slice %284 {offsets = [0, 8], sizes = [16, 8], strides = [1, 1]} : vector<16x32xbf16> to vector<16x8xbf16>
      %307 = vector.extract_strided_slice %285 {offsets = [0, 8], sizes = [16, 8], strides = [1, 1]} : vector<16x32xbf16> to vector<16x8xbf16>
      %308 = vector.extract_strided_slice %286 {offsets = [0, 8], sizes = [16, 8], strides = [1, 1]} : vector<16x32xbf16> to vector<16x8xbf16>
      %cst_121 = arith.constant dense<0.000000e+00> : vector<16x16xf32>
      %309 = tpu.matmul %306, %307, %cst_121 {dimension_numbers = #tpu.dot_dimension_numbers<[1], [1], [0], [0], [0, 0, 1, 0], [], []>} : vector<16x8xbf16>, vector<16x8xbf16>, vector<16x16xf32> -> vector<16x16xf32>
      %cst_122 = arith.constant dense<0xFF800000> : vector<16xf32>
      %310 = vector.multi_reduction <maximumf>, %309, %cst_122 [1] : vector<16x16xf32> to vector<16xf32>
      %311 = vector.shape_cast %310 : vector<16xf32> to vector<16x1xf32>
      %312 = vector.broadcast %311 : vector<16x1xf32> to vector<16x16xf32>
      %313 = arith.subf %309, %312 : vector<16x16xf32>
      %314 = math.exp %313 : vector<16x16xf32>
      %cst_123 = arith.constant dense<0.000000e+00> : vector<16xf32>
      %315 = vector.multi_reduction <add>, %314, %cst_123 [1] : vector<16x16xf32> to vector<16xf32>
      %316 = vector.shape_cast %315 : vector<16xf32> to vector<16x1xf32>
      %317 = tpu.reciprocal %316 {approx = true} : vector<16x1xf32> -> vector<16x1xf32>
      %318 = vector.broadcast %317 : vector<16x1xf32> to vector<16x16xf32>
      %319 = arith.mulf %314, %318 : vector<16x16xf32>
      %320 = arith.truncf %319 : vector<16x16xf32> to vector<16x16xbf16>
      %cst_124 = arith.constant dense<0.000000e+00> : vector<16x8xf32>
      %321 = tpu.matmul %320, %308, %cst_124 {dimension_numbers = #tpu.dot_dimension_numbers<[1], [0], [0], [1], [0, 0, 1, 1], [], []>} : vector<16x16xbf16>, vector<16x8xbf16>, vector<16x8xf32> -> vector<16x8xf32>
      %322 = arith.truncf %321 : vector<16x8xf32> to vector<16x8xbf16>
      %323 = vector.extract_strided_slice %269 {offsets = [8, 0], sizes = [8, 32], strides = [1, 1]} : vector<32x32xbf16> to vector<8x32xbf16>
      %cst_125 = arith.constant dense<0.000000e+00> : vector<16x32xf32>
      %324 = tpu.matmul %322, %323, %cst_125 {dimension_numbers = #tpu.dot_dimension_numbers<[1], [0], [0], [1], [0, 0, 1, 1], [], []>} : vector<16x8xbf16>, vector<8x32xbf16>, vector<16x32xf32> -> vector<16x32xf32>
      %325 = arith.addf %305, %324 : vector<16x32xf32>
      %326 = vector.extract_strided_slice %284 {offsets = [0, 16], sizes = [16, 8], strides = [1, 1]} : vector<16x32xbf16> to vector<16x8xbf16>
      %327 = vector.extract_strided_slice %285 {offsets = [0, 16], sizes = [16, 8], strides = [1, 1]} : vector<16x32xbf16> to vector<16x8xbf16>
      %328 = vector.extract_strided_slice %286 {offsets = [0, 16], sizes = [16, 8], strides = [1, 1]} : vector<16x32xbf16> to vector<16x8xbf16>
      %cst_126 = arith.constant dense<0.000000e+00> : vector<16x16xf32>
      %329 = tpu.matmul %326, %327, %cst_126 {dimension_numbers = #tpu.dot_dimension_numbers<[1], [1], [0], [0], [0, 0, 1, 0], [], []>} : vector<16x8xbf16>, vector<16x8xbf16>, vector<16x16xf32> -> vector<16x16xf32>
      %cst_127 = arith.constant dense<0xFF800000> : vector<16xf32>
      %330 = vector.multi_reduction <maximumf>, %329, %cst_127 [1] : vector<16x16xf32> to vector<16xf32>
      %331 = vector.shape_cast %330 : vector<16xf32> to vector<16x1xf32>
      %332 = vector.broadcast %331 : vector<16x1xf32> to vector<16x16xf32>
      %333 = arith.subf %329, %332 : vector<16x16xf32>
      %334 = math.exp %333 : vector<16x16xf32>
      %cst_128 = arith.constant dense<0.000000e+00> : vector<16xf32>
      %335 = vector.multi_reduction <add>, %334, %cst_128 [1] : vector<16x16xf32> to vector<16xf32>
      %336 = vector.shape_cast %335 : vector<16xf32> to vector<16x1xf32>
      %337 = tpu.reciprocal %336 {approx = true} : vector<16x1xf32> -> vector<16x1xf32>
      %338 = vector.broadcast %337 : vector<16x1xf32> to vector<16x16xf32>
      %339 = arith.mulf %334, %338 : vector<16x16xf32>
      %340 = arith.truncf %339 : vector<16x16xf32> to vector<16x16xbf16>
      %cst_129 = arith.constant dense<0.000000e+00> : vector<16x8xf32>
      %341 = tpu.matmul %340, %328, %cst_129 {dimension_numbers = #tpu.dot_dimension_numbers<[1], [0], [0], [1], [0, 0, 1, 1], [], []>} : vector<16x16xbf16>, vector<16x8xbf16>, vector<16x8xf32> -> vector<16x8xf32>
      %342 = arith.truncf %341 : vector<16x8xf32> to vector<16x8xbf16>
      %343 = vector.extract_strided_slice %269 {offsets = [16, 0], sizes = [8, 32], strides = [1, 1]} : vector<32x32xbf16> to vector<8x32xbf16>
      %cst_130 = arith.constant dense<0.000000e+00> : vector<16x32xf32>
      %344 = tpu.matmul %342, %343, %cst_130 {dimension_numbers = #tpu.dot_dimension_numbers<[1], [0], [0], [1], [0, 0, 1, 1], [], []>} : vector<16x8xbf16>, vector<8x32xbf16>, vector<16x32xf32> -> vector<16x32xf32>
      %345 = arith.addf %325, %344 : vector<16x32xf32>
      %346 = vector.extract_strided_slice %284 {offsets = [0, 24], sizes = [16, 8], strides = [1, 1]} : vector<16x32xbf16> to vector<16x8xbf16>
      %347 = vector.extract_strided_slice %285 {offsets = [0, 24], sizes = [16, 8], strides = [1, 1]} : vector<16x32xbf16> to vector<16x8xbf16>
      %348 = vector.extract_strided_slice %286 {offsets = [0, 24], sizes = [16, 8], strides = [1, 1]} : vector<16x32xbf16> to vector<16x8xbf16>
      %cst_131 = arith.constant dense<0.000000e+00> : vector<16x16xf32>
      %349 = tpu.matmul %346, %347, %cst_131 {dimension_numbers = #tpu.dot_dimension_numbers<[1], [1], [0], [0], [0, 0, 1, 0], [], []>} : vector<16x8xbf16>, vector<16x8xbf16>, vector<16x16xf32> -> vector<16x16xf32>
      %cst_132 = arith.constant dense<0xFF800000> : vector<16xf32>
      %350 = vector.multi_reduction <maximumf>, %349, %cst_132 [1] : vector<16x16xf32> to vector<16xf32>
      %351 = vector.shape_cast %350 : vector<16xf32> to vector<16x1xf32>
      %352 = vector.broadcast %351 : vector<16x1xf32> to vector<16x16xf32>
      %353 = arith.subf %349, %352 : vector<16x16xf32>
      %354 = math.exp %353 : vector<16x16xf32>
      %cst_133 = arith.constant dense<0.000000e+00> : vector<16xf32>
      %355 = vector.multi_reduction <add>, %354, %cst_133 [1] : vector<16x16xf32> to vector<16xf32>
      %356 = vector.shape_cast %355 : vector<16xf32> to vector<16x1xf32>
      %357 = tpu.reciprocal %356 {approx = true} : vector<16x1xf32> -> vector<16x1xf32>
      %358 = vector.broadcast %357 : vector<16x1xf32> to vector<16x16xf32>
      %359 = arith.mulf %354, %358 : vector<16x16xf32>
      %360 = arith.truncf %359 : vector<16x16xf32> to vector<16x16xbf16>
      %cst_134 = arith.constant dense<0.000000e+00> : vector<16x8xf32>
      %361 = tpu.matmul %360, %348, %cst_134 {dimension_numbers = #tpu.dot_dimension_numbers<[1], [0], [0], [1], [0, 0, 1, 1], [], []>} : vector<16x16xbf16>, vector<16x8xbf16>, vector<16x8xf32> -> vector<16x8xf32>
      %362 = arith.truncf %361 : vector<16x8xf32> to vector<16x8xbf16>
      %363 = vector.extract_strided_slice %269 {offsets = [24, 0], sizes = [8, 32], strides = [1, 1]} : vector<32x32xbf16> to vector<8x32xbf16>
      %cst_135 = arith.constant dense<0.000000e+00> : vector<16x32xf32>
      %364 = tpu.matmul %362, %363, %cst_135 {dimension_numbers = #tpu.dot_dimension_numbers<[1], [0], [0], [1], [0, 0, 1, 1], [], []>} : vector<16x8xbf16>, vector<8x32xbf16>, vector<16x32xf32> -> vector<16x32xf32>
      %365 = arith.addf %345, %364 : vector<16x32xf32>
      %366 = vector.extract_strided_slice %281 {offsets = [16, 0], sizes = [16, 32], strides = [1, 1]} : vector<32x32xbf16> to vector<16x32xbf16>
      %367 = vector.extract_strided_slice %282 {offsets = [16, 0], sizes = [16, 32], strides = [1, 1]} : vector<32x32xbf16> to vector<16x32xbf16>
      %368 = vector.extract_strided_slice %283 {offsets = [16, 0], sizes = [16, 32], strides = [1, 1]} : vector<32x32xbf16> to vector<16x32xbf16>
      %369 = vector.extract_strided_slice %366 {offsets = [0, 0], sizes = [16, 8], strides = [1, 1]} : vector<16x32xbf16> to vector<16x8xbf16>
      %370 = vector.extract_strided_slice %367 {offsets = [0, 0], sizes = [16, 8], strides = [1, 1]} : vector<16x32xbf16> to vector<16x8xbf16>
      %371 = vector.extract_strided_slice %368 {offsets = [0, 0], sizes = [16, 8], strides = [1, 1]} : vector<16x32xbf16> to vector<16x8xbf16>
      %cst_136 = arith.constant dense<0.000000e+00> : vector<16x16xf32>
      %372 = tpu.matmul %369, %370, %cst_136 {dimension_numbers = #tpu.dot_dimension_numbers<[1], [1], [0], [0], [0, 0, 1, 0], [], []>} : vector<16x8xbf16>, vector<16x8xbf16>, vector<16x16xf32> -> vector<16x16xf32>
      %cst_137 = arith.constant dense<0xFF800000> : vector<16xf32>
      %373 = vector.multi_reduction <maximumf>, %372, %cst_137 [1] : vector<16x16xf32> to vector<16xf32>
      %374 = vector.shape_cast %373 : vector<16xf32> to vector<16x1xf32>
      %375 = vector.broadcast %374 : vector<16x1xf32> to vector<16x16xf32>
      %376 = arith.subf %372, %375 : vector<16x16xf32>
      %377 = math.exp %376 : vector<16x16xf32>
      %cst_138 = arith.constant dense<0.000000e+00> : vector<16xf32>
      %378 = vector.multi_reduction <add>, %377, %cst_138 [1] : vector<16x16xf32> to vector<16xf32>
      %379 = vector.shape_cast %378 : vector<16xf32> to vector<16x1xf32>
      %380 = tpu.reciprocal %379 {approx = true} : vector<16x1xf32> -> vector<16x1xf32>
      %381 = vector.broadcast %380 : vector<16x1xf32> to vector<16x16xf32>
      %382 = arith.mulf %377, %381 : vector<16x16xf32>
      %383 = arith.truncf %382 : vector<16x16xf32> to vector<16x16xbf16>
      %cst_139 = arith.constant dense<0.000000e+00> : vector<16x8xf32>
      %384 = tpu.matmul %383, %371, %cst_139 {dimension_numbers = #tpu.dot_dimension_numbers<[1], [0], [0], [1], [0, 0, 1, 1], [], []>} : vector<16x16xbf16>, vector<16x8xbf16>, vector<16x8xf32> -> vector<16x8xf32>
      %385 = arith.truncf %384 : vector<16x8xf32> to vector<16x8xbf16>
      %386 = vector.extract_strided_slice %269 {offsets = [0, 0], sizes = [8, 32], strides = [1, 1]} : vector<32x32xbf16> to vector<8x32xbf16>
      %cst_140 = arith.constant dense<0.000000e+00> : vector<16x32xf32>
      %387 = tpu.matmul %385, %386, %cst_140 {dimension_numbers = #tpu.dot_dimension_numbers<[1], [0], [0], [1], [0, 0, 1, 1], [], []>} : vector<16x8xbf16>, vector<8x32xbf16>, vector<16x32xf32> -> vector<16x32xf32>
      %388 = vector.extract_strided_slice %366 {offsets = [0, 8], sizes = [16, 8], strides = [1, 1]} : vector<16x32xbf16> to vector<16x8xbf16>
      %389 = vector.extract_strided_slice %367 {offsets = [0, 8], sizes = [16, 8], strides = [1, 1]} : vector<16x32xbf16> to vector<16x8xbf16>
      %390 = vector.extract_strided_slice %368 {offsets = [0, 8], sizes = [16, 8], strides = [1, 1]} : vector<16x32xbf16> to vector<16x8xbf16>
      %cst_141 = arith.constant dense<0.000000e+00> : vector<16x16xf32>
      %391 = tpu.matmul %388, %389, %cst_141 {dimension_numbers = #tpu.dot_dimension_numbers<[1], [1], [0], [0], [0, 0, 1, 0], [], []>} : vector<16x8xbf16>, vector<16x8xbf16>, vector<16x16xf32> -> vector<16x16xf32>
      %cst_142 = arith.constant dense<0xFF800000> : vector<16xf32>
      %392 = vector.multi_reduction <maximumf>, %391, %cst_142 [1] : vector<16x16xf32> to vector<16xf32>
      %393 = vector.shape_cast %392 : vector<16xf32> to vector<16x1xf32>
      %394 = vector.broadcast %393 : vector<16x1xf32> to vector<16x16xf32>
      %395 = arith.subf %391, %394 : vector<16x16xf32>
      %396 = math.exp %395 : vector<16x16xf32>
      %cst_143 = arith.constant dense<0.000000e+00> : vector<16xf32>
      %397 = vector.multi_reduction <add>, %396, %cst_143 [1] : vector<16x16xf32> to vector<16xf32>
      %398 = vector.shape_cast %397 : vector<16xf32> to vector<16x1xf32>
      %399 = tpu.reciprocal %398 {approx = true} : vector<16x1xf32> -> vector<16x1xf32>
      %400 = vector.broadcast %399 : vector<16x1xf32> to vector<16x16xf32>
      %401 = arith.mulf %396, %400 : vector<16x16xf32>
      %402 = arith.truncf %401 : vector<16x16xf32> to vector<16x16xbf16>
      %cst_144 = arith.constant dense<0.000000e+00> : vector<16x8xf32>
      %403 = tpu.matmul %402, %390, %cst_144 {dimension_numbers = #tpu.dot_dimension_numbers<[1], [0], [0], [1], [0, 0, 1, 1], [], []>} : vector<16x16xbf16>, vector<16x8xbf16>, vector<16x8xf32> -> vector<16x8xf32>
      %404 = arith.truncf %403 : vector<16x8xf32> to vector<16x8xbf16>
      %405 = vector.extract_strided_slice %269 {offsets = [8, 0], sizes = [8, 32], strides = [1, 1]} : vector<32x32xbf16> to vector<8x32xbf16>
      %cst_145 = arith.constant dense<0.000000e+00> : vector<16x32xf32>
      %406 = tpu.matmul %404, %405, %cst_145 {dimension_numbers = #tpu.dot_dimension_numbers<[1], [0], [0], [1], [0, 0, 1, 1], [], []>} : vector<16x8xbf16>, vector<8x32xbf16>, vector<16x32xf32> -> vector<16x32xf32>
      %407 = arith.addf %387, %406 : vector<16x32xf32>
      %408 = vector.extract_strided_slice %366 {offsets = [0, 16], sizes = [16, 8], strides = [1, 1]} : vector<16x32xbf16> to vector<16x8xbf16>
      %409 = vector.extract_strided_slice %367 {offsets = [0, 16], sizes = [16, 8], strides = [1, 1]} : vector<16x32xbf16> to vector<16x8xbf16>
      %410 = vector.extract_strided_slice %368 {offsets = [0, 16], sizes = [16, 8], strides = [1, 1]} : vector<16x32xbf16> to vector<16x8xbf16>
      %cst_146 = arith.constant dense<0.000000e+00> : vector<16x16xf32>
      %411 = tpu.matmul %408, %409, %cst_146 {dimension_numbers = #tpu.dot_dimension_numbers<[1], [1], [0], [0], [0, 0, 1, 0], [], []>} : vector<16x8xbf16>, vector<16x8xbf16>, vector<16x16xf32> -> vector<16x16xf32>
      %cst_147 = arith.constant dense<0xFF800000> : vector<16xf32>
      %412 = vector.multi_reduction <maximumf>, %411, %cst_147 [1] : vector<16x16xf32> to vector<16xf32>
      %413 = vector.shape_cast %412 : vector<16xf32> to vector<16x1xf32>
      %414 = vector.broadcast %413 : vector<16x1xf32> to vector<16x16xf32>
      %415 = arith.subf %411, %414 : vector<16x16xf32>
      %416 = math.exp %415 : vector<16x16xf32>
      %cst_148 = arith.constant dense<0.000000e+00> : vector<16xf32>
      %417 = vector.multi_reduction <add>, %416, %cst_148 [1] : vector<16x16xf32> to vector<16xf32>
      %418 = vector.shape_cast %417 : vector<16xf32> to vector<16x1xf32>
      %419 = tpu.reciprocal %418 {approx = true} : vector<16x1xf32> -> vector<16x1xf32>
      %420 = vector.broadcast %419 : vector<16x1xf32> to vector<16x16xf32>
      %421 = arith.mulf %416, %420 : vector<16x16xf32>
      %422 = arith.truncf %421 : vector<16x16xf32> to vector<16x16xbf16>
      %cst_149 = arith.constant dense<0.000000e+00> : vector<16x8xf32>
      %423 = tpu.matmul %422, %410, %cst_149 {dimension_numbers = #tpu.dot_dimension_numbers<[1], [0], [0], [1], [0, 0, 1, 1], [], []>} : vector<16x16xbf16>, vector<16x8xbf16>, vector<16x8xf32> -> vector<16x8xf32>
      %424 = arith.truncf %423 : vector<16x8xf32> to vector<16x8xbf16>
      %425 = vector.extract_strided_slice %269 {offsets = [16, 0], sizes = [8, 32], strides = [1, 1]} : vector<32x32xbf16> to vector<8x32xbf16>
      %cst_150 = arith.constant dense<0.000000e+00> : vector<16x32xf32>
      %426 = tpu.matmul %424, %425, %cst_150 {dimension_numbers = #tpu.dot_dimension_numbers<[1], [0], [0], [1], [0, 0, 1, 1], [], []>} : vector<16x8xbf16>, vector<8x32xbf16>, vector<16x32xf32> -> vector<16x32xf32>
      %427 = arith.addf %407, %426 : vector<16x32xf32>
      %428 = vector.extract_strided_slice %366 {offsets = [0, 24], sizes = [16, 8], strides = [1, 1]} : vector<16x32xbf16> to vector<16x8xbf16>
      %429 = vector.extract_strided_slice %367 {offsets = [0, 24], sizes = [16, 8], strides = [1, 1]} : vector<16x32xbf16> to vector<16x8xbf16>
      %430 = vector.extract_strided_slice %368 {offsets = [0, 24], sizes = [16, 8], strides = [1, 1]} : vector<16x32xbf16> to vector<16x8xbf16>
      %cst_151 = arith.constant dense<0.000000e+00> : vector<16x16xf32>
      %431 = tpu.matmul %428, %429, %cst_151 {dimension_numbers = #tpu.dot_dimension_numbers<[1], [1], [0], [0], [0, 0, 1, 0], [], []>} : vector<16x8xbf16>, vector<16x8xbf16>, vector<16x16xf32> -> vector<16x16xf32>
      %cst_152 = arith.constant dense<0xFF800000> : vector<16xf32>
      %432 = vector.multi_reduction <maximumf>, %431, %cst_152 [1] : vector<16x16xf32> to vector<16xf32>
      %433 = vector.shape_cast %432 : vector<16xf32> to vector<16x1xf32>
      %434 = vector.broadcast %433 : vector<16x1xf32> to vector<16x16xf32>
      %435 = arith.subf %431, %434 : vector<16x16xf32>
      %436 = math.exp %435 : vector<16x16xf32>
      %cst_153 = arith.constant dense<0.000000e+00> : vector<16xf32>
      %437 = vector.multi_reduction <add>, %436, %cst_153 [1] : vector<16x16xf32> to vector<16xf32>
      %438 = vector.shape_cast %437 : vector<16xf32> to vector<16x1xf32>
      %439 = tpu.reciprocal %438 {approx = true} : vector<16x1xf32> -> vector<16x1xf32>
      %440 = vector.broadcast %439 : vector<16x1xf32> to vector<16x16xf32>
      %441 = arith.mulf %436, %440 : vector<16x16xf32>
      %442 = arith.truncf %441 : vector<16x16xf32> to vector<16x16xbf16>
      %cst_154 = arith.constant dense<0.000000e+00> : vector<16x8xf32>
      %443 = tpu.matmul %442, %430, %cst_154 {dimension_numbers = #tpu.dot_dimension_numbers<[1], [0], [0], [1], [0, 0, 1, 1], [], []>} : vector<16x16xbf16>, vector<16x8xbf16>, vector<16x8xf32> -> vector<16x8xf32>
      %444 = arith.truncf %443 : vector<16x8xf32> to vector<16x8xbf16>
      %445 = vector.extract_strided_slice %269 {offsets = [24, 0], sizes = [8, 32], strides = [1, 1]} : vector<32x32xbf16> to vector<8x32xbf16>
      %cst_155 = arith.constant dense<0.000000e+00> : vector<16x32xf32>
      %446 = tpu.matmul %444, %445, %cst_155 {dimension_numbers = #tpu.dot_dimension_numbers<[1], [0], [0], [1], [0, 0, 1, 1], [], []>} : vector<16x8xbf16>, vector<8x32xbf16>, vector<16x32xf32> -> vector<16x32xf32>
      %447 = arith.addf %427, %446 : vector<16x32xf32>
      %448 = tpu.concatenate %365, %447 in 0 : vector<16x32xf32>, vector<16x32xf32> -> vector<32x32xf32>
      %449 = vector.broadcast %271 : vector<1x32xf32> to vector<32x32xf32>
      %450 = arith.addf %448, %449 : vector<32x32xf32>
      %451 = arith.addf %450, %265 : vector<32x32xf32>
      %cst_156 = arith.constant dense<0.000000e+00> : vector<32xf32>
      %452 = vector.multi_reduction <add>, %451, %cst_156 [1] : vector<32x32xf32> to vector<32xf32>
      %453 = vector.shape_cast %452 : vector<32xf32> to vector<32x1xf32>
      %cst_157 = arith.constant 3.200000e+01 : f32
      %454 = vector.broadcast %cst_157 : f32 to vector<32x1xf32>
      %455 = arith.divf %453, %454 : vector<32x1xf32>
      %456 = vector.broadcast %455 : vector<32x1xf32> to vector<32x32xf32>
      %457 = arith.subf %451, %456 : vector<32x32xf32>
      %458 = arith.mulf %457, %457 : vector<32x32xf32>
      %cst_158 = arith.constant dense<0.000000e+00> : vector<32xf32>
      %459 = vector.multi_reduction <add>, %458, %cst_158 [1] : vector<32x32xf32> to vector<32xf32>
      %460 = vector.shape_cast %459 : vector<32xf32> to vector<32x1xf32>
      %cst_159 = arith.constant 3.100000e+01 : f32
      %461 = vector.broadcast %cst_159 : f32 to vector<32x1xf32>
      %462 = arith.divf %460, %461 : vector<32x1xf32>
      %463 = vector.broadcast %455 : vector<32x1xf32> to vector<32x32xf32>
      %464 = arith.subf %451, %463 : vector<32x32xf32>
      %465 = math.sqrt %462 : vector<32x1xf32>
      %cst_160 = arith.constant 1.000000e-03 : f32
      %466 = vector.broadcast %cst_160 : f32 to vector<32x1xf32>
      %467 = arith.addf %465, %466 : vector<32x1xf32>
      %468 = vector.broadcast %467 : vector<32x1xf32> to vector<32x32xf32>
      %469 = arith.divf %464, %468 : vector<32x32xf32>
      %470 = vector.broadcast %273 : vector<1x32xf32> to vector<32x32xf32>
      %471 = arith.mulf %469, %470 : vector<32x32xf32>
      %472 = vector.broadcast %275 : vector<1x32xf32> to vector<32x32xf32>
      %473 = arith.addf %471, %472 : vector<32x32xf32>
      %c0_161 = arith.constant 0 : index
      %c0_162 = arith.constant 0 : index
      %474 = vector.load %arg21[%c0_161, %c0_162] : memref<32x32xf32, #tpu.memory_space<vmem>>, vector<32x32xf32>
      tpu.vector_store %arg21[%c0_161, %c0_162], %473 {strides = array<i32>} : memref<32x32xf32, #tpu.memory_space<vmem>>, vector<32x32xf32>,
    } else {
    }
    %c0 = arith.constant 0 : index
    %c0_3 = arith.constant 0 : index
    %6 = vector.load %arg21[%c0, %c0_3] : memref<32x32xf32, #tpu.memory_space<vmem>>, vector<32x32xf32>
    %c0_4 = arith.constant 0 : index
    %c0_5 = arith.constant 0 : index
    %7 = vector.load %arg3[%c0_4, %c0_5] : memref<16x32xf32, #tpu.memory_space<vmem>>, vector<16x32xf32>
    %8 = arith.truncf %7 : vector<16x32xf32> to vector<16x32xbf16>
    %c0_6 = arith.constant 0 : index
    %c0_7 = arith.constant 0 : index
    %c0_8 = arith.constant 0 : index
    %9 = vector.load %arg9[%c0_6, %c0_7, %c0_8] : memref<1x32x32xbf16, #tpu.memory_space<vmem>>, vector<1x32x32xbf16>
    %10 = vector.shape_cast %9 : vector<1x32x32xbf16> to vector<32x32xbf16>
    %c0_9 = arith.constant 0 : index
    %c0_10 = arith.constant 0 : index
    %c0_11 = arith.constant 0 : index
    %11 = vector.load %arg10[%c0_9, %c0_10, %c0_11] : memref<1x32x64xbf16, #tpu.memory_space<vmem>>, vector<1x32x64xbf16>
    %12 = vector.shape_cast %11 : vector<1x32x64xbf16> to vector<32x64xbf16>
    %c0_12 = arith.constant 0 : index
    %c0_13 = arith.constant 0 : index
    %c0_14 = arith.constant 0 : index
    %13 = vector.load %arg11[%c0_12, %c0_13, %c0_14] : memref<1x32x32xbf16, #tpu.memory_space<vmem>>, vector<1x32x32xbf16>
    %14 = vector.shape_cast %13 : vector<1x32x32xbf16> to vector<32x32xbf16>
    %c0_15 = arith.constant 0 : index
    %c0_16 = arith.constant 0 : index
    %c0_17 = arith.constant 0 : index
    %15 = vector.load %arg12[%c0_15, %c0_16, %c0_17] : memref<1x1x32xf32, #tpu.memory_space<vmem>>, vector<1x1x32xf32>
    %16 = vector.shape_cast %15 : vector<1x1x32xf32> to vector<1x32xf32>
    %c0_18 = arith.constant 0 : index
    %c0_19 = arith.constant 0 : index
    %c0_20 = arith.constant 0 : index
    %17 = vector.load %arg13[%c0_18, %c0_19, %c0_20] : memref<1x1x32xf32, #tpu.memory_space<vmem>>, vector<1x1x32xf32>
    %18 = vector.shape_cast %17 : vector<1x1x32xf32> to vector<1x32xf32>
    %c0_21 = arith.constant 0 : index
    %c0_22 = arith.constant 0 : index
    %c0_23 = arith.constant 0 : index
    %19 = vector.load %arg14[%c0_21, %c0_22, %c0_23] : memref<1x1x32xf32, #tpu.memory_space<vmem>>, vector<1x1x32xf32>
    %20 = vector.shape_cast %19 : vector<1x1x32xf32> to vector<1x32xf32>
    %21 = arith.truncf %6 : vector<32x32xf32> to vector<32x32xbf16>
    %cst = arith.constant dense<0.000000e+00> : vector<32x32xf32>
    %22 = tpu.matmul %21, %10, %cst {dimension_numbers = #tpu.dot_dimension_numbers<[1], [0], [0], [1], [0, 0, 1, 1], [], []>} : vector<32x32xbf16>, vector<32x32xbf16>, vector<32x32xf32> -> vector<32x32xf32>
    %cst_24 = arith.constant dense<0.000000e+00> : vector<16x64xf32>
    %23 = tpu.matmul %8, %12, %cst_24 {dimension_numbers = #tpu.dot_dimension_numbers<[1], [0], [0], [1], [0, 0, 1, 1], [], []>} : vector<16x32xbf16>, vector<32x64xbf16>, vector<16x64xf32> -> vector<16x64xf32>
    %24 = vector.extract_strided_slice %23 {offsets = [0, 0], sizes = [16, 32], strides = [1, 1]} : vector<16x64xf32> to vector<16x32xf32>
    %25 = vector.extract_strided_slice %23 {offsets = [0, 32], sizes = [16, 32], strides = [1, 1]} : vector<16x64xf32> to vector<16x32xf32>
    %26 = arith.truncf %22 : vector<32x32xf32> to vector<32x32xbf16>
    %27 = arith.truncf %24 : vector<16x32xf32> to vector<16x32xbf16>
    %28 = arith.truncf %25 : vector<16x32xf32> to vector<16x32xbf16>
    %29 = vector.extract_strided_slice %26 {offsets = [0, 0], sizes = [16, 32], strides = [1, 1]} : vector<32x32xbf16> to vector<16x32xbf16>
    %30 = vector.extract_strided_slice %27 {offsets = [0, 0], sizes = [8, 32], strides = [1, 1]} : vector<16x32xbf16> to vector<8x32xbf16>
    %31 = vector.extract_strided_slice %28 {offsets = [0, 0], sizes = [8, 32], strides = [1, 1]} : vector<16x32xbf16> to vector<8x32xbf16>
    %32 = vector.extract_strided_slice %29 {offsets = [0, 0], sizes = [16, 8], strides = [1, 1]} : vector<16x32xbf16> to vector<16x8xbf16>
    %33 = vector.extract_strided_slice %30 {offsets = [0, 0], sizes = [8, 8], strides = [1, 1]} : vector<8x32xbf16> to vector<8x8xbf16>
    %34 = vector.extract_strided_slice %31 {offsets = [0, 0], sizes = [8, 8], strides = [1, 1]} : vector<8x32xbf16> to vector<8x8xbf16>
    %cst_25 = arith.constant dense<0.000000e+00> : vector<16x8xf32>
    %35 = tpu.matmul %32, %33, %cst_25 {dimension_numbers = #tpu.dot_dimension_numbers<[1], [1], [0], [0], [0, 0, 1, 0], [], []>} : vector<16x8xbf16>, vector<8x8xbf16>, vector<16x8xf32> -> vector<16x8xf32>
    %cst_26 = arith.constant dense<0xFF800000> : vector<16xf32>
    %36 = vector.multi_reduction <maximumf>, %35, %cst_26 [1] : vector<16x8xf32> to vector<16xf32>
    %37 = vector.shape_cast %36 : vector<16xf32> to vector<16x1xf32>
    %38 = vector.broadcast %37 : vector<16x1xf32> to vector<16x8xf32>
    %39 = arith.subf %35, %38 : vector<16x8xf32>
    %40 = math.exp %39 : vector<16x8xf32>
    %cst_27 = arith.constant dense<0.000000e+00> : vector<16xf32>
    %41 = vector.multi_reduction <add>, %40, %cst_27 [1] : vector<16x8xf32> to vector<16xf32>
    %42 = vector.shape_cast %41 : vector<16xf32> to vector<16x1xf32>
    %43 = tpu.reciprocal %42 {approx = true} : vector<16x1xf32> -> vector<16x1xf32>
    %44 = vector.broadcast %43 : vector<16x1xf32> to vector<16x8xf32>
    %45 = arith.mulf %40, %44 : vector<16x8xf32>
    %46 = arith.truncf %45 : vector<16x8xf32> to vector<16x8xbf16>
    %cst_28 = arith.constant dense<0.000000e+00> : vector<16x8xf32>
    %47 = tpu.matmul %46, %34, %cst_28 {dimension_numbers = #tpu.dot_dimension_numbers<[1], [0], [0], [1], [0, 0, 1, 1], [], []>} : vector<16x8xbf16>, vector<8x8xbf16>, vector<16x8xf32> -> vector<16x8xf32>
    %48 = arith.truncf %47 : vector<16x8xf32> to vector<16x8xbf16>
    %49 = vector.extract_strided_slice %14 {offsets = [0, 0], sizes = [8, 32], strides = [1, 1]} : vector<32x32xbf16> to vector<8x32xbf16>
    %cst_29 = arith.constant dense<0.000000e+00> : vector<16x32xf32>
    %50 = tpu.matmul %48, %49, %cst_29 {dimension_numbers = #tpu.dot_dimension_numbers<[1], [0], [0], [1], [0, 0, 1, 1], [], []>} : vector<16x8xbf16>, vector<8x32xbf16>, vector<16x32xf32> -> vector<16x32xf32>
    %51 = vector.extract_strided_slice %29 {offsets = [0, 8], sizes = [16, 8], strides = [1, 1]} : vector<16x32xbf16> to vector<16x8xbf16>
    %52 = vector.extract_strided_slice %30 {offsets = [0, 8], sizes = [8, 8], strides = [1, 1]} : vector<8x32xbf16> to vector<8x8xbf16>
    %53 = vector.extract_strided_slice %31 {offsets = [0, 8], sizes = [8, 8], strides = [1, 1]} : vector<8x32xbf16> to vector<8x8xbf16>
    %cst_30 = arith.constant dense<0.000000e+00> : vector<16x8xf32>
    %54 = tpu.matmul %51, %52, %cst_30 {dimension_numbers = #tpu.dot_dimension_numbers<[1], [1], [0], [0], [0, 0, 1, 0], [], []>} : vector<16x8xbf16>, vector<8x8xbf16>, vector<16x8xf32> -> vector<16x8xf32>
    %cst_31 = arith.constant dense<0xFF800000> : vector<16xf32>
    %55 = vector.multi_reduction <maximumf>, %54, %cst_31 [1] : vector<16x8xf32> to vector<16xf32>
    %56 = vector.shape_cast %55 : vector<16xf32> to vector<16x1xf32>
    %57 = vector.broadcast %56 : vector<16x1xf32> to vector<16x8xf32>
    %58 = arith.subf %54, %57 : vector<16x8xf32>
    %59 = math.exp %58 : vector<16x8xf32>
    %cst_32 = arith.constant dense<0.000000e+00> : vector<16xf32>
    %60 = vector.multi_reduction <add>, %59, %cst_32 [1] : vector<16x8xf32> to vector<16xf32>
    %61 = vector.shape_cast %60 : vector<16xf32> to vector<16x1xf32>
    %62 = tpu.reciprocal %61 {approx = true} : vector<16x1xf32> -> vector<16x1xf32>
    %63 = vector.broadcast %62 : vector<16x1xf32> to vector<16x8xf32>
    %64 = arith.mulf %59, %63 : vector<16x8xf32>
    %65 = arith.truncf %64 : vector<16x8xf32> to vector<16x8xbf16>
    %cst_33 = arith.constant dense<0.000000e+00> : vector<16x8xf32>
    %66 = tpu.matmul %65, %53, %cst_33 {dimension_numbers = #tpu.dot_dimension_numbers<[1], [0], [0], [1], [0, 0, 1, 1], [], []>} : vector<16x8xbf16>, vector<8x8xbf16>, vector<16x8xf32> -> vector<16x8xf32>
    %67 = arith.truncf %66 : vector<16x8xf32> to vector<16x8xbf16>
    %68 = vector.extract_strided_slice %14 {offsets = [8, 0], sizes = [8, 32], strides = [1, 1]} : vector<32x32xbf16> to vector<8x32xbf16>
    %cst_34 = arith.constant dense<0.000000e+00> : vector<16x32xf32>
    %69 = tpu.matmul %67, %68, %cst_34 {dimension_numbers = #tpu.dot_dimension_numbers<[1], [0], [0], [1], [0, 0, 1, 1], [], []>} : vector<16x8xbf16>, vector<8x32xbf16>, vector<16x32xf32> -> vector<16x32xf32>
    %70 = arith.addf %50, %69 : vector<16x32xf32>
    %71 = vector.extract_strided_slice %29 {offsets = [0, 16], sizes = [16, 8], strides = [1, 1]} : vector<16x32xbf16> to vector<16x8xbf16>
    %72 = vector.extract_strided_slice %30 {offsets = [0, 16], sizes = [8, 8], strides = [1, 1]} : vector<8x32xbf16> to vector<8x8xbf16>
    %73 = vector.extract_strided_slice %31 {offsets = [0, 16], sizes = [8, 8], strides = [1, 1]} : vector<8x32xbf16> to vector<8x8xbf16>
    %cst_35 = arith.constant dense<0.000000e+00> : vector<16x8xf32>
    %74 = tpu.matmul %71, %72, %cst_35 {dimension_numbers = #tpu.dot_dimension_numbers<[1], [1], [0], [0], [0, 0, 1, 0], [], []>} : vector<16x8xbf16>, vector<8x8xbf16>, vector<16x8xf32> -> vector<16x8xf32>
    %cst_36 = arith.constant dense<0xFF800000> : vector<16xf32>
    %75 = vector.multi_reduction <maximumf>, %74, %cst_36 [1] : vector<16x8xf32> to vector<16xf32>
    %76 = vector.shape_cast %75 : vector<16xf32> to vector<16x1xf32>
    %77 = vector.broadcast %76 : vector<16x1xf32> to vector<16x8xf32>
    %78 = arith.subf %74, %77 : vector<16x8xf32>
    %79 = math.exp %78 : vector<16x8xf32>
    %cst_37 = arith.constant dense<0.000000e+00> : vector<16xf32>
    %80 = vector.multi_reduction <add>, %79, %cst_37 [1] : vector<16x8xf32> to vector<16xf32>
    %81 = vector.shape_cast %80 : vector<16xf32> to vector<16x1xf32>
    %82 = tpu.reciprocal %81 {approx = true} : vector<16x1xf32> -> vector<16x1xf32>
    %83 = vector.broadcast %82 : vector<16x1xf32> to vector<16x8xf32>
    %84 = arith.mulf %79, %83 : vector<16x8xf32>
    %85 = arith.truncf %84 : vector<16x8xf32> to vector<16x8xbf16>
    %cst_38 = arith.constant dense<0.000000e+00> : vector<16x8xf32>
    %86 = tpu.matmul %85, %73, %cst_38 {dimension_numbers = #tpu.dot_dimension_numbers<[1], [0], [0], [1], [0, 0, 1, 1], [], []>} : vector<16x8xbf16>, vector<8x8xbf16>, vector<16x8xf32> -> vector<16x8xf32>
    %87 = arith.truncf %86 : vector<16x8xf32> to vector<16x8xbf16>
    %88 = vector.extract_strided_slice %14 {offsets = [16, 0], sizes = [8, 32], strides = [1, 1]} : vector<32x32xbf16> to vector<8x32xbf16>
    %cst_39 = arith.constant dense<0.000000e+00> : vector<16x32xf32>
    %89 = tpu.matmul %87, %88, %cst_39 {dimension_numbers = #tpu.dot_dimension_numbers<[1], [0], [0], [1], [0, 0, 1, 1], [], []>} : vector<16x8xbf16>, vector<8x32xbf16>, vector<16x32xf32> -> vector<16x32xf32>
    %90 = arith.addf %70, %89 : vector<16x32xf32>
    %91 = vector.extract_strided_slice %29 {offsets = [0, 24], sizes = [16, 8], strides = [1, 1]} : vector<16x32xbf16> to vector<16x8xbf16>
    %92 = vector.extract_strided_slice %30 {offsets = [0, 24], sizes = [8, 8], strides = [1, 1]} : vector<8x32xbf16> to vector<8x8xbf16>
    %93 = vector.extract_strided_slice %31 {offsets = [0, 24], sizes = [8, 8], strides = [1, 1]} : vector<8x32xbf16> to vector<8x8xbf16>
    %cst_40 = arith.constant dense<0.000000e+00> : vector<16x8xf32>
    %94 = tpu.matmul %91, %92, %cst_40 {dimension_numbers = #tpu.dot_dimension_numbers<[1], [1], [0], [0], [0, 0, 1, 0], [], []>} : vector<16x8xbf16>, vector<8x8xbf16>, vector<16x8xf32> -> vector<16x8xf32>
    %cst_41 = arith.constant dense<0xFF800000> : vector<16xf32>
    %95 = vector.multi_reduction <maximumf>, %94, %cst_41 [1] : vector<16x8xf32> to vector<16xf32>
    %96 = vector.shape_cast %95 : vector<16xf32> to vector<16x1xf32>
    %97 = vector.broadcast %96 : vector<16x1xf32> to vector<16x8xf32>
    %98 = arith.subf %94, %97 : vector<16x8xf32>
    %99 = math.exp %98 : vector<16x8xf32>
    %cst_42 = arith.constant dense<0.000000e+00> : vector<16xf32>
    %100 = vector.multi_reduction <add>, %99, %cst_42 [1] : vector<16x8xf32> to vector<16xf32>
    %101 = vector.shape_cast %100 : vector<16xf32> to vector<16x1xf32>
    %102 = tpu.reciprocal %101 {approx = true} : vector<16x1xf32> -> vector<16x1xf32>
    %103 = vector.broadcast %102 : vector<16x1xf32> to vector<16x8xf32>
    %104 = arith.mulf %99, %103 : vector<16x8xf32>
    %105 = arith.truncf %104 : vector<16x8xf32> to vector<16x8xbf16>
    %cst_43 = arith.constant dense<0.000000e+00> : vector<16x8xf32>
    %106 = tpu.matmul %105, %93, %cst_43 {dimension_numbers = #tpu.dot_dimension_numbers<[1], [0], [0], [1], [0, 0, 1, 1], [], []>} : vector<16x8xbf16>, vector<8x8xbf16>, vector<16x8xf32> -> vector<16x8xf32>
    %107 = arith.truncf %106 : vector<16x8xf32> to vector<16x8xbf16>
    %108 = vector.extract_strided_slice %14 {offsets = [24, 0], sizes = [8, 32], strides = [1, 1]} : vector<32x32xbf16> to vector<8x32xbf16>
    %cst_44 = arith.constant dense<0.000000e+00> : vector<16x32xf32>
    %109 = tpu.matmul %107, %108, %cst_44 {dimension_numbers = #tpu.dot_dimension_numbers<[1], [0], [0], [1], [0, 0, 1, 1], [], []>} : vector<16x8xbf16>, vector<8x32xbf16>, vector<16x32xf32> -> vector<16x32xf32>
    %110 = arith.addf %90, %109 : vector<16x32xf32>
    %111 = vector.extract_strided_slice %26 {offsets = [16, 0], sizes = [16, 32], strides = [1, 1]} : vector<32x32xbf16> to vector<16x32xbf16>
    %112 = vector.extract_strided_slice %27 {offsets = [8, 0], sizes = [8, 32], strides = [1, 1]} : vector<16x32xbf16> to vector<8x32xbf16>
    %113 = vector.extract_strided_slice %28 {offsets = [8, 0], sizes = [8, 32], strides = [1, 1]} : vector<16x32xbf16> to vector<8x32xbf16>
    %114 = vector.extract_strided_slice %111 {offsets = [0, 0], sizes = [16, 8], strides = [1, 1]} : vector<16x32xbf16> to vector<16x8xbf16>
    %115 = vector.extract_strided_slice %112 {offsets = [0, 0], sizes = [8, 8], strides = [1, 1]} : vector<8x32xbf16> to vector<8x8xbf16>
    %116 = vector.extract_strided_slice %113 {offsets = [0, 0], sizes = [8, 8], strides = [1, 1]} : vector<8x32xbf16> to vector<8x8xbf16>
    %cst_45 = arith.constant dense<0.000000e+00> : vector<16x8xf32>
    %117 = tpu.matmul %114, %115, %cst_45 {dimension_numbers = #tpu.dot_dimension_numbers<[1], [1], [0], [0], [0, 0, 1, 0], [], []>} : vector<16x8xbf16>, vector<8x8xbf16>, vector<16x8xf32> -> vector<16x8xf32>
    %cst_46 = arith.constant dense<0xFF800000> : vector<16xf32>
    %118 = vector.multi_reduction <maximumf>, %117, %cst_46 [1] : vector<16x8xf32> to vector<16xf32>
    %119 = vector.shape_cast %118 : vector<16xf32> to vector<16x1xf32>
    %120 = vector.broadcast %119 : vector<16x1xf32> to vector<16x8xf32>
    %121 = arith.subf %117, %120 : vector<16x8xf32>
    %122 = math.exp %121 : vector<16x8xf32>
    %cst_47 = arith.constant dense<0.000000e+00> : vector<16xf32>
    %123 = vector.multi_reduction <add>, %122, %cst_47 [1] : vector<16x8xf32> to vector<16xf32>
    %124 = vector.shape_cast %123 : vector<16xf32> to vector<16x1xf32>
    %125 = tpu.reciprocal %124 {approx = true} : vector<16x1xf32> -> vector<16x1xf32>
    %126 = vector.broadcast %125 : vector<16x1xf32> to vector<16x8xf32>
    %127 = arith.mulf %122, %126 : vector<16x8xf32>
    %128 = arith.truncf %127 : vector<16x8xf32> to vector<16x8xbf16>
    %cst_48 = arith.constant dense<0.000000e+00> : vector<16x8xf32>
    %129 = tpu.matmul %128, %116, %cst_48 {dimension_numbers = #tpu.dot_dimension_numbers<[1], [0], [0], [1], [0, 0, 1, 1], [], []>} : vector<16x8xbf16>, vector<8x8xbf16>, vector<16x8xf32> -> vector<16x8xf32>
    %130 = arith.truncf %129 : vector<16x8xf32> to vector<16x8xbf16>
    %131 = vector.extract_strided_slice %14 {offsets = [0, 0], sizes = [8, 32], strides = [1, 1]} : vector<32x32xbf16> to vector<8x32xbf16>
    %cst_49 = arith.constant dense<0.000000e+00> : vector<16x32xf32>
    %132 = tpu.matmul %130, %131, %cst_49 {dimension_numbers = #tpu.dot_dimension_numbers<[1], [0], [0], [1], [0, 0, 1, 1], [], []>} : vector<16x8xbf16>, vector<8x32xbf16>, vector<16x32xf32> -> vector<16x32xf32>
    %133 = vector.extract_strided_slice %111 {offsets = [0, 8], sizes = [16, 8], strides = [1, 1]} : vector<16x32xbf16> to vector<16x8xbf16>
    %134 = vector.extract_strided_slice %112 {offsets = [0, 8], sizes = [8, 8], strides = [1, 1]} : vector<8x32xbf16> to vector<8x8xbf16>
    %135 = vector.extract_strided_slice %113 {offsets = [0, 8], sizes = [8, 8], strides = [1, 1]} : vector<8x32xbf16> to vector<8x8xbf16>
    %cst_50 = arith.constant dense<0.000000e+00> : vector<16x8xf32>
    %136 = tpu.matmul %133, %134, %cst_50 {dimension_numbers = #tpu.dot_dimension_numbers<[1], [1], [0], [0], [0, 0, 1, 0], [], []>} : vector<16x8xbf16>, vector<8x8xbf16>, vector<16x8xf32> -> vector<16x8xf32>
    %cst_51 = arith.constant dense<0xFF800000> : vector<16xf32>
    %137 = vector.multi_reduction <maximumf>, %136, %cst_51 [1] : vector<16x8xf32> to vector<16xf32>
    %138 = vector.shape_cast %137 : vector<16xf32> to vector<16x1xf32>
    %139 = vector.broadcast %138 : vector<16x1xf32> to vector<16x8xf32>
    %140 = arith.subf %136, %139 : vector<16x8xf32>
    %141 = math.exp %140 : vector<16x8xf32>
    %cst_52 = arith.constant dense<0.000000e+00> : vector<16xf32>
    %142 = vector.multi_reduction <add>, %141, %cst_52 [1] : vector<16x8xf32> to vector<16xf32>
    %143 = vector.shape_cast %142 : vector<16xf32> to vector<16x1xf32>
    %144 = tpu.reciprocal %143 {approx = true} : vector<16x1xf32> -> vector<16x1xf32>
    %145 = vector.broadcast %144 : vector<16x1xf32> to vector<16x8xf32>
    %146 = arith.mulf %141, %145 : vector<16x8xf32>
    %147 = arith.truncf %146 : vector<16x8xf32> to vector<16x8xbf16>
    %cst_53 = arith.constant dense<0.000000e+00> : vector<16x8xf32>
    %148 = tpu.matmul %147, %135, %cst_53 {dimension_numbers = #tpu.dot_dimension_numbers<[1], [0], [0], [1], [0, 0, 1, 1], [], []>} : vector<16x8xbf16>, vector<8x8xbf16>, vector<16x8xf32> -> vector<16x8xf32>
    %149 = arith.truncf %148 : vector<16x8xf32> to vector<16x8xbf16>
    %150 = vector.extract_strided_slice %14 {offsets = [8, 0], sizes = [8, 32], strides = [1, 1]} : vector<32x32xbf16> to vector<8x32xbf16>
    %cst_54 = arith.constant dense<0.000000e+00> : vector<16x32xf32>
    %151 = tpu.matmul %149, %150, %cst_54 {dimension_numbers = #tpu.dot_dimension_numbers<[1], [0], [0], [1], [0, 0, 1, 1], [], []>} : vector<16x8xbf16>, vector<8x32xbf16>, vector<16x32xf32> -> vector<16x32xf32>
    %152 = arith.addf %132, %151 : vector<16x32xf32>
    %153 = vector.extract_strided_slice %111 {offsets = [0, 16], sizes = [16, 8], strides = [1, 1]} : vector<16x32xbf16> to vector<16x8xbf16>
    %154 = vector.extract_strided_slice %112 {offsets = [0, 16], sizes = [8, 8], strides = [1, 1]} : vector<8x32xbf16> to vector<8x8xbf16>
    %155 = vector.extract_strided_slice %113 {offsets = [0, 16], sizes = [8, 8], strides = [1, 1]} : vector<8x32xbf16> to vector<8x8xbf16>
    %cst_55 = arith.constant dense<0.000000e+00> : vector<16x8xf32>
    %156 = tpu.matmul %153, %154, %cst_55 {dimension_numbers = #tpu.dot_dimension_numbers<[1], [1], [0], [0], [0, 0, 1, 0], [], []>} : vector<16x8xbf16>, vector<8x8xbf16>, vector<16x8xf32> -> vector<16x8xf32>
    %cst_56 = arith.constant dense<0xFF800000> : vector<16xf32>
    %157 = vector.multi_reduction <maximumf>, %156, %cst_56 [1] : vector<16x8xf32> to vector<16xf32>
    %158 = vector.shape_cast %157 : vector<16xf32> to vector<16x1xf32>
    %159 = vector.broadcast %158 : vector<16x1xf32> to vector<16x8xf32>
    %160 = arith.subf %156, %159 : vector<16x8xf32>
    %161 = math.exp %160 : vector<16x8xf32>
    %cst_57 = arith.constant dense<0.000000e+00> : vector<16xf32>
    %162 = vector.multi_reduction <add>, %161, %cst_57 [1] : vector<16x8xf32> to vector<16xf32>
    %163 = vector.shape_cast %162 : vector<16xf32> to vector<16x1xf32>
    %164 = tpu.reciprocal %163 {approx = true} : vector<16x1xf32> -> vector<16x1xf32>
    %165 = vector.broadcast %164 : vector<16x1xf32> to vector<16x8xf32>
    %166 = arith.mulf %161, %165 : vector<16x8xf32>
    %167 = arith.truncf %166 : vector<16x8xf32> to vector<16x8xbf16>
    %cst_58 = arith.constant dense<0.000000e+00> : vector<16x8xf32>
    %168 = tpu.matmul %167, %155, %cst_58 {dimension_numbers = #tpu.dot_dimension_numbers<[1], [0], [0], [1], [0, 0, 1, 1], [], []>} : vector<16x8xbf16>, vector<8x8xbf16>, vector<16x8xf32> -> vector<16x8xf32>
    %169 = arith.truncf %168 : vector<16x8xf32> to vector<16x8xbf16>
    %170 = vector.extract_strided_slice %14 {offsets = [16, 0], sizes = [8, 32], strides = [1, 1]} : vector<32x32xbf16> to vector<8x32xbf16>
    %cst_59 = arith.constant dense<0.000000e+00> : vector<16x32xf32>
    %171 = tpu.matmul %169, %170, %cst_59 {dimension_numbers = #tpu.dot_dimension_numbers<[1], [0], [0], [1], [0, 0, 1, 1], [], []>} : vector<16x8xbf16>, vector<8x32xbf16>, vector<16x32xf32> -> vector<16x32xf32>
    %172 = arith.addf %152, %171 : vector<16x32xf32>
    %173 = vector.extract_strided_slice %111 {offsets = [0, 24], sizes = [16, 8], strides = [1, 1]} : vector<16x32xbf16> to vector<16x8xbf16>
    %174 = vector.extract_strided_slice %112 {offsets = [0, 24], sizes = [8, 8], strides = [1, 1]} : vector<8x32xbf16> to vector<8x8xbf16>
    %175 = vector.extract_strided_slice %113 {offsets = [0, 24], sizes = [8, 8], strides = [1, 1]} : vector<8x32xbf16> to vector<8x8xbf16>
    %cst_60 = arith.constant dense<0.000000e+00> : vector<16x8xf32>
    %176 = tpu.matmul %173, %174, %cst_60 {dimension_numbers = #tpu.dot_dimension_numbers<[1], [1], [0], [0], [0, 0, 1, 0], [], []>} : vector<16x8xbf16>, vector<8x8xbf16>, vector<16x8xf32> -> vector<16x8xf32>
    %cst_61 = arith.constant dense<0xFF800000> : vector<16xf32>
    %177 = vector.multi_reduction <maximumf>, %176, %cst_61 [1] : vector<16x8xf32> to vector<16xf32>
    %178 = vector.shape_cast %177 : vector<16xf32> to vector<16x1xf32>
    %179 = vector.broadcast %178 : vector<16x1xf32> to vector<16x8xf32>
    %180 = arith.subf %176, %179 : vector<16x8xf32>
    %181 = math.exp %180 : vector<16x8xf32>
    %cst_62 = arith.constant dense<0.000000e+00> : vector<16xf32>
    %182 = vector.multi_reduction <add>, %181, %cst_62 [1] : vector<16x8xf32> to vector<16xf32>
    %183 = vector.shape_cast %182 : vector<16xf32> to vector<16x1xf32>
    %184 = tpu.reciprocal %183 {approx = true} : vector<16x1xf32> -> vector<16x1xf32>
    %185 = vector.broadcast %184 : vector<16x1xf32> to vector<16x8xf32>
    %186 = arith.mulf %181, %185 : vector<16x8xf32>
    %187 = arith.truncf %186 : vector<16x8xf32> to vector<16x8xbf16>
    %cst_63 = arith.constant dense<0.000000e+00> : vector<16x8xf32>
    %188 = tpu.matmul %187, %175, %cst_63 {dimension_numbers = #tpu.dot_dimension_numbers<[1], [0], [0], [1], [0, 0, 1, 1], [], []>} : vector<16x8xbf16>, vector<8x8xbf16>, vector<16x8xf32> -> vector<16x8xf32>
    %189 = arith.truncf %188 : vector<16x8xf32> to vector<16x8xbf16>
    %190 = vector.extract_strided_slice %14 {offsets = [24, 0], sizes = [8, 32], strides = [1, 1]} : vector<32x32xbf16> to vector<8x32xbf16>
    %cst_64 = arith.constant dense<0.000000e+00> : vector<16x32xf32>
    %191 = tpu.matmul %189, %190, %cst_64 {dimension_numbers = #tpu.dot_dimension_numbers<[1], [0], [0], [1], [0, 0, 1, 1], [], []>} : vector<16x8xbf16>, vector<8x32xbf16>, vector<16x32xf32> -> vector<16x32xf32>
    %192 = arith.addf %172, %191 : vector<16x32xf32>
    %193 = tpu.concatenate %110, %192 in 0 : vector<16x32xf32>, vector<16x32xf32> -> vector<32x32xf32>
    %194 = vector.broadcast %16 : vector<1x32xf32> to vector<32x32xf32>
    %195 = arith.addf %193, %194 : vector<32x32xf32>
    %196 = arith.addf %195, %6 : vector<32x32xf32>
    %cst_65 = arith.constant dense<0.000000e+00> : vector<32xf32>
    %197 = vector.multi_reduction <add>, %196, %cst_65 [1] : vector<32x32xf32> to vector<32xf32>
    %198 = vector.shape_cast %197 : vector<32xf32> to vector<32x1xf32>
    %cst_66 = arith.constant 3.200000e+01 : f32
    %199 = vector.broadcast %cst_66 : f32 to vector<32x1xf32>
    %200 = arith.divf %198, %199 : vector<32x1xf32>
    %201 = vector.broadcast %200 : vector<32x1xf32> to vector<32x32xf32>
    %202 = arith.subf %196, %201 : vector<32x32xf32>
    %203 = arith.mulf %202, %202 : vector<32x32xf32>
    %cst_67 = arith.constant dense<0.000000e+00> : vector<32xf32>
    %204 = vector.multi_reduction <add>, %203, %cst_67 [1] : vector<32x32xf32> to vector<32xf32>
    %205 = vector.shape_cast %204 : vector<32xf32> to vector<32x1xf32>
    %cst_68 = arith.constant 3.100000e+01 : f32
    %206 = vector.broadcast %cst_68 : f32 to vector<32x1xf32>
    %207 = arith.divf %205, %206 : vector<32x1xf32>
    %208 = vector.broadcast %200 : vector<32x1xf32> to vector<32x32xf32>
    %209 = arith.subf %196, %208 : vector<32x32xf32>
    %210 = math.sqrt %207 : vector<32x1xf32>
    %cst_69 = arith.constant 1.000000e-03 : f32
    %211 = vector.broadcast %cst_69 : f32 to vector<32x1xf32>
    %212 = arith.addf %210, %211 : vector<32x1xf32>
    %213 = vector.broadcast %212 : vector<32x1xf32> to vector<32x32xf32>
    %214 = arith.divf %209, %213 : vector<32x32xf32>
    %215 = vector.broadcast %18 : vector<1x32xf32> to vector<32x32xf32>
    %216 = arith.mulf %214, %215 : vector<32x32xf32>
    %217 = vector.broadcast %20 : vector<1x32xf32> to vector<32x32xf32>
    %218 = arith.addf %216, %217 : vector<32x32xf32>
    %c0_70 = arith.constant 0 : index
    %c0_71 = arith.constant 0 : index
    %c0_72 = arith.constant 0 : index
    %219 = vector.load %arg15[%c0_70, %c0_71, %c0_72] : memref<1x32x64xbf16, #tpu.memory_space<vmem>>, vector<1x32x64xbf16>
    %220 = vector.shape_cast %219 : vector<1x32x64xbf16> to vector<32x64xbf16>
    %c0_73 = arith.constant 0 : index
    %c0_74 = arith.constant 0 : index
    %c0_75 = arith.constant 0 : index
    %221 = vector.load %arg16[%c0_73, %c0_74, %c0_75] : memref<1x1x64xf32, #tpu.memory_space<vmem>>, vector<1x1x64xf32>
    %222 = vector.shape_cast %221 : vector<1x1x64xf32> to vector<1x64xf32>
    %c0_76 = arith.constant 0 : index
    %c0_77 = arith.constant 0 : index
    %c0_78 = arith.constant 0 : index
    %223 = vector.load %arg17[%c0_76, %c0_77, %c0_78] : memref<1x64x32xbf16, #tpu.memory_space<vmem>>, vector<1x64x32xbf16>
    %224 = vector.shape_cast %223 : vector<1x64x32xbf16> to vector<64x32xbf16>
    %c0_79 = arith.constant 0 : index
    %c0_80 = arith.constant 0 : index
    %c0_81 = arith.constant 0 : index
    %225 = vector.load %arg18[%c0_79, %c0_80, %c0_81] : memref<1x1x32xf32, #tpu.memory_space<vmem>>, vector<1x1x32xf32>
    %226 = vector.shape_cast %225 : vector<1x1x32xf32> to vector<1x32xf32>
    %c0_82 = arith.constant 0 : index
    %c0_83 = arith.constant 0 : index
    %c0_84 = arith.constant 0 : index
    %227 = vector.load %arg19[%c0_82, %c0_83, %c0_84] : memref<1x1x32xf32, #tpu.memory_space<vmem>>, vector<1x1x32xf32>
    %228 = vector.shape_cast %227 : vector<1x1x32xf32> to vector<1x32xf32>
    %c0_85 = arith.constant 0 : index
    %c0_86 = arith.constant 0 : index
    %c0_87 = arith.constant 0 : index
    %229 = vector.load %arg20[%c0_85, %c0_86, %c0_87] : memref<1x1x32xf32, #tpu.memory_space<vmem>>, vector<1x1x32xf32>
    %230 = vector.shape_cast %229 : vector<1x1x32xf32> to vector<1x32xf32>
    %231 = arith.truncf %218 : vector<32x32xf32> to vector<32x32xbf16>
    %cst_88 = arith.constant dense<0.000000e+00> : vector<32x64xf32>
    %232 = tpu.matmul %231, %220, %cst_88 {dimension_numbers = #tpu.dot_dimension_numbers<[1], [0], [0], [1], [0, 0, 1, 1], [], []>} : vector<32x32xbf16>, vector<32x64xbf16>, vector<32x64xf32> -> vector<32x64xf32>
    %233 = vector.broadcast %222 : vector<1x64xf32> to vector<32x64xf32>
    %234 = arith.addf %232, %233 : vector<32x64xf32>
    %cst_89 = arith.constant 0.000000e+00 : f32
    %235 = vector.broadcast %cst_89 : f32 to vector<32x64xf32>
    %236 = arith.maximumf %234, %235 : vector<32x64xf32>
    %237 = arith.truncf %236 : vector<32x64xf32> to vector<32x64xbf16>
    %cst_90 = arith.constant dense<0.000000e+00> : vector<32x32xf32>
    %238 = tpu.matmul %237, %224, %cst_90 {dimension_numbers = #tpu.dot_dimension_numbers<[1], [0], [0], [1], [0, 0, 1, 1], [], []>} : vector<32x64xbf16>, vector<64x32xbf16>, vector<32x32xf32> -> vector<32x32xf32>
    %239 = vector.broadcast %226 : vector<1x32xf32> to vector<32x32xf32>
    %240 = arith.addf %238, %239 : vector<32x32xf32>
    %241 = arith.addf %240, %218 : vector<32x32xf32>
    %cst_91 = arith.constant dense<0.000000e+00> : vector<32xf32>
    %242 = vector.multi_reduction <add>, %241, %cst_91 [1] : vector<32x32xf32> to vector<32xf32>
    %243 = vector.shape_cast %242 : vector<32xf32> to vector<32x1xf32>
    %cst_92 = arith.constant 3.200000e+01 : f32
    %244 = vector.broadcast %cst_92 : f32 to vector<32x1xf32>
    %245 = arith.divf %243, %244 : vector<32x1xf32>
    %246 = vector.broadcast %245 : vector<32x1xf32> to vector<32x32xf32>
    %247 = arith.subf %241, %246 : vector<32x32xf32>
    %248 = arith.mulf %247, %247 : vector<32x32xf32>
    %cst_93 = arith.constant dense<0.000000e+00> : vector<32xf32>
    %249 = vector.multi_reduction <add>, %248, %cst_93 [1] : vector<32x32xf32> to vector<32xf32>
    %250 = vector.shape_cast %249 : vector<32xf32> to vector<32x1xf32>
    %cst_94 = arith.constant 3.100000e+01 : f32
    %251 = vector.broadcast %cst_94 : f32 to vector<32x1xf32>
    %252 = arith.divf %250, %251 : vector<32x1xf32>
    %253 = vector.broadcast %245 : vector<32x1xf32> to vector<32x32xf32>
    %254 = arith.subf %241, %253 : vector<32x32xf32>
    %255 = math.sqrt %252 : vector<32x1xf32>
    %cst_95 = arith.constant 1.000000e-03 : f32
    %256 = vector.broadcast %cst_95 : f32 to vector<32x1xf32>
    %257 = arith.addf %255, %256 : vector<32x1xf32>
    %258 = vector.broadcast %257 : vector<32x1xf32> to vector<32x32xf32>
    %259 = arith.divf %254, %258 : vector<32x32xf32>
    %260 = vector.broadcast %228 : vector<1x32xf32> to vector<32x32xf32>
    %261 = arith.mulf %259, %260 : vector<32x32xf32>
    %262 = vector.broadcast %230 : vector<1x32xf32> to vector<32x32xf32>
    %263 = arith.addf %261, %262 : vector<32x32xf32>
    %c0_96 = arith.constant 0 : index
    %c0_97 = arith.constant 0 : index
    %264 = vector.load %arg21[%c0_96, %c0_97] : memref<32x32xf32, #tpu.memory_space<vmem>>, vector<32x32xf32>
    tpu.vector_store %arg21[%c0_96, %c0_97], %263 {strides = array<i32>} : memref<32x32xf32, #tpu.memory_space<vmem>>, vector<32x32xf32>,
    return
  }
  func.func @transform_0(%arg0: i32, %arg1: i32) -> (i32, i32) {
    %c0_i32 = arith.constant 0 : i32
    %c0_i32_0 = arith.constant 0 : i32
    %c0_i32_1 = arith.constant 0 : i32
    return %c0_i32, %c0_i32_0 : i32, i32
  }
  func.func @transform_1(%arg0: i32, %arg1: i32) -> (i32, i32) {
    %c0_i32 = arith.constant 0 : i32
    %c0_i32_0 = arith.constant 0 : i32
    return %arg0, %c0_i32 : i32, i32
  }
  func.func @transform_2(%arg0: i32, %arg1: i32) -> (i32, i32, i32) {
    %c0_i32 = arith.constant 0 : i32
    %c0_i32_0 = arith.constant 0 : i32
    %c0_i32_1 = arith.constant 0 : i32
    return %arg1, %c0_i32, %c0_i32_0 : i32, i32, i32
  }
  func.func @transform_3(%arg0: i32, %arg1: i32) -> (i32, i32, i32) {
    %c0_i32 = arith.constant 0 : i32
    %c0_i32_0 = arith.constant 0 : i32
    %c0_i32_1 = arith.constant 0 : i32
    return %arg1, %c0_i32, %c0_i32_0 : i32, i32, i32
  }
  func.func @transform_4(%arg0: i32, %arg1: i32) -> (i32, i32, i32) {
    %c0_i32 = arith.constant 0 : i32
    %c0_i32_0 = arith.constant 0 : i32
    %c0_i32_1 = arith.constant 0 : i32
    return %arg1, %c0_i32, %c0_i32_0 : i32, i32, i32
  }
  func.func @transform_5(%arg0: i32, %arg1: i32) -> (i32, i32, i32) {
    %c0_i32 = arith.constant 0 : i32
    %c0_i32_0 = arith.constant 0 : i32
    %c0_i32_1 = arith.constant 0 : i32
    return %arg1, %c0_i32, %c0_i32_0 : i32, i32, i32
  }
  func.func @transform_6(%arg0: i32, %arg1: i32) -> (i32, i32, i32) {
    %c0_i32 = arith.constant 0 : i32
    %c0_i32_0 = arith.constant 0 : i32
    %c0_i32_1 = arith.constant 0 : i32
    return %arg1, %c0_i32, %c0_i32_0 : i32, i32, i32
  }
  func.func @transform_7(%arg0: i32, %arg1: i32) -> (i32, i32, i32) {
    %c0_i32 = arith.constant 0 : i32
    %c0_i32_0 = arith.constant 0 : i32
    %c0_i32_1 = arith.constant 0 : i32
    return %arg1, %c0_i32, %c0_i32_0 : i32, i32, i32
  }
  func.func @transform_8(%arg0: i32, %arg1: i32) -> (i32, i32, i32) {
    %c0_i32 = arith.constant 0 : i32
    %c0_i32_0 = arith.constant 0 : i32
    %c0_i32_1 = arith.constant 0 : i32
    return %arg1, %c0_i32, %c0_i32_0 : i32, i32, i32
  }
  func.func @transform_9(%arg0: i32, %arg1: i32) -> (i32, i32, i32) {
    %c0_i32 = arith.constant 0 : i32
    %c0_i32_0 = arith.constant 0 : i32
    %c0_i32_1 = arith.constant 0 : i32
    return %arg1, %c0_i32, %c0_i32_0 : i32, i32, i32
  }
  func.func @transform_10(%arg0: i32, %arg1: i32) -> (i32, i32, i32) {
    %c0_i32 = arith.constant 0 : i32
    %c0_i32_0 = arith.constant 0 : i32
    %c0_i32_1 = arith.constant 0 : i32
    return %arg1, %c0_i32, %c0_i32_0 : i32, i32, i32
  }
  func.func @transform_11(%arg0: i32, %arg1: i32) -> (i32, i32, i32) {
    %c0_i32 = arith.constant 0 : i32
    %c0_i32_0 = arith.constant 0 : i32
    %c0_i32_1 = arith.constant 0 : i32
    return %arg1, %c0_i32, %c0_i32_0 : i32, i32, i32
  }
  func.func @transform_12(%arg0: i32, %arg1: i32) -> (i32, i32, i32) {
    %c0_i32 = arith.constant 0 : i32
    %c0_i32_0 = arith.constant 0 : i32
    %c0_i32_1 = arith.constant 0 : i32
    return %arg1, %c0_i32, %c0_i32_0 : i32, i32, i32
  }
  func.func @transform_13(%arg0: i32, %arg1: i32) -> (i32, i32, i32) {
    %c0_i32 = arith.constant 0 : i32
    %c0_i32_0 = arith.constant 0 : i32
    %c0_i32_1 = arith.constant 0 : i32
    return %arg1, %c0_i32, %c0_i32_0 : i32, i32, i32
  }
  func.func @transform_14(%arg0: i32, %arg1: i32) -> (i32, i32, i32) {
    %c0_i32 = arith.constant 0 : i32
    %c0_i32_0 = arith.constant 0 : i32
    %c0_i32_1 = arith.constant 0 : i32
    return %arg1, %c0_i32, %c0_i32_0 : i32, i32, i32
  }
  func.func @transform_15(%arg0: i32, %arg1: i32) -> (i32, i32, i32) {
    %c0_i32 = arith.constant 0 : i32
    %c0_i32_0 = arith.constant 0 : i32
    %c0_i32_1 = arith.constant 0 : i32
    return %arg1, %c0_i32, %c0_i32_0 : i32, i32, i32
  }
  func.func @transform_16(%arg0: i32, %arg1: i32) -> (i32, i32, i32) {
    %c0_i32 = arith.constant 0 : i32
    %c0_i32_0 = arith.constant 0 : i32
    %c0_i32_1 = arith.constant 0 : i32
    return %arg1, %c0_i32, %c0_i32_0 : i32, i32, i32
  }
  func.func @transform_17(%arg0: i32, %arg1: i32) -> (i32, i32, i32) {
    %c0_i32 = arith.constant 0 : i32
    %c0_i32_0 = arith.constant 0 : i32
    %c0_i32_1 = arith.constant 0 : i32
    return %arg1, %c0_i32, %c0_i32_0 : i32, i32, i32
  }
  func.func @transform_18(%arg0: i32, %arg1: i32) -> (i32, i32, i32) {
    %c0_i32 = arith.constant 0 : i32
    %c0_i32_0 = arith.constant 0 : i32
    %c0_i32_1 = arith.constant 0 : i32
    return %arg1, %c0_i32, %c0_i32_0 : i32, i32, i32
  }
  func.func @transform_19(%arg0: i32, %arg1: i32) -> (i32, i32) {
    %c0_i32 = arith.constant 0 : i32
    %c0_i32_0 = arith.constant 0 : i32
    return %arg0, %c0_i32 : i32, i32
  }
}

</mosaic_0001>

<bundles_post_ra>
// kernel: tpu_custom_call.1
= control target key start
LH: loop header
LB: loop body
LE: loop exit
PB: predicated region body
PF: predicated region fallthrough
CT: control target
= control target key end

     0   :  { %s6013_s0 = inlined_call_operand.hbm [shape: f32[16,32], index: 0, kind: input, shape index: {}]   ;;  %s6014_s1 = inlined_call_operand.hbm [shape: f32[16,32], index: 1, kind: input, shape index: {}]   ;;  %s6015_s2 = inlined_call_operand.vmem [shape: bf16[2,32,96], index: 2, kind: input, shape index: {}]   ;;  %s6016_s3 = inlined_call_operand.vmem [shape: bf16[2,32,32], index: 3, kind: input, shape index: {}]   ;;  %s6017_s4 = inlined_call_operand.vmem [shape: f32[2,1,32], index: 4, kind: input, shape index: {}]   ;;  %s6018_s5 = inlined_call_operand.hbm [shape: f32[2,1,32], index: 5, kind: input, shape index: {}]   ;;  %s6019_s6 = inlined_call_operand.vmem [shape: f32[2,1,32], index: 6, kind: input, shape index: {}]   ;;  %s6020_s7 = inlined_call_operand.vmem [shape: bf16[2,32,32], index: 7, kind: input, shape index: {}]   ;;  %s6021_s8 = inlined_call_operand.hbm [shape: bf16[2,32,64], index: 8, kind: input, shape index: {}]   ;;  %s6022_s9 = inlined_call_operand.hbm [shape: bf16[2,32,32], index: 9, kind: input, shape index: {}]   ;;  %s6023_s10 = inlined_call_operand.vmem [shape: f32[2,1,32], index: 10, kind: input, shape index: {}]   ;;  %s6024_s11 = inlined_call_operand.vmem [shape: f32[2,1,32], index: 11, kind: input, shape index: {}]   ;;  %s6025_s12 = inlined_call_operand.vmem [shape: f32[2,1,32], index: 12, kind: input, shape index: {}]   ;;  %s6026_s13 = inlined_call_operand.hbm [shape: bf16[2,32,64], index: 13, kind: input, shape index: {}]   ;;  %s6027_s14 = inlined_call_operand.vmem [shape: f32[2,1,64], index: 14, kind: input, shape index: {}]   ;;  %s6028_s15 = inlined_call_operand.vmem [shape: bf16[2,64,32], index: 15, kind: input, shape index: {}]   ;;  %s6029_s16 = inlined_call_operand.vmem [shape: f32[2,1,32], index: 16, kind: input, shape index: {}]   ;;  %s6030_s17 = inlined_call_operand.hbm [shape: f32[2,1,32], index: 17, kind: input, shape index: {}]   ;;  %s6031_s18 = inlined_call_operand.vmem [shape: f32[2,1,32], index: 18, kind: input, shape index: {}]   ;;  %s6032_s19 = inlined_call_operand.hbm [shape: f32[32,32], index: 19, kind: output, shape index: {}]  }
   0x1   :  { %6041 = sst [smem:[#allocation24_spill]] %s6013_s0 }
   0x2   :  { %6042 = sst [smem:[#allocation25_spill]] %s6014_s1 }
   0x3   :  { %6043 = sst [smem:[#allocation26_spill]] %s6015_s2 }
   0x4   :  { %6044 = sst [smem:[#allocation27_spill]] %s6016_s3 }
   0x5   :  { %6045 = sst [smem:[#allocation28_spill]] %s6017_s4 }
   0x6   :  { %6046 = sst [smem:[#allocation29_spill]] %s6018_s5 }
   0x7   :  { %6047 = sst [smem:[#allocation30_spill]] %s6019_s6 }
   0x8   :  { %6048 = sst [smem:[#allocation31_spill]] %s6020_s7 }
   0x9   :  { %6049 = sst [smem:[#allocation32_spill]] %s6021_s8 }
   0xa   :  { %6050 = sst [smem:[#allocation33_spill]] %s6022_s9 }
   0xb   :  { %6051 = sst [smem:[#allocation34_spill]] %s6023_s10 }
   0xc   :  { %6052 = sst [smem:[#allocation35_spill]] %s6024_s11 }
   0xd   :  { %6053 = sst [smem:[#allocation36_spill]] %s6025_s12 }
   0xe   :  { %6054 = sst [smem:[#allocation37_spill]] %s6026_s13 }
   0xf   :  { %6055 = sst [smem:[#allocation38_spill]] %s6027_s14 }
  0x10   :  { %6056 = sst [smem:[#allocation39_spill]] %s6028_s15 }
  0x11   :  { %6057 = sst [smem:[#allocation40_spill]] %s6029_s16 }
  0x12   :  { %6058 = sst [smem:[#allocation41_spill]] %s6030_s17 }
  0x13   :  { %6059 = sst [smem:[#allocation42_spill]] %s6031_s18 }
  0x14   :  { %6060 = sst [smem:[#allocation43_spill]] %s6032_s19 }
  0x15   :  { %24 = vsyncpa [#allocation3], 0 }
  0x16   :  { %25 = vsyncpa [#allocation6], 0 }
  0x17   :  { %26 = vsyncpa [#allocation4], 0  ;;  %s5099_s0 = smov 0   ;;  %s5101_s30 = smov 0  }
  0x18   :  { %s5103_s20 = smov 0   ;;  %s5105_s21 = smov 0  }
  0x19   :  { %s5107_s1 = smov 0   ;;  %s5109_s22 = smov 0  }
  0x1a LB: > { %6061 = sst [smem:[#allocation17_spill]] %s4937_s30  ;;  %s5128_s2 = sadd.s32 4294967295, %s4953_s22   ;;  %s4953_s22 = sphi %s5109_s22, %s32_s22   ;;  %s4949_s1 = sphi %s5107_s1, %s6110_s1   ;;  %s4945_s21 = sphi %s5105_s21, %s6109_s21   ;;  %s4941_s20 = sphi %s5103_s20, %s6108_s20   ;;  %s4937_s30 = sphi %s5101_s30, %s6107_s30   ;;  %s4933_s0 = sphi %s5099_s0, %s6106_s0  }
  0x1b   : > { %6062 = sst [smem:[#allocation18_spill]] %s4941_s20  ;;  %p189_p0 = scmp.ne.s32.totalorder %s4937_s30, %s4933_s0 }
  0x1c   : > { %6063 = sst [smem:[#allocation19_spill]] %s4949_s1  ;;  %p190_p1 = scmp.eq.s32.totalorder %s5128_s2, 0 }
  0x1d   : > { %6064 = sst [smem:[#allocation20_spill]] %s4953_s22  ;;  %p4088_p2 = scmp.ge.s32.totalorder %s4953_s22, 1 }
  0x1e   : > { %6065 = sst [smem:[#allocation21_spill]] %s5128_s2  ;;  %p564_p3 = scmp.lt.s32.totalorder %s4953_s22, 3 }
  0x1f   : > { %p5136_p4 = por %p190_p1, %p189_p0  ;;  %s6067_s3 = sld [smem:[#allocation24_spill]] }
  0x20   : > { %p5143_p5 = pnand %p4088_p2, %p564_p3  ;;  %s4955_s28 = smov [#allocation2]  }
  0x21   : > { %s577_s29 = sshll.u32 %s4955_s28, 4  ;;  %s6033_s24 = smov 128   ;;  %s578_s29 = int_to_ptr.vmem [resolvable:$true] %s577_s29 }
  0x22   : > { %p4290_p6 = pneg %p5143_p5  ;;  %s6034_s25 = smov 8  }
  0x23   : > { %s176_s28 = sadd.s32 1, %s4941_s20  ;;  %p183_p9 = scmp.ne.s32.totalorder %s4941_s20, %s4937_s30 }
  0x24   : > { %p5151_p7 = pnand %p4290_p6, %p190_p1  ;;  %p184_p10 = scmp.eq.s32.totalorder %s4953_s22, 0 }
  0x25   : > { %s575_s26 = sshll.u32 %s6067_s3, 4  ;;  %s41_s3 = sadd.s32 1, %s4949_s1  ;;  %s576_s26 = int_to_ptr.hbm [resolvable:$true] %s575_s26 }
  0x26   : > { %4293 = dma.hbm_to_vmem [thread:$0]  (!%p5151_p7), %s576_s26, 256, %s578_s29, [#allocation3], %s6033_s24, %s6033_s24, %s6034_s25  }
  0x27   : > { %p42_p8 = scmp.ge.s32.totalorder %s41_s3, 2  ;;  %p5167_p11 = por %p184_p10, %p183_p9 }
  0x28   : > { %p4315_p12 = scmp.lt.s32.totalorder %s4953_s22, 2  ;;  %s630_s15 = sand.u32 1, %s4953_s22  }
  0x29   : > { %s6112_s3 = smov (%p42_p8, %s41_s3), 0  ;;  %s5176_s16 = sand.u32 1, %s4941_s20  }
  0x2a   : > { %6070 = sst [smem:[#allocation22_spill]] %s6112_s3  ;;  %s173_s18 = ssub.s32 %s4949_s1, %s6112_s3 }
  0x2b   : > { %p174_p13 = scmp.eq.s32.totalorder %s173_s18, 0  ;;  %s6072_s5 = sld [smem:[#allocation29_spill]] }
  0x2c   : > { %s633_s12 = scalar_lea.vmem [#allocation7], %s5176_s16  ;;  %p5188_p0 = pnand %p4315_p12, %p5167_p11 }
  0x2d   : > { %s5183_s25 = scalar_select %p174_p13, %s4941_s20, %s176_s28  }
  0x2e   : > { %s640_s11 = sshll.u32 %s633_s12, 4  ;;  %s4092_s18 = sshll.u32 %s5176_s16, 4  ;;  %s641_s11 = int_to_ptr.vmem [resolvable:$true] %s640_s11 }
  0x2f   : > { %6073 = sst [smem:[#allocation23_spill]] %s5183_s25  ;;  %s4247_s22 = sshll.u32 %s4949_s1, 4 }
  0x30   : > { %s5194_s26 = scalar_lea.sflag [#allocation3], %s630_s15  ;;  %s6075_s8 = sld [smem:[#allocation32_spill]] }
  0x31   : > { %s636_s24 = scalar_lea.hbm %s6072_s5, %s4949_s1  ;;  %s665_s19 = scalar_lea.vmem [#allocation8], %s4092_s18 }
  0x32   : > { %s638_s14 = sshll.u32 %s636_s24, 4  ;;  %s673_s29 = sshll.u32 %s665_s19, 4  ;;  %s639_s14 = int_to_ptr.hbm [resolvable:$true] %s638_s14  ;;  %s674_s29 = int_to_ptr.vmem [resolvable:$true] %s673_s29 }
  0x33   : > { %4300 = dma.hbm_to_vmem [thread:$0]  (!%p5188_p0), %s639_s14, 16, %s641_s11, %s5194_s26  }
  0x34   : > { %s4958_s25 = smov 64   ;;  %s4959_s20 = smov 4  }
  0x35   : > { %s6076_s9 = sld [smem:[#allocation33_spill]]  ;;  %s687_s14 = scalar_lea.vmem [#allocation9], %s4092_s18 }
  0x36   : > { %s670_s12 = scalar_lea.hbm %s6075_s8, %s4247_s22  ;;  %s695_s24 = sshll.u32 %s687_s14, 4  ;;  %s696_s24 = int_to_ptr.vmem [resolvable:$true] %s695_s24 }
  0x37   : > { %s671_s5 = sshll.u32 %s670_s12, 4  ;;  %s6077_s13 = sld [smem:[#allocation37_spill]]  ;;  %s672_s5 = int_to_ptr.hbm [resolvable:$true] %s671_s5 }
  0x38   : > { %4303 = dma.hbm_to_vmem [thread:$0]  (!%p5188_p0), %s672_s5, 256, %s674_s29, %s5194_s26, %s4958_s25, %s4958_s25, %s4959_s20  }
  0x39   : > { %s727_s7 = scalar_lea.vmem [#allocation10], %s4092_s18  ;;  %s6079_s17 = sld [smem:[#allocation41_spill]] }
  0x3a   : > { %s735_s5 = sshll.u32 %s727_s7, 4  ;;  %s6080_s7 = smov 8   ;;  %s736_s5 = int_to_ptr.vmem [resolvable:$true] %s735_s5 }
  0x3b   : > { %s692_s11 = scalar_lea.hbm %s6076_s9, %s4247_s22  ;;  %s768_s9 = scalar_lea.vmem [#allocation11], %s5176_s16 }
  0x3c   : > { %s693_s28 = sshll.u32 %s692_s11, 4  ;;  %s6078_s11 = sld [smem:[#allocation25_spill]]  ;;  %s694_s28 = int_to_ptr.hbm [resolvable:$true] %s693_s28 }
  0x3d   : > { %4306 = dma.hbm_to_vmem [thread:$0]  (!%p5188_p0), %s694_s28, 256, %s696_s24, %s5194_s26, %s4958_s25, %s4958_s25, %s4959_s20  }
  0x3e   : > { %s732_s8 = scalar_lea.hbm %s6077_s13, %s4247_s22  ;;  %s4960_s24 = smov [#allocation5]  }
  0x3f   : > { %s733_s29 = sshll.u32 %s732_s8, 4  ;;  %s594_s28 = sshll.u32 %s4960_s24, 4  ;;  %s734_s29 = int_to_ptr.hbm [resolvable:$true] %s733_s29  ;;  %s595_s28 = int_to_ptr.vmem [resolvable:$true] %s594_s28 }
  0x40   : > { %4309 = dma.hbm_to_vmem [thread:$0]  (!%p5188_p0), %s734_s29, 256, %s736_s5, %s5194_s26, %s4958_s25, %s4958_s25, %s4959_s20  }
  0x41   : > { %s771_s22 = scalar_lea.hbm %s6079_s17, %s4949_s1  ;;  %s6081_s8 = smov 128  }
  0x42   : > { %s592_s14 = sshll.u32 %s6078_s11, 4  ;;  %s773_s18 = sshll.u32 %s771_s22, 4  ;;  %s593_s14 = int_to_ptr.hbm [resolvable:$true] %s592_s14  ;;  %s774_s18 = int_to_ptr.hbm [resolvable:$true] %s773_s18 }
  0x43   : > { %4296 = dma.hbm_to_vmem [thread:$0]  (!%p5151_p7), %s593_s14, 256, %s595_s28, [#allocation6], %s6081_s8, %s6081_s8, %s6080_s7  }
  0x44   : > { %s775_s13 = sshll.u32 %s768_s9, 4  ;;  %790 = sbr.rel (%p5143_p5) target bundleno = 8009 (0x1f49), region = 96  ;;  %s776_s13 = int_to_ptr.vmem [resolvable:$true] %s775_s13 }
  0x45   : > { %4312 = dma.hbm_to_vmem [thread:$0]  (!%p5188_p0), %s774_s18, 16, %s776_s13, %s5194_s26  }
  0x49   : > { %4916 = dma.done.wait (%p190_p1), [#allocation3], 256  }
  0x4a   : > { %4918 = vsyncadd (%p190_p1), [#allocation3], 4294967040 }
  0x4b   : > { %4920 = dma.done.wait (%p190_p1), [#allocation6], 256  }
  0x4c   : > { %4922 = vsyncadd (%p190_p1), [#allocation6], 4294967040  ;;  %s802_s9 = sand.u32 1, %s5128_s2   ;;  %s5245_s13 = sand.u32 1, %s4937_s30  }
  0x4d   : > { %s803_s16 = scalar_lea.sflag [#allocation3], %s802_s9 }
  0x4e   : > { %4924 = dma.done.wait (%p5136_p4), %s803_s16, 800  }
  0x4f   : > { %4926 = vsyncadd (%p5136_p4), %s803_s16, 4294966496  ;;  %s5253_s27 = sshll.u32 %s5245_s13, 4  ;;  %p958_p1 = scmp.lt.s32.totalorder %s4945_s21, 1 }
  0x50   : > { %s6082_s4 = sld [smem:[#allocation28_spill]]  ;;  %s815_s14 = scalar_lea.vmem [#allocation8], %s5253_s27 }
  0x51   : > { %s5257_s0 = scalar_select %p958_p1, %s4945_s21, 1 }
  0x52   : > { %s6083_s10 = sld [smem:[#allocation26_spill]]  ;;  %s844_s12 = scalar_lea.vmem [#allocation11], %s5245_s13 }
  0x53   : > { %s4250_s23 = sshll.u32 %s5257_s0, 4  ;;  %s6084_s24 = sld [smem:[#allocation27_spill]] }
  0x54   : > { %s6085_s6 = sld [smem:[#allocation30_spill]]  ;;  %s4253_s30 = sshll.u32 %s5257_s0, 5 }
  0x55   : > { %s6086_s18 = sld [smem:[#allocation31_spill]]  ;;  %p4115_p2 = scmp.ne.s32.totalorder %s4945_s21, 0 }
  0x56   : > { %s5264_s26 = scalar_lea.vmem %s6082_s4, %s5257_s0  ;;  %s6087_s3 = sld [smem:[#allocation34_spill]] }
  0x57   : > { %s6089_s4 = sld [smem:[#allocation36_spill]]  ;;  %s4963_s2 = smov (!%p4115_p2), 64  }
  0x58   : > { %s5269_s15 = scalar_lea.vmem %s6083_s10, %s4250_s23  ;;  %s6091_s8 = sld [smem:[#allocation40_spill]] }
  0x59   : > { %s5274_s28 = scalar_lea.vmem %s6084_s24, %s4250_s23  ;;  %s6092_s25 = sld [smem:[#allocation39_spill]] }
  0x5a   : > { %s5280_s22 = scalar_lea.vmem %s6085_s6, %s5257_s0  ;;  %s6090_s6 = sld [smem:[#allocation38_spill]] }
  0x5b   : > { %s5285_s9 = scalar_lea.vmem %s6086_s18, %s4250_s23  ;;  %s6093_s10 = sld [smem:[#allocation42_spill]] }
  0x5c   : > { %s981_s5 = scalar_lea.vmem %s6087_s3, %s5257_s0  ;;  %s835_s24 = scalar_lea.vmem [#allocation10], %s5253_s27 }
  0x5d   : > { %s987_s17 = scalar_lea.vmem %s6089_s4, %s5257_s0  ;;  %s5319_s4 = scalar_lea.vmem [#allocation9], %s5253_s27 }
  0x5e   : > { %s998_s18 = scalar_lea.vmem %s6091_s8, %s5257_s0  ;;  %1007 = sbr.rel (%p4115_p2) target bundleno = 1898 (0x76a), region = 128 }
  0x5f   : > { %s5311_s3 = scalar_lea.vmem %s6092_s25, %s4253_s30  ;;  %s4962_s30 = smov (!%p4115_p2), 88  }
  0x60   : > { %s990_s1 = scalar_lea.vmem %s6090_s6, %s5257_s0  ;;  %s4961_s6 = smov (!%p4115_p2), 96  }
  0x61   : > { %s1001_s11 = scalar_lea.vmem %s6093_s10, %s5257_s0  ;;  %s4964_s19 = smov (!%p4115_p2), 72  }
  0x62   : > { %s4965_s7 = smov (!%p4115_p2), 120   ;;  %s4966_s23 = smov (!%p4115_p2), 104  }
  0x63   : > { %v4255_v0 = vld [vmem:[%s5269_s15 + $0x8] sm:$0xff]  ;;  %v4254_v1 = vld [vmem:[%s5269_s15] sm:$0xff]  ;;  %vm1034_vm0 = vcmask 261120   ;;  %vm1061_vm1 = vcmask 64512   ;;  %vm1082_vm2 = vcmask 130048   ;;  %s4967_s8 = smov 80  }
  0x64   : > { %1044 = vmatpush.bf16.msra.mxu0 %v4255_v0  ;;  %v5326_v2 = vld [vmem:[#allocation2] sm:$0xff]  ;;  %v5328_v3 = vld [vmem:[#allocation2 + $0x8] sm:$0xff]  ;;  %s4968_s16 = smov 112   ;;  %vm1198_vm3 = vcmask 1043456   ;;  %s4969_s25 = smov 56  }
  0x65   : > { %v1021_v4 = vpack.c.bf16 %v5328_v3, %v5326_v2  ;;  %v1014_v28 = vld [vmem:[%s5274_s28] sm:$0xf]  ;;  %s4970_s29 = smov 40   ;;  %s4971_s20 = smov 48  }
  0x66   : > { %v1220_v29 = vsel %vm1198_vm3, %v1014_v28, 0  ;;  %s6094_s10 = scalar_lea.vmem [#allocation7], %s5245_s13 }
  0x68   : > { %1045 = vmatpush.bf16.msra.mxu0 %v4254_v1 }
  0x6b   : > { %4124 = vmatmul.msk.bf16.vlgmr.msra.gmra.mxu0 %vm1034_vm0, %v1021_v4 }
  0xe8   : > { %v1047_v5 = vpop.f32.mrf.mxu0 }
  0xe9   : > { %v1052_v6 = vpack.c.bf16 %v1047_v5, %v1047_v5 }
  0xeb   : > { %v1056_v9 = vunpack.c.l.b16 %v1052_v6 }
  0xf0   : > { %v1049_v7 = vpop.f32.mrf.mxu0 }
  0xf1   : > { %v1053_v8 = vpack.c.bf16 %v1049_v7, %v1049_v7 }
  0xf3   : > { %v1057_v10 = vunpack.c.l.b16 %v1053_v8 }
  0xf5   : > { %v5333_v11 = vpack.c.b16 %v1057_v10, %v1056_v9 }
  0xf7   : > { %1059 = vrot.lane.b32.xlu0 %v5333_v11, %s4961_s6 }
 0x169   : > { %v1060_v12 = vpop.permute.xlu0 %1059 }
 0x16a   : > { %v1066_v13 = vsel %vm1061_vm1, %v1060_v12, 0 }
 0x16b   : > { %1075 = vmatpush.bf16.xpose.msra.mxu1 %v1066_v13 }
 0x172   : > { %4125 = vmatmul.msk.bf16.vlgmr.msra.gmra.mxu1 %vm1061_vm1, %v5333_v11 }
 0x173   : > { %1229 = vmatpush.bf16.msrb.mxu1 %v1220_v29 }
 0x1ef   : > { %v1077_v14 = vpop.f32.mrf.mxu1 }
 0x1f0   : > { %v1083_v15 = vsel %vm1082_vm2, %v1077_v14, -inf }
 0x1f1   : > { %1084 = vmax.xlane.f32.xlu0 %v1083_v15 }
 0x1f7   : > { %v1079_v16 = vpop.f32.mrf.mxu1 }
 0x1f8   : > { %v1086_v17 = vsel %vm1082_vm2, %v1079_v16, -inf }
 0x1f9   : > { %1087 = vmax.xlane.f32.xlu1 %v1086_v17 }
 0x264   : > { %v1085_v18 = vpop.xlane.xlu0 %1084 }
 0x265   : > { %v1089_v19 = vsub.f32 %v1077_v14, %v1085_v18 }
 0x267   : > { %v1091_v20 = vmul.f32 1.442695, %v1089_v19 }
 0x269   : > { %4415 = vpow2.f32 %v1091_v20 }
 0x26c   : > { %v1088_v21 = vpop.xlane.xlu1 %1087 }
 0x26d   : > { %v1090_v22 = vsub.f32 %v1079_v16, %v1088_v21 }
 0x26f   : > { %v4416_v23 = vpop.eup %4415  ;;  %v1093_v24 = vmul.f32 1.442695, %v1090_v22 }
 0x270   : > { %v1095_v25 = vsel %vm1082_vm2, %v4416_v23, 0.0 }
 0x271   : > { %4417 = vpow2.f32 %v1093_v24  ;;  %1096 = vadd.xlane.f32.xlu1 %v1095_v25 }
 0x277   : > { %v4418_v26 = vpop.eup %4417 }
 0x278   : > { %v1098_v27 = vsel %vm1082_vm2, %v4418_v26, 0.0 }
 0x279   : > { %1099 = vadd.xlane.f32.xlu2 %v1098_v27 }
 0x28a   : > { %1129 = vrot.lane.b32.xlu1 %v5333_v11, %s4962_s30 }
 0x291   : > { %1106 = vrot.lane.b32.xlu2 %v5333_v11, %s4963_s2 }
 0x292   : > { %1328 = vrot.lane.b32.xlu1 %v5333_v11, %s4964_s19 }
 0x299   : > { %1127 = vrot.lane.b32.xlu2 %v5333_v11, %s4965_s7 }
 0x29a   : > { %1326 = vrot.lane.b32.xlu1 %v5333_v11, %s4966_s23 }
 0x2a1   : > { %1238 = vrot.lane.b32.xlu2 %v5333_v11, %s4967_s8 }
 0x2a9   : > { %1236 = vrot.lane.b32.xlu2 %v5333_v11, %s4968_s16 }
 0x2e4   : > { %v1097_v30 = vpop.xlane.xlu1 %1096 }
 0x2e5   : > { %4419 = vrcp.f32 %v1097_v30 }
 0x2eb   : > { %v4420_v32 = vpop.eup %4419 }
 0x2ec   : > { %v1100_v31 = vpop.xlane.xlu2 %1099  ;;  %v1103_v35 = vmul.f32 %v4420_v32, %v4416_v23 }
 0x2ed   : > { %4421 = vrcp.f32 %v1100_v31 }
 0x2f3   : > { %v4422_v33 = vpop.eup %4421 }
 0x2f4   : > { %v1107_v34 = vpop.permute.xlu2 %1106  ;;  %v1104_v36 = vmul.f32 %v4422_v33, %v4418_v26 }
 0x2f5   : > { %1119 = vmatpush.bf16.msra.mxu2 %v1107_v34 }
 0x2f6   : > { %v1105_v37 = vpack.c.bf16 %v1104_v36, %v1103_v35 }
 0x2f8   : > { %4126 = vmatmul.msk.bf16.vlgmr.msra.gmra.mxu2 %vm1082_vm2, %v1105_v37 }
 0x2fc   : > { %v1128_v38 = vpop.permute.xlu2 %1127  ;;  %v1130_v39 = vpop.permute.xlu1 %1129 }
 0x2fd   : > { %v1135_v40 = vsel %vm1061_vm1, %v1130_v39, 0 }
 0x2fe   : > { %1144 = vmatpush.bf16.xpose.msra.mxu3 %v1135_v40 }
 0x304   : > { %v1239_v41 = vpop.permute.xlu2 %1238  ;;  %v1329_v42 = vpop.permute.xlu1 %1328 }
 0x305   : > { %v1334_v43 = vsel %vm1061_vm1, %v1329_v42, 0  ;;  %4127 = vmatmul.msk.bf16.vlgmr.msra.gmra.mxu3 %vm1061_vm1, %v1128_v38  ;;  %v1244_v44 = vsel %vm1061_vm1, %v1239_v41, 0 }
 0x306   : > { %1253 = vmatpush.bf16.xpose.msrb.mxu3 %v1244_v44  ;;  %1343 = vmatpush.bf16.xpose.msra.mxu1 %v1334_v43  ;;  %v1015_v43 = vld [vmem:[%s5274_s28 + $0x4] sm:$0xf] }
 0x307   : > { %v1200_v44 = vsel %vm1198_vm3, %v1015_v43, 0 }
 0x308   : > { %1209 = vmatpush.bf16.msrb.mxu0 %v1200_v44  ;;  %v4973_v44 = vmov 31.0  }
 0x30c   : > { %v1237_v45 = vpop.permute.xlu2 %1236  ;;  %v1327_v53 = vpop.permute.xlu1 %1326 }
 0x315   : > { %4131 = vmatmul.msk.bf16.vlgmr.msrb.gmra.mxu3 %vm1061_vm1, %v1237_v45 }
 0x37b   : > { %v1121_v46 = vpop.f32.mrf.mxu2 }
 0x383   : > { %v1123_v47 = vpop.f32.mrf.mxu2 }
 0x384   : > { %v1126_v48 = vpack.c.bf16 %v1123_v47, %v1121_v46 }
 0x386   : > { %4130 = vmatmul.msk.bf16.vlgmr.msrb.gmra.mxu1 %vm1061_vm1, %v1126_v48 }
 0x388   : > { %v1146_v49 = vpop.f32.mrf.mxu3 }
 0x389   : > { %v1151_v50 = vsel %vm1082_vm2, %v1146_v49, -inf }
 0x38a   : > { %1152 = vmax.xlane.f32.xlu0 %v1151_v50 }
 0x390   : > { %v1148_v51 = vpop.f32.mrf.mxu3 }
 0x391   : > { %v1154_v52 = vsel %vm1082_vm2, %v1148_v51, -inf }
 0x392   : > { %1155 = vmax.xlane.f32.xlu2 %v1154_v52 }
 0x396   : > { %4134 = vmatmul.msk.bf16.vlgmr.msra.gmra.mxu1 %vm1061_vm1, %v1327_v53 }
 0x398   : > { %v1255_v54 = vpop.f32.mrf.mxu3 }
 0x399   : > { %v1260_v55 = vsel %vm1082_vm2, %v1255_v54, -inf }
 0x39a   : > { %1261 = vmax.xlane.f32.xlu0 %v1260_v55 }
 0x3a0   : > { %v1257_v56 = vpop.f32.mrf.mxu3 }
 0x3a1   : > { %v1263_v57 = vsel %vm1082_vm2, %v1257_v56, -inf }
 0x3a2   : > { %1264 = vmax.xlane.f32.xlu0 %v1263_v57 }
 0x3aa   : > { %1174 = vrot.lane.b32.xlu2 %v5333_v11, %s4969_s25 }
 0x3fd   : > { %v1153_v58 = vpop.xlane.xlu0 %1152 }
 0x3fe   : > { %v1157_v59 = vsub.f32 %v1146_v49, %v1153_v58 }
 0x400   : > { %v1159_v60 = vmul.f32 1.442695, %v1157_v59 }
 0x402   : > { %4423 = vpow2.f32 %v1159_v60 }
 0x403   : > { %v5365_v61 = vpop.f32.mrf.mxu1 }
 0x405   : > { %v1156_v62 = vpop.xlane.xlu2 %1155 }
 0x406   : > { %v1158_v6 = vsub.f32 %v1148_v51, %v1156_v62  ;;  %v1017_v62 = vld [vmem:[%s5274_s28 + $0xc] sm:$0xf] }
 0x408   : > { %v4424_v63 = vpop.eup %4423  ;;  %v1161_v12 = vmul.f32 1.442695, %v1158_v6 }
 0x409   : > { %v1163_v0 = vsel %vm1082_vm2, %v4424_v63, 0.0 }
 0x40a   : > { %1164 = vadd.xlane.f32.xlu0 %v1163_v0  ;;  %v1016_v0 = vld [vmem:[%s5274_s28 + $0x8] sm:$0xf] }
 0x40b   : > { %v5368_v1 = vpop.f32.mrf.mxu1 }
 0x40d   : > { %v1262_v4 = vpop.xlane.xlu0 %1261  ;;  %v1175_v5 = vpop.permute.xlu2 %1174 }
 0x40e   : > { %1187 = vmatpush.bf16.msrb.mxu2 %v1175_v5  ;;  %v1266_v14 = vsub.f32 %v1255_v54, %v1262_v4  ;;  %v1308_v4 = vsel %vm1198_vm3, %v1016_v0, 0 }
 0x40f   : > { %1317 = vmatpush.bf16.msra.mxu0 %v1308_v4 }
 0x410   : > { %v1268_v17 = vmul.f32 1.442695, %v1266_v14 }
 0x413   : > { %v1345_v7 = vpop.f32.mrf.mxu1 }
 0x414   : > { %v1350_v8 = vsel %vm1082_vm2, %v1345_v7, -inf }
 0x415   : > { %v1265_v9 = vpop.xlane.xlu0 %1264  ;;  %1351 = vmax.xlane.f32.xlu1 %v1350_v8 }
 0x416   : > { %v1267_v10 = vsub.f32 %v1257_v56, %v1265_v9 }
 0x418   : > { %v1270_v13 = vmul.f32 1.442695, %v1267_v10 }
 0x41a   : > { %4425 = vpow2.f32 %v1270_v13 }
 0x41b   : > { %4427 = vpow2.f32 %v1161_v12  ;;  %v1347_v15 = vpop.f32.mrf.mxu1 }
 0x41c   : > { %v1353_v16 = vsel %vm1082_vm2, %v1347_v15, -inf  ;;  %4429 = vpow2.f32 %v1268_v17 }
 0x41d   : > { %1354 = vmax.xlane.f32.xlu0 %v1353_v16 }
 0x420   : > { %v4426_v18 = vpop.eup %4425 }
 0x421   : > { %v4428_v19 = vpop.eup %4427  ;;  %v1275_v20 = vsel %vm1082_vm2, %v4426_v18, 0.0 }
 0x422   : > { %1276 = vadd.xlane.f32.xlu1 %v1275_v20  ;;  %v1166_v21 = vsel %vm1082_vm2, %v4428_v19, 0.0  ;;  %v4430_v22 = vpop.eup %4429 }
 0x423   : > { %v1272_v23 = vsel %vm1082_vm2, %v4430_v22, 0.0 }
 0x425   : > { %1167 = vadd.xlane.f32.xlu0 %v1166_v21 }
 0x42d   : > { %1273 = vadd.xlane.f32.xlu0 %v1272_v23 }
 0x47d   : > { %v1165_v24 = vpop.xlane.xlu0 %1164 }
 0x488   : > { %v1352_v25 = vpop.xlane.xlu1 %1351 }
 0x489   : > { %v1356_v26 = vsub.f32 %v1345_v7, %v1352_v25 }
 0x48b   : > { %v1358_v27 = vmul.f32 1.442695, %v1356_v26 }
 0x48d   : > { %4431 = vpow2.f32 %v1358_v27 }
 0x490   : > { %v1355_v28 = vpop.xlane.xlu0 %1354 }
 0x491   : > { %v1357_v29 = vsub.f32 %v1347_v15, %v1355_v28 }
 0x493   : > { %v4432_v30 = vpop.eup %4431  ;;  %v1360_v31 = vmul.f32 1.442695, %v1357_v29 }
 0x494   : > { %v1362_v32 = vsel %vm1082_vm2, %v4432_v30, 0.0 }
 0x495   : > { %4433 = vpow2.f32 %v1360_v31  ;;  %1363 = vadd.xlane.f32.xlu0 %v1362_v32  ;;  %v1277_v42 = vpop.xlane.xlu1 %1276 }
 0x496   : > { %4435 = vrcp.f32 %v1165_v24 }
 0x498   : > { %v1168_v33 = vpop.xlane.xlu0 %1167 }
 0x499   : > { %4437 = vrcp.f32 %v1168_v33 }
 0x49b   : > { %v4434_v34 = vpop.eup %4433 }
 0x49c   : > { %v1365_v35 = vsel %vm1082_vm2, %v4434_v34, 0.0  ;;  %v4436_v36 = vpop.eup %4435 }
 0x49d   : > { %1366 = vadd.xlane.f32.xlu1 %v1365_v35  ;;  %v1171_v38 = vmul.f32 %v4436_v36, %v4424_v63  ;;  %v1398_v63 = vsel %vm1198_vm3, %v1017_v62, 0 }
 0x49f   : > { %v4438_v37 = vpop.eup %4437 }
 0x4a0   : > { %v1172_v39 = vmul.f32 %v4438_v37, %v4428_v19  ;;  %v1274_v41 = vpop.xlane.xlu0 %1273 }
 0x4a2   : > { %v1173_v40 = vpack.c.bf16 %v1172_v39, %v1171_v38 }
 0x4a4   : > { %4128 = vmatmul.msk.bf16.vlgmr.msrb.gmra.mxu2 %vm1082_vm2, %v1173_v40 }
 0x4a9   : > { %1373 = vrot.lane.b32.xlu0 %v5333_v11, %s4970_s29 }
 0x4b6   : > { %1283 = vrot.lane.b32.xlu1 %v5333_v11, %s4971_s20 }
 0x508   : > { %v1364_v45 = vpop.xlane.xlu0 %1363 }
 0x510   : > { %v1367_v46 = vpop.xlane.xlu1 %1366 }
 0x511   : > { %4439 = vrcp.f32 %v1367_v46 }
 0x512   : > { %4441 = vrcp.f32 %v1364_v45 }
 0x513   : > { %4443 = vrcp.f32 %v1274_v41 }
 0x514   : > { %4445 = vrcp.f32 %v1277_v42 }
 0x517   : > { %v4440_v47 = vpop.eup %4439 }
 0x518   : > { %v4442_v48 = vpop.eup %4441  ;;  %v1371_v49 = vmul.f32 %v4440_v47, %v4434_v34 }
 0x519   : > { %v1370_v50 = vmul.f32 %v4442_v48, %v4432_v30  ;;  %v4444_v11 = vpop.eup %4443  ;;  %v4972_v30 = vmov 32.0  }
 0x51a   : > { %v4446_v53 = vpop.eup %4445  ;;  %v1280_v54 = vmul.f32 %v4444_v11, %v4430_v22  ;;  %4447 = vrcp.f32 %v4972_v30 }
 0x51b   : > { %v1374_v51 = vpop.permute.xlu0 %1373  ;;  %v1372_v52 = vpack.c.bf16 %v1371_v49, %v1370_v50  ;;  %v1281_v56 = vmul.f32 %v4446_v53, %v4426_v18  ;;  %v4412_v18 = vld [vmem:[%s5264_s26] ss:$0 sm:$0xff]  ;;  %4449 = vrcp.f32 %v4973_v44 }
 0x51c   : > { %1386 = vmatpush.bf16.msra.mxu3 %v1374_v51 }
 0x51d   : > { %v1282_v58 = vpack.c.bf16 %v1281_v56, %v1280_v54 }
 0x51f   : > { %4135 = vmatmul.msk.bf16.vlgmr.msra.gmra.mxu3 %vm1082_vm2, %v1372_v52 }
 0x520   : > { %v4448_v31 = vpop.eup %4447 }
 0x521   : > { %v1430_v32 = vmul.f32 32.0, %v4448_v31  ;;  %vm1434_vm4 = vweird.f32 %v4448_v31  ;;  %v4450_v45 = vpop.eup %4449 }
 0x522   : > { %v1449_v46 = vmul.f32 31.0, %v4450_v45  ;;  %vm1453_vm5 = vweird.f32 %v4450_v45 }
 0x524   : > { %v1450_v47 = vsub.f32 1.0, %v1449_v46 }
 0x526   : > { %v1451_v48 = vmul.f32 %v4450_v45, %v1450_v47 }
 0x527   : > { %v1189_v55 = vpop.f32.mrf.mxu2 }
 0x528   : > { %v1284_v57 = vpop.permute.xlu1 %1283  ;;  %v1452_v49 = vadd.f32 %v4450_v45, %v1451_v48 }
 0x529   : > { %1296 = vmatpush.bf16.msra.mxu2 %v1284_v57 }
 0x52a   : > { %v1454_v50 = vsel %vm1453_vm5, %v4450_v45, %v1452_v49 }
 0x52c   : > { %4132 = vmatmul.msk.bf16.vlgmr.msra.gmra.mxu2 %vm1082_vm2, %v1282_v58 }
 0x52d   : > { %1407 = vmatpush.bf16.msrb.mxu2 %v1398_v63 }
 0x52f   : > { %v1191_v59 = vpop.f32.mrf.mxu2 }
 0x530   : > { %v1194_v60 = vpack.c.bf16 %v1191_v59, %v1189_v55 }
 0x532   : > { %4129 = vmatmul.msk.bf16.vlgmr.msrb.gmra.mxu0 %vm1061_vm1, %v1194_v60 }
 0x5a2   : > { %v1388_v5 = vpop.f32.mrf.mxu3 }
 0x5aa   : > { %v1390_v6 = vpop.f32.mrf.mxu3 }
 0x5ab   : > { %v1393_v7 = vpack.c.bf16 %v1390_v6, %v1388_v5 }
 0x5ad   : > { %4136 = vmatmul.msk.bf16.vlgmr.msrb.gmra.mxu2 %vm1061_vm1, %v1393_v7 }
 0x5af   : > { %v1298_v8 = vpop.f32.mrf.mxu2  ;;  %v1211_v12 = vpop.f32.mrf.mxu0 }
 0x5b0   : > { %v1232_v14 = vadd.f32 %v5365_v61, %v1211_v12 }
 0x5b7   : > { %v1300_v9 = vpop.f32.mrf.mxu2  ;;  %v1213_v13 = vpop.f32.mrf.mxu0 }
 0x5b8   : > { %v1303_v10 = vpack.c.bf16 %v1300_v9, %v1298_v8  ;;  %v1234_v21 = vadd.f32 %v5368_v1, %v1213_v13  ;;  %v1431_v1 = vsub.f32 1.0, %v1430_v32 }
 0x5ba   : > { %4133 = vmatmul.msk.bf16.vlgmr.msra.gmra.mxu0 %vm1061_vm1, %v1303_v10  ;;  %v1432_v33 = vmul.f32 %v4448_v31, %v1431_v1 }
 0x630   : > { %v1409_v15 = vpop.f32.mrf.mxu2 }
 0x637   : > { %v1319_v16 = vpop.f32.mrf.mxu0 }
 0x638   : > { %v1324_v17 = vadd.f32 %v1319_v16, %v1232_v14  ;;  %v1411_v26 = vpop.f32.mrf.mxu2 }
 0x63a   : > { %v1414_v19 = vadd.f32 %v1409_v15, %v1324_v17 }
 0x63c   : > { %v1419_v20 = vadd.f32 %v4412_v18, %v1414_v19 }
 0x63e   : > { %v1421_v22 = vadd.f32 %v1419_v20, %v5326_v2  ;;  %v1433_v2 = vadd.f32 %v4448_v31, %v1432_v33 }
 0x63f   : > { %v1321_v23 = vpop.f32.mrf.mxu0 }
 0x640   : > { %v1325_v24 = vadd.f32 %v1321_v23, %v1234_v21  ;;  %v1423_v25 = vsel %vm1034_vm0, %v1421_v22, 0.0  ;;  %v1435_v34 = vsel %vm1434_vm4, %v4448_v31, %v1433_v2 }
 0x641   : > { %1424 = vadd.xlane.f32.xlu2 %v1423_v25 }
 0x642   : > { %v1415_v27 = vadd.f32 %v1411_v26, %v1325_v24  ;;  %v4413_v26 = vld [vmem:[%s6094_s10] ss:$0 sm:$0xff] }
 0x644   : > { %v1420_v28 = vadd.f32 %v4412_v18, %v1415_v27 }
 0x646   : > { %v1422_v61 = vadd.f32 %v1420_v28, %v5328_v3 }
 0x648   : > { %v1426_v29 = vsel %vm1034_vm0, %v1422_v61, 0.0 }
 0x649   : > { %1427 = vadd.xlane.f32.xlu0 %v1426_v29  ;;  %v4414_v29 = vld [vmem:[%s5280_s22] ss:$0 sm:$0xff] }
 0x6b4   : > { %v1425_v35 = vpop.xlane.xlu2 %1424 }
 0x6b5   : > { %v1436_v36 = vmul.f32 %v1435_v34, %v1425_v35 }
 0x6b7   : > { %v5398_v37 = vsub.f32 %v1421_v22, %v1436_v36 }
 0x6b9   : > { %v1440_v38 = vmul.f32 %v5398_v37, %v5398_v37 }
 0x6bb   : > { %v1442_v3 = vsel %vm1034_vm0, %v1440_v38, 0.0 }
 0x6bc   : > { %1443 = vadd.xlane.f32.xlu1 %v1442_v3  ;;  %v1428_v39 = vpop.xlane.xlu0 %1427 }
 0x6bd   : > { %v1437_v40 = vmul.f32 %v1435_v34, %v1428_v39 }
 0x6bf   : > { %v5403_v41 = vsub.f32 %v1422_v61, %v1437_v40 }
 0x6c1   : > { %v1441_v42 = vmul.f32 %v5403_v41, %v5403_v41 }
 0x6c3   : > { %v1445_v43 = vsel %vm1034_vm0, %v1441_v42, 0.0 }
 0x6c4   : > { %1446 = vadd.xlane.f32.xlu2 %v1445_v43 }
 0x72f   : > { %v1444_v51 = vpop.xlane.xlu1 %1443 }
 0x730   : > { %v1455_v52 = vmul.f32 %v1454_v50, %v1444_v51 }
 0x732   : > { %4451 = vrsqrt.f32 %v1455_v52  ;;  %vm1464_vm6 = vcmp.eq.f32.partialorder %v1455_v52, inf  ;;  %v1467_v4 = vand.u32 2147483648, %v1455_v52  ;;  %vm1466_vm7 = vcmp.eq.f32.partialorder %v1455_v52, 0.0 }
 0x737   : > { %v1447_v11 = vpop.xlane.xlu2 %1446 }
 0x738   : > { %v4452_v53 = vpop.eup %4451  ;;  %v1456_v54 = vmul.f32 %v1454_v50, %v1447_v11 }
 0x739   : > { %v1458_v55 = vmul.f32 %v4452_v53, %v1455_v52 }
 0x73a   : > { %4453 = vrsqrt.f32 %v1456_v54  ;;  %vm1476_vm8 = vcmp.eq.f32.partialorder %v1456_v54, inf  ;;  %v1479_v13 = vand.u32 2147483648, %v1456_v54  ;;  %vm1478_vm9 = vcmp.eq.f32.partialorder %v1456_v54, 0.0 }
 0x73b   : > { %v1459_v56 = vmul.f32 %v4452_v53, %v1458_v55 }
 0x73d   : > { %v1460_v57 = vmul.f32 0.5, %v1459_v56 }
 0x73f   : > { %v1461_v58 = vsub.f32 1.5, %v1460_v57 }
 0x740   : > { %v4454_v59 = vpop.eup %4453 }
 0x741   : > { %v1462_v60 = vmul.f32 %v4452_v53, %v1461_v58  ;;  %v1470_v62 = vmul.f32 %v4454_v59, %v1456_v54 }
 0x743   : > { %v1463_v63 = vmul.f32 %v1462_v60, %v1455_v52  ;;  %v1471_v0 = vmul.f32 %v4454_v59, %v1470_v62 }
 0x745   : > { %v1465_v5 = vsel %vm1464_vm6, %v1455_v52, %v1463_v63  ;;  %v1472_v6 = vmul.f32 0.5, %v1471_v0 }
 0x746   : > { %v1468_v7 = vsel %vm1466_vm7, %v1467_v4, %v1465_v5 }
 0x747   : > { %v1481_v8 = vadd.f32 0.001, %v1468_v7  ;;  %v1473_v9 = vsub.f32 1.5, %v1472_v6 }
 0x749   : > { %4455 = vrcp.f32 %v1481_v8  ;;  %v1474_v10 = vmul.f32 %v4454_v59, %v1473_v9  ;;  %v1494_v20 = vand.u32 2147483648, %v1481_v8  ;;  %v1492_v22 = vand.u32 2147483647, %v1481_v8 }
 0x74a   : > { %vm1488_vm11 = vweird.f32 %v1481_v8 }
 0x74b   : > { %v1475_v12 = vmul.f32 %v1474_v10, %v1456_v54  ;;  %v1495_v24 = vor.u32 1.1754944e-38, %v1494_v20  ;;  %vm1493_vm13 = vcmp.eq.f32.partialorder %v1492_v22, 8.507059e+37 }
 0x74d   : > { %v1477_v14 = vsel %vm1476_vm8, %v1456_v54, %v1475_v12 }
 0x74e   : > { %v1480_v16 = vsel %vm1478_vm9, %v1479_v13, %v1477_v14 }
 0x74f   : > { %v4456_v15 = vpop.eup %4455  ;;  %v1482_v18 = vadd.f32 0.001, %v1480_v16 }
 0x750   : > { %v1484_v17 = vmul.f32 %v4456_v15, %v1481_v8  ;;  %vm1489_vm10 = vweird.f32 %v4456_v15 }
 0x751   : > { %4457 = vrcp.f32 %v1482_v18  ;;  %vm1490_vm12 = vmor %vm1488_vm11, %vm1489_vm10  ;;  %v1509_v1 = vand.u32 2147483648, %v1482_v18  ;;  %v1507_v2 = vand.u32 2147483647, %v1482_v18  ;;  %vm1503_vm15 = vweird.f32 %v1482_v18 }
 0x752   : > { %v1485_v19 = vsub.f32 1.0, %v1484_v17 }
 0x753   : > { %v1510_v36 = vor.u32 1.1754944e-38, %v1509_v1  ;;  %vm1508_vm2 = vcmp.eq.f32.partialorder %v1507_v2, 8.507059e+37 }
 0x754   : > { %v1486_v21 = vmul.f32 %v4456_v15, %v1485_v19 }
 0x756   : > { %v1487_v23 = vadd.f32 %v4456_v15, %v1486_v21 }
 0x757   : > { %v4458_v25 = vpop.eup %4457 }
 0x758   : > { %v1491_v27 = vsel %vm1490_vm12, %v4456_v15, %v1487_v23  ;;  %v1499_v61 = vmul.f32 %v4458_v25, %v1482_v18  ;;  %vm1504_vm14 = vweird.f32 %v4458_v25 }
 0x759   : > { %v1496_v28 = vsel %vm1493_vm13, %v1495_v24, %v1491_v27  ;;  %vm1505_vm1 = vmor %vm1503_vm15, %vm1504_vm14 }
 0x75a   : > { %v1497_v30 = vmul.f32 %v1496_v28, %v5398_v37  ;;  %v1500_v31 = vsub.f32 1.0, %v1499_v61 }
 0x75c   : > { %v1516_v32 = vmul.f32 %v4413_v26, %v1497_v30  ;;  %v1501_v33 = vmul.f32 %v4458_v25, %v1500_v31 }
 0x75e   : > { %v1521_v34 = vadd.f32 %v4414_v29, %v1516_v32  ;;  %v1502_v35 = vadd.f32 %v4458_v25, %v1501_v33 }
 0x760   : > { %1523 = vst.msk [vmem:[#allocation12] sm:$0xff] %vm1034_vm0, %v1521_v34  ;;  %v1506_v38 = vsel %vm1505_vm1, %v4458_v25, %v1502_v35 }
 0x761   : > { %1525 = vst.msk [vmem:[#allocation12 + $0x10] sm:$0xff] %vm1034_vm0, %v1521_v34  ;;  %v1511_v3 = vsel %vm1508_vm2, %v1510_v36, %v1506_v38 }
 0x762   : > { %v1512_v37 = vmul.f32 %v1511_v3, %v5403_v41 }
 0x764   : > { %v1517_v39 = vmul.f32 %v4413_v26, %v1512_v37 }
 0x766   : > { %v1522_v40 = vadd.f32 %v4414_v29, %v1517_v39 }
 0x768   : > { %1524 = vst.msk [vmem:[#allocation12 + $0x8] sm:$0xff] %vm1034_vm0, %v1522_v40 }
 0x769   : > { %1526 = vst.msk [vmem:[#allocation12 + $0x18] sm:$0xff] %vm1034_vm0, %v1522_v40 }
 0x76a PF: > { %p4137_p3 = scmp.le.s32.totalorder %s4945_s21, 0 }
 0x76b   : > { %s4974_s21 = smov (!%p4137_p3), 120   ;;  %s4976_s6 = smov (!%p4137_p3), 88  }
 0x76c   : > { %1530 = sbr.rel (%p4137_p3) target bundleno = 4762 (0x129a), region = 132  ;;  %s4977_s30 = smov (!%p4137_p3), 56  }
 0x76d   : > { %s4978_s2 = smov (!%p4137_p3), 112   ;;  %s4979_s19 = smov (!%p4137_p3), 80  }
 0x76e   : > { %s4980_s7 = smov (!%p4137_p3), 64   ;;  %s4981_s23 = smov (!%p4137_p3), 72  }
 0x76f   : > { %s4982_s8 = smov (!%p4137_p3), 48   ;;  %s4983_s16 = smov (!%p4137_p3), 104  }
 0x770   : > { %s4984_s25 = smov (!%p4137_p3), 40  }
 0x771   : > { %v4257_v42 = vld [vmem:[%s5269_s15 + $0x8] sm:$0xff]  ;;  %v4256_v43 = vld [vmem:[%s5269_s15] sm:$0xff]  ;;  %vm1560_vm3 = vcmask 261120   ;;  %s4975_s15 = smov 96   ;;  %vm1597_vm0 = vcmask 64512   ;;  %vm1618_vm4 = vcmask 130048  }
 0x772   : > { %1573 = vmatpush.bf16.msra.mxu0 %v4257_v42  ;;  %v5420_v44 = vld [vmem:[#allocation12] sm:$0xff]  ;;  %v5422_v45 = vld [vmem:[#allocation12 + $0x8] sm:$0xff]  ;;  %v1539_v42 = vld [vmem:[%s5274_s28] sm:$0xf]  ;;  %vm1734_vm5 = vcmask 1043456  }
 0x773   : > { %v1546_v41 = vpack.c.bf16 %v5422_v45, %v5420_v44 }
 0x776   : > { %1574 = vmatpush.bf16.msra.mxu0 %v4256_v43  ;;  %v5462_v43 = vsel %vm1734_vm5, %v1539_v42, 0 }
 0x779   : > { %4146 = vmatmul.msk.bf16.vlgmr.msra.gmra.mxu0 %vm1560_vm3, %v1546_v41 }
 0x7f6   : > { %v1576_v46 = vpop.f32.mrf.mxu0 }
 0x7f7   : > { %v1586_v47 = vpack.c.bf16 %v1576_v46, %v1576_v46 }
 0x7f9   : > { %v1592_v50 = vunpack.c.l.b16 %v1586_v47 }
 0x7fe   : > { %v1578_v48 = vpop.f32.mrf.mxu0 }
 0x7ff   : > { %v1587_v49 = vpack.c.bf16 %v1578_v48, %v1578_v48  ;;  %v1540_v48 = vld [vmem:[%s5274_s28 + $0x4] sm:$0xf] }
 0x801   : > { %v1593_v51 = vunpack.c.l.b16 %v1587_v49  ;;  %v5468_v49 = vsel %vm1734_vm5, %v1540_v48, 0 }
 0x803   : > { %v5427_v52 = vpack.c.b16 %v1593_v51, %v1592_v50 }
 0x805   : > { %1663 = vrot.lane.b32.xlu1 %v5427_v52, %s4974_s21  ;;  %1595 = vrot.lane.b32.xlu0 %v5427_v52, %s4975_s15 }
 0x80d   : > { %1665 = vrot.lane.b32.xlu0 %v5427_v52, %s4976_s6 }
 0x877   : > { %v1596_v11 = vpop.permute.xlu0 %1595  ;;  %v1664_v56 = vpop.permute.xlu1 %1663 }
 0x878   : > { %v1602_v53 = vsel %vm1597_vm0, %v1596_v11, 0 }
 0x879   : > { %1611 = vmatpush.bf16.xpose.msra.mxu1 %v1602_v53 }
 0x87f   : > { %v1666_v54 = vpop.permute.xlu0 %1665 }
 0x880   : > { %4148 = vmatmul.msk.bf16.vlgmr.msra.gmra.mxu1 %vm1597_vm0, %v5427_v52  ;;  %v1671_v55 = vsel %vm1597_vm0, %v1666_v54, 0 }
 0x881   : > { %1680 = vmatpush.bf16.xpose.msra.mxu3 %v1671_v55  ;;  %1745 = vmatpush.bf16.msrb.mxu1 %v5468_v49 }
 0x888   : > { %4150 = vmatmul.msk.bf16.vlgmr.msra.gmra.mxu3 %vm1597_vm0, %v1664_v56 }
 0x889   : > { %1765 = vmatpush.bf16.msrb.mxu3 %v5462_v43 }
 0x8fd   : > { %v1613_v57 = vpop.f32.mrf.mxu1 }
 0x8fe   : > { %v1619_v58 = vsel %vm1618_vm4, %v1613_v57, -inf }
 0x8ff   : > { %1620 = vmax.xlane.f32.xlu1 %v1619_v58  ;;  %v5478_v58 = vld [vmem:[#allocation12 + $0x18] sm:$0xff] }
 0x905   : > { %v1615_v62 = vpop.f32.mrf.mxu1 }
 0x906   : > { %v1622_v0 = vsel %vm1618_vm4, %v1615_v62, -inf }
 0x90b   : > { %v1682_v59 = vpop.f32.mrf.mxu3 }
 0x90c   : > { %v1687_v60 = vsel %vm1618_vm4, %v1682_v59, -inf }
 0x90d   : > { %1688 = vmax.xlane.f32.xlu2 %v1687_v60 }
 0x913   : > { %v1684_v63 = vpop.f32.mrf.mxu3 }
 0x914   : > { %v1690_v4 = vsel %vm1618_vm4, %v1684_v63, -inf }
 0x915   : > { %1623 = vmax.xlane.f32.xlu2 %v1622_v0  ;;  %1691 = vmax.xlane.f32.xlu0 %v1690_v4 }
 0x929   : > { %1710 = vrot.lane.b32.xlu0 %v5427_v52, %s4977_s30 }
 0x931   : > { %1772 = vrot.lane.b32.xlu0 %v5427_v52, %s4978_s2 }
 0x972   : > { %v1621_v5 = vpop.xlane.xlu1 %1620 }
 0x973   : > { %v1625_v6 = vsub.f32 %v1613_v57, %v1621_v5  ;;  %v5476_v57 = vld [vmem:[#allocation12 + $0x10] sm:$0xff] }
 0x975   : > { %v1627_v7 = vmul.f32 1.442695, %v1625_v6 }
 0x977   : > { %4462 = vpow2.f32 %v1627_v7 }
 0x97d   : > { %v4463_v8 = vpop.eup %4462 }
 0x97e   : > { %v1631_v9 = vsel %vm1618_vm4, %v4463_v8, 0.0 }
 0x97f   : > { %1632 = vadd.xlane.f32.xlu2 %v1631_v9 }
 0x980   : > { %v1689_v10 = vpop.xlane.xlu2 %1688 }
 0x981   : > { %v1693_v12 = vsub.f32 %v1682_v59, %v1689_v10  ;;  %v1547_v59 = vpack.c.bf16 %v5478_v58, %v5476_v57 }
 0x983   : > { %v1695_v13 = vmul.f32 1.442695, %v1693_v12  ;;  %4147 = vmatmul.msk.bf16.gmra.mxu0 %vm1560_vm3, %v1547_v59 }
 0x985   : > { %4464 = vpow2.f32 %v1695_v13 }
 0x988   : > { %v1624_v14 = vpop.xlane.xlu2 %1623  ;;  %v1692_v21 = vpop.xlane.xlu0 %1691 }
 0x989   : > { %v1626_v15 = vsub.f32 %v1615_v62, %v1624_v14  ;;  %v1694_v22 = vsub.f32 %v1684_v63, %v1692_v21 }
 0x98b   : > { %v4465_v16 = vpop.eup %4464  ;;  %v1629_v17 = vmul.f32 1.442695, %v1626_v15  ;;  %v1697_v23 = vmul.f32 1.442695, %v1694_v22 }
 0x98c   : > { %v1699_v18 = vsel %vm1618_vm4, %v4465_v16, 0.0 }
 0x98d   : > { %4466 = vpow2.f32 %v1629_v17  ;;  %1700 = vadd.xlane.f32.xlu1 %v1699_v18 }
 0x98e   : > { %4468 = vpow2.f32 %v1697_v23 }
 0x993   : > { %v4467_v19 = vpop.eup %4466 }
 0x994   : > { %v1634_v20 = vsel %vm1618_vm4, %v4467_v19, 0.0  ;;  %v4469_v24 = vpop.eup %4468 }
 0x995   : > { %1635 = vadd.xlane.f32.xlu2 %v1634_v20  ;;  %v1702_v25 = vsel %vm1618_vm4, %v4469_v24, 0.0 }
 0x99b   : > { %v1711_v1 = vpop.permute.xlu0 %1710 }
 0x9a3   : > { %v1773_v40 = vpop.permute.xlu0 %1772 }
 0x9a6   : > { %1774 = vrot.lane.b32.xlu1 %v5427_v52, %s4979_s19 }
 0x9ad   : > { %1642 = vrot.lane.b32.xlu2 %v5427_v52, %s4980_s7 }
 0x9d6   : > { %1703 = vadd.xlane.f32.xlu2 %v1702_v25 }
 0x9f2   : > { %v1633_v26 = vpop.xlane.xlu2 %1632 }
 0x9f3   : > { %4470 = vrcp.f32 %v1633_v26 }
 0x9f9   : > { %v4471_v28 = vpop.eup %4470 }
 0x9fa   : > { %v1639_v31 = vmul.f32 %v4471_v28, %v4463_v8 }
 0xa00   : > { %v1701_v29 = vpop.xlane.xlu1 %1700 }
 0xa08   : > { %v1636_v27 = vpop.xlane.xlu2 %1635 }
 0xa09   : > { %4472 = vrcp.f32 %v1636_v27 }
 0xa0a   : > { %4474 = vrcp.f32 %v1701_v29 }
 0xa0f   : > { %v4473_v61 = vpop.eup %4472 }
 0xa10   : > { %v1643_v30 = vpop.permute.xlu2 %1642  ;;  %v1640_v32 = vmul.f32 %v4473_v61, %v4467_v19  ;;  %v4475_v36 = vpop.eup %4474 }
 0xa11   : > { %1655 = vmatpush.bf16.msra.mxu2 %v1643_v30  ;;  %v1707_v3 = vmul.f32 %v4475_v36, %v4465_v16  ;;  %v1581_v16 = vpop.f32.mrf.mxu0 }
 0xa12   : > { %v1641_v33 = vpack.c.bf16 %v1640_v32, %v1639_v31  ;;  %v1588_v18 = vpack.c.bf16 %v1581_v16, %v1581_v16  ;;  %v1541_v31 = vld [vmem:[%s5274_s28 + $0x8] sm:$0xf] }
 0xa13   : > { %v1844_v32 = vsel %vm1734_vm5, %v1541_v31, 0 }
 0xa14   : > { %4149 = vmatmul.msk.bf16.vlgmr.msra.gmra.mxu2 %vm1618_vm4, %v1641_v33  ;;  %v1954_v20 = vunpack.c.l.b16 %v1588_v18  ;;  %1853 = vmatpush.bf16.msra.mxu1 %v1844_v32 }
 0xa15   : > { %1723 = vmatpush.bf16.msrb.mxu2 %v1711_v1 }
 0xa18   : > { %v1775_v2 = vpop.permute.xlu1 %1774 }
 0xa19   : > { %v1780_v34 = vsel %vm1597_vm0, %v1775_v2, 0  ;;  %v1583_v19 = vpop.f32.mrf.mxu0 }
 0xa1a   : > { %1789 = vmatpush.bf16.xpose.msra.mxu2 %v1780_v34  ;;  %v1589_v21 = vpack.c.bf16 %v1583_v19, %v1583_v19 }
 0xa1c   : > { %v1955_v22 = vunpack.c.l.b16 %v1589_v21 }
 0xa49   : > { %v1704_v35 = vpop.xlane.xlu2 %1703 }
 0xa4a   : > { %4476 = vrcp.f32 %v1704_v35 }
 0xa50   : > { %v4477_v38 = vpop.eup %4476 }
 0xa51   : > { %v1708_v37 = vmul.f32 %v4477_v38, %v4469_v24  ;;  %v5490_v24 = vpack.c.b16 %v1955_v22, %v1954_v20 }
 0xa53   : > { %v1709_v39 = vpack.c.bf16 %v1708_v37, %v1707_v3 }
 0xa55   : > { %4151 = vmatmul.msk.bf16.vlgmr.msrb.gmra.mxu2 %vm1618_vm4, %v1709_v39 }
 0xa65   : > { %4154 = vmatmul.msk.bf16.vlgmr.msra.gmra.mxu2 %vm1597_vm0, %v1773_v40 }
 0xa97   : > { %v1657_v41 = vpop.f32.mrf.mxu2 }
 0xa9f   : > { %v1659_v46 = vpop.f32.mrf.mxu2 }
 0xaa0   : > { %v1662_v47 = vpack.c.bf16 %v1659_v46, %v1657_v41 }
 0xaa2   : > { %4153 = vmatmul.msk.bf16.vlgmr.msrb.gmra.mxu3 %vm1597_vm0, %v1662_v47 }
 0xad8   : > { %v1725_v50 = vpop.f32.mrf.mxu2 }
 0xae0   : > { %v1727_v51 = vpop.f32.mrf.mxu2 }
 0xae1   : > { %v1730_v11 = vpack.c.bf16 %v1727_v51, %v1725_v50 }
 0xae3   : > { %4152 = vmatmul.msk.bf16.vlgmr.msrb.gmra.mxu1 %vm1597_vm0, %v1730_v11 }
 0xae8   : > { %v1791_v53 = vpop.f32.mrf.mxu2 }
 0xae9   : > { %v1796_v54 = vsel %vm1618_vm4, %v1791_v53, -inf }
 0xaea   : > { %1797 = vmax.xlane.f32.xlu1 %v1796_v54 }
 0xaf0   : > { %v1793_v55 = vpop.f32.mrf.mxu2 }
 0xaf1   : > { %v1799_v56 = vsel %vm1618_vm4, %v1793_v55, -inf }
 0xaf2   : > { %1800 = vmax.xlane.f32.xlu0 %v1799_v56 }
 0xb03   : > { %1957 = vrot.lane.b32.xlu1 %v5490_v24, %s4975_s15 }
 0xb06   : > { %1864 = vrot.lane.b32.xlu0 %v5427_v52, %s4981_s23 }
 0xb25   : > { %v1767_v63 = vpop.f32.mrf.mxu3 }
 0xb5d   : > { %v1798_v60 = vpop.xlane.xlu1 %1797 }
 0xb5e   : > { %v1802_v62 = vsub.f32 %v1791_v53, %v1798_v60 }
 0xb60   : > { %v1804_v0 = vmul.f32 1.442695, %v1802_v62  ;;  %v1747_v4 = vpop.f32.mrf.mxu1 }
 0xb61   : > { %v1768_v5 = vadd.f32 %v1767_v63, %v1747_v4 }
 0xb62   : > { %4478 = vpow2.f32 %v1804_v0 }
 0xb65   : > { %v1801_v6 = vpop.xlane.xlu0 %1800 }
 0xb66   : > { %v1803_v7 = vsub.f32 %v1793_v55, %v1801_v6 }
 0xb68   : > { %v4479_v8 = vpop.eup %4478  ;;  %v1806_v9 = vmul.f32 1.442695, %v1803_v7  ;;  %v5503_v36 = vpop.f32.mrf.mxu1 }
 0xb69   : > { %v1808_v10 = vsel %vm1618_vm4, %v4479_v8, 0.0 }
 0xb6a   : > { %4480 = vpow2.f32 %v1806_v9  ;;  %1809 = vadd.xlane.f32.xlu2 %v1808_v10 }
 0xb70   : > { %v4481_v12 = vpop.eup %4480 }
 0xb71   : > { %v1811_v13 = vsel %vm1618_vm4, %v4481_v12, 0.0 }
 0xb72   : > { %1812 = vadd.xlane.f32.xlu2 %v1811_v13 }
 0xb75   : > { %v1958_v1 = vpop.permute.xlu1 %1957 }
 0xb76   : > { %v1963_v33 = vsel %vm1597_vm0, %v1958_v1, 0 }
 0xb77   : > { %1972 = vmatpush.bf16.xpose.msrb.mxu1 %v1963_v33 }
 0xb78   : > { %v1865_v14 = vpop.permute.xlu0 %1864 }
 0xb79   : > { %v1870_v15 = vsel %vm1597_vm0, %v1865_v14, 0 }
 0xb7a   : > { %1879 = vmatpush.bf16.xpose.msra.mxu3 %v1870_v15 }
 0xb8a   : > { %1819 = vrot.lane.b32.xlu2 %v5427_v52, %s4982_s8 }
 0xb92   : > { %1862 = vrot.lane.b32.xlu2 %v5427_v52, %s4983_s16 }
 0xbdd   : > { %v1810_v17 = vpop.xlane.xlu2 %1809 }
 0xbde   : > { %4482 = vrcp.f32 %v1810_v17 }
 0xbe4   : > { %v4483_v25 = vpop.eup %4482 }
 0xbe5   : > { %v1813_v23 = vpop.xlane.xlu2 %1812  ;;  %v1816_v27 = vmul.f32 %v4483_v25, %v4479_v8 }
 0xbe6   : > { %4484 = vrcp.f32 %v1813_v23 }
 0xbec   : > { %v4485_v26 = vpop.eup %4484 }
 0xbed   : > { %v1817_v28 = vmul.f32 %v4485_v26, %v4481_v12  ;;  %v1820_v61 = vpop.permute.xlu2 %1819 }
 0xbee   : > { %1832 = vmatpush.bf16.msrb.mxu0 %v1820_v61 }
 0xbef   : > { %v1818_v29 = vpack.c.bf16 %v1817_v28, %v1816_v27 }
 0xbf1   : > { %4155 = vmatmul.msk.bf16.vlgmr.msrb.gmra.mxu0 %vm1618_vm4, %v1818_v29 }
 0xbf5   : > { %v1863_v30 = vpop.permute.xlu2 %1862 }
 0xbf6   : > { %4157 = vmatmul.msk.bf16.vlgmr.msra.gmra.mxu3 %vm1597_vm0, %v1863_v30 }
 0xc6e   : > { %v1834_v2 = vpop.f32.mrf.mxu0 }
 0xc76   : > { %v1836_v34 = vpop.f32.mrf.mxu0 }
 0xc77   : > { %v1839_v35 = vpack.c.bf16 %v1836_v34, %v1834_v2 }
 0xc79   : > { %4156 = vmatmul.msk.bf16.vlgmr.msra.gmra.mxu1 %vm1597_vm0, %v1839_v35 }
 0xc7a   : > { %2101 = vmatpush.bf16.msra.mxu1 %v5468_v49  ;;  %v5521_v49 = vpop.f32.mrf.mxu3 }
 0xc82   : > { %v1881_v55 = vpop.f32.mrf.mxu3 }
 0xc83   : > { %v1886_v59 = vsel %vm1618_vm4, %v1881_v55, -inf }
 0xc89   : > { %4160 = vmatmul.msk.bf16.vlgmr.msrb.gmra.mxu1 %vm1597_vm0, %v5490_v24 }
 0xc8a   : > { %2203 = vmatpush.bf16.msrb.mxu1 %v1844_v32  ;;  %v1883_v62 = vpop.f32.mrf.mxu3 }
 0xc8b   : > { %v1889_v0 = vsel %vm1618_vm4, %v1883_v62, -inf }
 0xcf6   : > { %v1855_v38 = vpop.f32.mrf.mxu1 }
 0xcf7   : > { %v5505_v3 = vadd.f32 %v1855_v38, %v1768_v5 }
 0xcfe   : > { %v5507_v37 = vpop.f32.mrf.mxu1 }
 0xd06   : > { %v1974_v39 = vpop.f32.mrf.mxu1 }
 0xd07   : > { %v1979_v40 = vsel %vm1618_vm4, %v1974_v39, -inf }
 0xd08   : > { %1980 = vmax.xlane.f32.xlu2 %v1979_v40  ;;  %v1542_v40 = vld [vmem:[%s5274_s28 + $0xc] sm:$0xf] }
 0xd0e   : > { %v1976_v42 = vpop.f32.mrf.mxu1 }
 0xd0f   : > { %v1982_v41 = vsel %vm1618_vm4, %v1976_v42, -inf }
 0xd10   : > { %1983 = vmax.xlane.f32.xlu0 %v1982_v41 }
 0xd24   : > { %2002 = vrot.lane.b32.xlu0 %v5490_v24, %s4980_s7 }
 0xd2c   : > { %2025 = vrot.lane.b32.xlu0 %v5490_v24, %s4976_s6 }
 0xd34   : > { %2214 = vrot.lane.b32.xlu0 %v5490_v24, %s4981_s23 }
 0xd3c   : > { %2127 = vrot.lane.b32.xlu0 %v5490_v24, %s4979_s19 }
 0xd44   : > { %2125 = vrot.lane.b32.xlu0 %v5490_v24, %s4978_s2 }
 0xd7b   : > { %v1981_v46 = vpop.xlane.xlu2 %1980 }
 0xd7c   : > { %v1985_v47 = vsub.f32 %v1974_v39, %v1981_v46 }
 0xd7e   : > { %v1987_v48 = vmul.f32 1.442695, %v1985_v47 }
 0xd80   : > { %4486 = vpow2.f32 %v1987_v48 }
 0xd83   : > { %v1984_v50 = vpop.xlane.xlu0 %1983 }
 0xd84   : > { %v1986_v51 = vsub.f32 %v1976_v42, %v1984_v50  ;;  %v5547_v42 = vsel %vm1734_vm5, %v1542_v40, 0 }
 0xd85   : > { %1943 = vmatpush.bf16.msra.mxu0 %v5547_v42 }
 0xd86   : > { %v4487_v11 = vpop.eup %4486  ;;  %v1989_v53 = vmul.f32 1.442695, %v1986_v51 }
 0xd87   : > { %v1991_v54 = vsel %vm1618_vm4, %v4487_v11, 0.0 }
 0xd88   : > { %4488 = vpow2.f32 %v1989_v53  ;;  %1992 = vadd.xlane.f32.xlu1 %v1991_v54 }
 0xd8e   : > { %v4489_v56 = vpop.eup %4488 }
 0xd8f   : > { %v1994_v60 = vsel %vm1618_vm4, %v4489_v56, 0.0 }
 0xd90   : > { %1887 = vmax.xlane.f32.xlu1 %v1886_v59  ;;  %1995 = vadd.xlane.f32.xlu2 %v1994_v60 }
 0xd96   : > { %v2003_v63 = vpop.permute.xlu0 %2002 }
 0xd97   : > { %2015 = vmatpush.bf16.msrb.mxu3 %v2003_v63 }
 0xd98   : > { %1890 = vmax.xlane.f32.xlu2 %v1889_v0 }
 0xd9b   : > { %2118 = vmatpush.bf16.msra.mxu3 %v5462_v43 }
 0xd9e   : > { %v2026_v5 = vpop.permute.xlu0 %2025 }
 0xda6   : > { %v2215_v16 = vpop.permute.xlu0 %2214 }
 0xda7   : > { %v2220_v43 = vsel %vm1597_vm0, %v2215_v16, 0 }
 0xdae   : > { %v2128_v33 = vpop.permute.xlu0 %2127 }
 0xdaf   : > { %v2133_v34 = vsel %vm1597_vm0, %v2128_v33, 0 }
 0xdb6   : > { %v2126_v39 = vpop.permute.xlu0 %2125 }
 0xdfb   : > { %v1993_v4 = vpop.xlane.xlu1 %1992 }
 0xdfc   : > { %4490 = vrcp.f32 %v1993_v4 }
 0xe02   : > { %v4491_v10 = vpop.eup %4490 }
 0xe03   : > { %v1888_v6 = vpop.xlane.xlu1 %1887  ;;  %v1996_v7 = vpop.xlane.xlu2 %1995  ;;  %v1999_v13 = vmul.f32 %v4491_v10, %v4487_v11 }
 0xe04   : > { %v1892_v8 = vsub.f32 %v1881_v55, %v1888_v6  ;;  %4492 = vrcp.f32 %v1996_v7  ;;  %v5564_v7 = vld [vmem:[%s5264_s26] ss:$0 sm:$0xff]  ;;  %s6095_s26 = scalar_lea.vmem [#allocation7], %s5245_s13 }
 0xe06   : > { %v1894_v9 = vmul.f32 1.442695, %v1892_v8 }
 0xe08   : > { %4494 = vpow2.f32 %v1894_v9 }
 0xe0a   : > { %v4493_v12 = vpop.eup %4492 }
 0xe0b   : > { %v2000_v14 = vmul.f32 %v4493_v12, %v4489_v56  ;;  %v1891_v15 = vpop.xlane.xlu2 %1890 }
 0xe0c   : > { %v1893_v17 = vsub.f32 %v1883_v62, %v1891_v15 }
 0xe0d   : > { %v2001_v18 = vpack.c.bf16 %v2000_v14, %v1999_v13 }
 0xe0e   : > { %v4495_v19 = vpop.eup %4494  ;;  %v1896_v20 = vmul.f32 1.442695, %v1893_v17 }
 0xe0f   : > { %4161 = vmatmul.msk.bf16.vlgmr.msrb.gmra.mxu3 %vm1618_vm4, %v2001_v18  ;;  %v1898_v21 = vsel %vm1618_vm4, %v4495_v19, 0.0 }
 0xe10   : > { %4496 = vpow2.f32 %v1896_v20  ;;  %2229 = vmatpush.bf16.xpose.msrb.mxu3 %v2220_v43  ;;  %1899 = vadd.xlane.f32.xlu1 %v1898_v21 }
 0xe16   : > { %v4497_v22 = vpop.eup %4496 }
 0xe17   : > { %v1901_v23 = vsel %vm1618_vm4, %v4497_v22, 0.0 }
 0xe18   : > { %1902 = vadd.xlane.f32.xlu2 %v1901_v23 }
 0xe29   : > { %1909 = vrot.lane.b32.xlu1 %v5427_v52, %s4984_s25  ;;  %v2031_v52 = vsel %vm1597_vm0, %v2026_v5, 0 }
 0xe30   : > { %2023 = vrot.lane.b32.xlu2 %v5490_v24, %s4974_s21 }
 0xe31   : > { %2212 = vrot.lane.b32.xlu1 %v5490_v24, %s4983_s16 }
 0xe83   : > { %v1900_v26 = vpop.xlane.xlu1 %1899 }
 0xe8b   : > { %v1903_v25 = vpop.xlane.xlu2 %1902 }
 0xe8c   : > { %4498 = vrcp.f32 %v1903_v25 }
 0xe8d   : > { %4500 = vrcp.f32 %v1900_v26 }
 0xe92   : > { %v2017_v27 = vpop.f32.mrf.mxu3  ;;  %v4499_v28 = vpop.eup %4498 }
 0xe93   : > { %v4501_v61 = vpop.eup %4500  ;;  %v1907_v29 = vmul.f32 %v4499_v28, %v4497_v22  ;;  %v2024_v38 = vpop.permute.xlu2 %2023 }
 0xe94   : > { %v1906_v31 = vmul.f32 %v4501_v61, %v4495_v19 }
 0xe96   : > { %v1908_v2 = vpack.c.bf16 %v1907_v29, %v1906_v31 }
 0xe9a   : > { %v2019_v30 = vpop.f32.mrf.mxu3 }
 0xe9b   : > { %v2022_v32 = vpack.c.bf16 %v2019_v30, %v2017_v27  ;;  %v1910_v1 = vpop.permute.xlu1 %1909 }
 0xe9c   : > { %1922 = vmatpush.bf16.msrb.mxu2 %v1910_v1 }
 0xe9d   : > { %4165 = vmatmul.msk.bf16.vlgmr.msra.gmra.mxu3 %vm1597_vm0, %v2022_v32 }
 0xe9f   : > { %4158 = vmatmul.msk.bf16.vlgmr.msrb.gmra.mxu2 %vm1618_vm4, %v1908_v2 }
 0xea0   : > { %2040 = vmatpush.bf16.xpose.msra.mxu2 %v2031_v52 }
 0xea3   : > { %v2213_v35 = vpop.permute.xlu1 %2212 }
 0xea8   : > { %2142 = vmatpush.bf16.xpose.msrb.mxu2 %v2133_v34 }
 0xead   : > { %4169 = vmatmul.msk.bf16.vlgmr.msrb.gmra.mxu3 %vm1597_vm0, %v2213_v35 }
 0xeaf   : > { %4162 = vmatmul.msk.bf16.vlgmr.msra.gmra.mxu2 %vm1597_vm0, %v2024_v38 }
 0xebf   : > { %4166 = vmatmul.msk.bf16.vlgmr.msrb.gmra.mxu2 %vm1597_vm0, %v2126_v39  ;;  %v1770_v39 = vadd.f32 %v5521_v49, %v5503_v36 }
 0xf20   : > { %v5550_v41 = vpop.f32.mrf.mxu3 }
 0xf22   : > { %v1924_v46 = vpop.f32.mrf.mxu2 }
 0xf28   : > { %v5552_v47 = vpop.f32.mrf.mxu3 }
 0xf2a   : > { %v1926_v48 = vpop.f32.mrf.mxu2 }
 0xf2b   : > { %v1929_v50 = vpack.c.bf16 %v1926_v48, %v1924_v46  ;;  %v1861_v46 = vadd.f32 %v5507_v37, %v1770_v39 }
 0xf2d   : > { %4159 = vmatmul.msk.bf16.vlgmr.msra.gmra.mxu0 %vm1597_vm0, %v1929_v50 }
 0xf30   : > { %v2231_v51 = vpop.f32.mrf.mxu3 }
 0xf31   : > { %v2236_v11 = vsel %vm1618_vm4, %v2231_v51, -inf }
 0xf32   : > { %v2042_v53 = vpop.f32.mrf.mxu2  ;;  %2237 = vmax.xlane.f32.xlu0 %v2236_v11 }
 0xf33   : > { %v2047_v54 = vsel %vm1618_vm4, %v2042_v53, -inf }
 0xf34   : > { %2048 = vmax.xlane.f32.xlu2 %v2047_v54 }
 0xf38   : > { %v2233_v55 = vpop.f32.mrf.mxu3 }
 0xf39   : > { %v2239_v60 = vsel %vm1618_vm4, %v2233_v55, -inf }
 0xf3a   : > { %v2044_v56 = vpop.f32.mrf.mxu2 }
 0xf3b   : > { %v2050_v59 = vsel %vm1618_vm4, %v2044_v56, -inf }
 0xf3c   : > { %2051 = vmax.xlane.f32.xlu1 %v2050_v59  ;;  %2240 = vmax.xlane.f32.xlu2 %v2239_v60 }
 0xf42   : > { %v2144_v62 = vpop.f32.mrf.mxu2 }
 0xf43   : > { %v2149_v63 = vsel %vm1618_vm4, %v2144_v62, -inf }
 0xf44   : > { %2150 = vmax.xlane.f32.xlu1 %v2149_v63 }
 0xf4a   : > { %v2146_v0 = vpop.f32.mrf.mxu2 }
 0xf4b   : > { %v2152_v4 = vsel %vm1618_vm4, %v2146_v0, -inf }
 0xf4c   : > { %2153 = vmax.xlane.f32.xlu2 %v2152_v4 }
 0xf64   : > { %2070 = vrot.lane.b32.xlu2 %v5490_v24, %s4977_s30 }
 0xfa5   : > { %v2238_v20 = vpop.xlane.xlu0 %2237 }
 0xfa6   : > { %v2242_v23 = vsub.f32 %v2231_v51, %v2238_v20 }
 0xfa7   : > { %v2049_v5 = vpop.xlane.xlu2 %2048 }
 0xfa8   : > { %v2053_v6 = vsub.f32 %v2042_v53, %v2049_v5  ;;  %v2244_v26 = vmul.f32 1.442695, %v2242_v23 }
 0xfaa   : > { %v2055_v8 = vmul.f32 1.442695, %v2053_v6  ;;  %v1945_v9 = vpop.f32.mrf.mxu0 }
 0xfab   : > { %v1950_v10 = vadd.f32 %v1945_v9, %v5505_v3 }
 0xfac   : > { %4502 = vpow2.f32 %v2055_v8 }
 0xfad   : > { %v2302_v12 = vadd.f32 %v5564_v7, %v1950_v10 }
 0xfaf   : > { %v2052_v13 = vpop.xlane.xlu1 %2051  ;;  %v5569_v14 = vadd.f32 %v2302_v12, %v5420_v44  ;;  %v2241_v3 = vpop.xlane.xlu2 %2240 }
 0xfb0   : > { %v2054_v15 = vsub.f32 %v2044_v56, %v2052_v13  ;;  %v2243_v29 = vsub.f32 %v2233_v55, %v2241_v3 }
 0xfb1   : > { %v2310_v16 = vsel %vm1560_vm3, %v5569_v14, 0.0 }
 0xfb2   : > { %v4503_v17 = vpop.eup %4502  ;;  %v2057_v18 = vmul.f32 1.442695, %v2054_v15  ;;  %2311 = vadd.xlane.f32.xlu2 %v2310_v16  ;;  %v2246_v32 = vmul.f32 1.442695, %v2243_v29  ;;  %v1947_v40 = vpop.f32.mrf.mxu0  ;;  %v4985_v16 = vmov 32.0  }
 0xfb3   : > { %v2059_v19 = vsel %vm1618_vm4, %v4503_v17, 0.0  ;;  %v1951_v48 = vadd.f32 %v1947_v40, %v1861_v46 }
 0xfb4   : > { %4504 = vpow2.f32 %v2057_v18  ;;  %2060 = vadd.xlane.f32.xlu0 %v2059_v19 }
 0xfb5   : > { %v2303_v50 = vadd.f32 %v5564_v7, %v1951_v48 }
 0xfb7   : > { %v2151_v43 = vpop.xlane.xlu1 %2150  ;;  %v2307_v51 = vadd.f32 %v2303_v50, %v5422_v45 }
 0xfb8   : > { %v2155_v21 = vsub.f32 %v2144_v62, %v2151_v43 }
 0xfb9   : > { %v2313_v11 = vsel %vm1560_vm3, %v2307_v51, 0.0 }
 0xfba   : > { %v4505_v22 = vpop.eup %4504  ;;  %v2157_v25 = vmul.f32 1.442695, %v2155_v21 }
 0xfbb   : > { %v2062_v44 = vsel %vm1618_vm4, %v4505_v22, 0.0 }
 0xfbc   : > { %4506 = vpow2.f32 %v2157_v25  ;;  %2063 = vadd.xlane.f32.xlu1 %v2062_v44 }
 0xfbd   : > { %4508 = vpow2.f32 %v2244_v26 }
 0xfbf   : > { %v2154_v27 = vpop.xlane.xlu2 %2153 }
 0xfc0   : > { %v2156_v28 = vsub.f32 %v2146_v0, %v2154_v27 }
 0xfc2   : > { %v4507_v61 = vpop.eup %4506  ;;  %v2159_v30 = vmul.f32 1.442695, %v2156_v28 }
 0xfc3   : > { %v2161_v31 = vsel %vm1618_vm4, %v4507_v61, 0.0  ;;  %v4509_v52 = vpop.eup %4508 }
 0xfc4   : > { %4510 = vpow2.f32 %v2159_v30  ;;  %2162 = vadd.xlane.f32.xlu0 %v2161_v31  ;;  %v2248_v34 = vsel %vm1618_vm4, %v4509_v52, 0.0 }
 0xfc5   : > { %4512 = vpow2.f32 %v2246_v32 }
 0xfc7   : > { %v2071_v1 = vpop.permute.xlu2 %2070 }
 0xfc8   : > { %2083 = vmatpush.bf16.msrb.mxu0 %v2071_v1 }
 0xfca   : > { %v4511_v33 = vpop.eup %4510 }
 0xfcb   : > { %v2164_v2 = vsel %vm1618_vm4, %v4511_v33, 0.0  ;;  %v4513_v35 = vpop.eup %4512 }
 0xfcc   : > { %2165 = vadd.xlane.f32.xlu1 %v2164_v2  ;;  %2249 = vadd.xlane.f32.xlu0 %v2248_v34  ;;  %v2251_v38 = vsel %vm1618_vm4, %v4513_v35, 0.0 }
 0xfd4   : > { %2252 = vadd.xlane.f32.xlu1 %v2251_v38 }
 0xfe0   : > { %2259 = vrot.lane.b32.xlu0 %v5490_v24, %s4984_s25 }
 0xfed   : > { %2172 = vrot.lane.b32.xlu1 %v5490_v24, %s4982_s8 }
0x100a   : > { %2314 = vadd.xlane.f32.xlu0 %v2313_v11 }
0x1027   : > { %v2061_v53 = vpop.xlane.xlu0 %2060 }
0x1028   : > { %4514 = vrcp.f32 %v2061_v53 }
0x102e   : > { %v4515_v55 = vpop.eup %4514 }
0x102f   : > { %v2064_v54 = vpop.xlane.xlu1 %2063  ;;  %v2067_v56 = vmul.f32 %v4515_v55, %v4503_v17 }
0x1030   : > { %4516 = vrcp.f32 %v2064_v54 }
0x1036   : > { %v4517_v24 = vpop.eup %4516 }
0x1037   : > { %v2068_v59 = vmul.f32 %v4517_v24, %v4505_v22  ;;  %v2163_v37 = vpop.xlane.xlu0 %2162 }
0x1039   : > { %v2069_v36 = vpack.c.bf16 %v2068_v59, %v2067_v56 }
0x103b   : > { %4163 = vmatmul.msk.bf16.vlgmr.msrb.gmra.mxu0 %vm1618_vm4, %v2069_v36 }
0x103f   : > { %v2166_v49 = vpop.xlane.xlu1 %2165  ;;  %v2250_v60 = vpop.xlane.xlu0 %2249 }
0x1047   : > { %v2253_v62 = vpop.xlane.xlu1 %2252 }
0x1048   : > { %4518 = vrcp.f32 %v2253_v62 }
0x1049   : > { %4520 = vrcp.f32 %v2250_v60 }
0x104a   : > { %4522 = vrcp.f32 %v2166_v49 }
0x104b   : > { %4524 = vrcp.f32 %v2163_v37 }
0x104c   : > { %4526 = vrcp.f32 %v4985_v16 }
0x104e   : > { %v4519_v45 = vpop.eup %4518 }
0x104f   : > { %v4521_v63 = vpop.eup %4520  ;;  %v2257_v0 = vmul.f32 %v4519_v45, %v4513_v35 }
0x1050   : > { %v2256_v4 = vmul.f32 %v4521_v63, %v4509_v52  ;;  %v4523_v8 = vpop.eup %4522 }
0x1051   : > { %v4525_v9 = vpop.eup %4524  ;;  %v2170_v10 = vmul.f32 %v4523_v8, %v4511_v33  ;;  %v5608_v8 = vld [vmem:[%s5280_s22] ss:$0 sm:$0xff] }
0x1052   : > { %v2260_v5 = vpop.permute.xlu0 %2259  ;;  %v2258_v6 = vpack.c.bf16 %v2257_v0, %v2256_v4  ;;  %v2169_v12 = vmul.f32 %v4525_v9, %v4507_v61  ;;  %v4527_v17 = vpop.eup %4526  ;;  %v4986_v61 = vmov 31.0   ;;  %v5605_v4 = vld [vmem:[%s6095_s26] ss:$0 sm:$0xff] }
0x1053   : > { %2272 = vmatpush.bf16.msra.mxu2 %v2260_v5  ;;  %v2323_v18 = vmul.f32 32.0, %v4527_v17  ;;  %vm2327_vm6 = vweird.f32 %v4527_v17  ;;  %4528 = vrcp.f32 %v4986_v61 }
0x1054   : > { %v2171_v15 = vpack.c.bf16 %v2170_v10, %v2169_v12 }
0x1055   : > { %v2324_v19 = vsub.f32 1.0, %v2323_v18 }
0x1056   : > { %4170 = vmatmul.msk.bf16.vlgmr.msra.gmra.mxu2 %vm1618_vm4, %v2258_v6 }
0x1057   : > { %v2325_v20 = vmul.f32 %v4527_v17, %v2324_v19 }
0x1059   : > { %v2326_v3 = vadd.f32 %v4527_v17, %v2325_v20  ;;  %v4529_v32 = vpop.eup %4528 }
0x105a   : > { %v2354_v1 = vmul.f32 31.0, %v4529_v32  ;;  %vm2358_vm7 = vweird.f32 %v4529_v32 }
0x105b   : > { %v5593_v43 = vsel %vm2327_vm6, %v4527_v17, %v2326_v3 }
0x105c   : > { %v2355_v2 = vsub.f32 1.0, %v2354_v1 }
0x105e   : > { %v2356_v34 = vmul.f32 %v4529_v32, %v2355_v2 }
0x105f   : > { %v2173_v13 = vpop.permute.xlu1 %2172 }
0x1060   : > { %2185 = vmatpush.bf16.msra.mxu0 %v2173_v13  ;;  %v2357_v35 = vadd.f32 %v4529_v32, %v2356_v34 }
0x1062   : > { %v5600_v38 = vsel %vm2358_vm7, %v4529_v32, %v2357_v35 }
0x1063   : > { %4167 = vmatmul.msk.bf16.vlgmr.msra.gmra.mxu0 %vm1618_vm4, %v2171_v15 }
0x1064   : > { %2290 = vmatpush.bf16.msrb.mxu0 %v5547_v42 }
0x107d   : > { %v2315_v21 = vpop.xlane.xlu0 %2314 }
0x107e   : > { %v2330_v22 = vmul.f32 %v5593_v43, %v2315_v21 }
0x1080   : > { %v2334_v23 = vsub.f32 %v2307_v51, %v2330_v22 }
0x1082   : > { %v2338_v25 = vmul.f32 %v2334_v23, %v2334_v23 }
0x1084   : > { %v2344_v44 = vsel %vm1560_vm3, %v2338_v25, 0.0 }
0x1085   : > { %2345 = vadd.xlane.f32.xlu0 %v2344_v44 }
0x10b8   : > { %v2085_v42 = vpop.f32.mrf.mxu0 }
0x10c0   : > { %v2087_v26 = vpop.f32.mrf.mxu0 }
0x10c1   : > { %v2090_v27 = vpack.c.bf16 %v2087_v26, %v2085_v42  ;;  %v2312_v42 = vpop.xlane.xlu2 %2311 }
0x10c3   : > { %4164 = vmatmul.msk.bf16.vlgmr.msra.gmra.mxu1 %vm1597_vm0, %v2090_v27 }
0x10d9   : > { %v2274_v28 = vpop.f32.mrf.mxu2 }
0x10e0   : > { %v2187_v29 = vpop.f32.mrf.mxu0 }
0x10e1   : > { %v2276_v30 = vpop.f32.mrf.mxu2 }
0x10e2   : > { %v2279_v31 = vpack.c.bf16 %v2276_v30, %v2274_v28 }
0x10e4   : > { %4171 = vmatmul.msk.bf16.vlgmr.msrb.gmra.mxu0 %vm1597_vm0, %v2279_v31 }
0x10e8   : > { %v2189_v52 = vpop.f32.mrf.mxu0 }
0x10e9   : > { %v2192_v33 = vpack.c.bf16 %v2189_v52, %v2187_v29 }
0x10eb   : > { %4168 = vmatmul.msk.bf16.vlgmr.msrb.gmra.mxu1 %vm1597_vm0, %v2192_v33 }
0x10f8   : > { %v2346_v39 = vpop.xlane.xlu0 %2345 }
0x10f9   : > { %v2361_v40 = vmul.f32 %v5600_v38, %v2346_v39 }
0x10fb   : > { %4530 = vrsqrt.f32 %v2361_v40  ;;  %vm2383_vm8 = vcmp.eq.f32.partialorder %v2361_v40, inf  ;;  %v2386_v55 = vand.u32 2147483648, %v2361_v40  ;;  %vm2385_vm9 = vcmp.eq.f32.partialorder %v2361_v40, 0.0 }
0x1101   : > { %v4531_v46 = vpop.eup %4530 }
0x1102   : > { %v2377_v48 = vmul.f32 %v4531_v46, %v2361_v40 }
0x1104   : > { %v2378_v50 = vmul.f32 %v4531_v46, %v2377_v48 }
0x1106   : > { %v2379_v51 = vmul.f32 0.5, %v2378_v50 }
0x1108   : > { %v2380_v11 = vsub.f32 1.5, %v2379_v51 }
0x110a   : > { %v2381_v53 = vmul.f32 %v4531_v46, %v2380_v11 }
0x110c   : > { %v2382_v54 = vmul.f32 %v2381_v53, %v2361_v40 }
0x110e   : > { %v2384_v24 = vsel %vm2383_vm8, %v2361_v40, %v2382_v54 }
0x110f   : > { %v2387_v56 = vsel %vm2385_vm9, %v2386_v55, %v2384_v24 }
0x1110   : > { %v2413_v59 = vadd.f32 0.001, %v2387_v56 }
0x1112   : > { %4532 = vrcp.f32 %v2413_v59  ;;  %v2442_v60 = vand.u32 2147483648, %v2413_v59  ;;  %v2440_v45 = vand.u32 2147483647, %v2413_v59  ;;  %vm2436_vm11 = vweird.f32 %v2413_v59 }
0x1114   : > { %v2443_v0 = vor.u32 1.1754944e-38, %v2442_v60  ;;  %vm2441_vm13 = vcmp.eq.f32.partialorder %v2440_v45, 8.507059e+37 }
0x1118   : > { %v4533_v36 = vpop.eup %4532 }
0x1119   : > { %v2432_v37 = vmul.f32 %v4533_v36, %v2413_v59  ;;  %vm2437_vm10 = vweird.f32 %v4533_v36 }
0x111a   : > { %vm2438_vm12 = vmor %vm2436_vm11, %vm2437_vm10 }
0x111b   : > { %v2433_v49 = vsub.f32 1.0, %v2432_v37 }
0x111d   : > { %v2434_v62 = vmul.f32 %v4533_v36, %v2433_v49 }
0x111f   : > { %v2435_v63 = vadd.f32 %v4533_v36, %v2434_v62 }
0x1121   : > { %v2439_v5 = vsel %vm2438_vm12, %v4533_v36, %v2435_v63 }
0x1122   : > { %v2444_v6 = vsel %vm2441_vm13, %v2443_v0, %v2439_v5 }
0x1123   : > { %v2445_v9 = vmul.f32 %v2444_v6, %v2334_v23 }
0x1125   : > { %v2480_v10 = vmul.f32 %v5605_v4, %v2445_v9 }
0x1127   : > { %v2487_v12 = vadd.f32 %v5608_v8, %v2480_v10 }
0x1129   : > { %2491 = vst.msk [vmem:[#allocation12 + $0x8] sm:$0xff] %vm1560_vm3, %v2487_v12 }
0x1140   : > { %v2103_v13 = vpop.f32.mrf.mxu1 }
0x1141   : > { %v2121_v16 = vadd.f32 %v5550_v41, %v2103_v13  ;;  %v2329_v41 = vmul.f32 %v5593_v43, %v2312_v42 }
0x1143   : > { %v2333_v29 = vsub.f32 %v5569_v14, %v2329_v41 }
0x1148   : > { %v2105_v15 = vpop.f32.mrf.mxu1 }
0x1149   : > { %v2123_v21 = vadd.f32 %v5552_v47, %v2105_v15 }
0x1161   : > { %v2292_v17 = vpop.f32.mrf.mxu0 }
0x1168   : > { %v2205_v18 = vpop.f32.mrf.mxu1 }
0x1169   : > { %v2210_v19 = vadd.f32 %v2205_v18, %v2121_v16  ;;  %v2294_v26 = vpop.f32.mrf.mxu0 }
0x116b   : > { %v2297_v20 = vadd.f32 %v2292_v17, %v2210_v19 }
0x116d   : > { %v2304_v3 = vadd.f32 %v5564_v7, %v2297_v20 }
0x116f   : > { %v2308_v22 = vadd.f32 %v2304_v3, %v5476_v57  ;;  %v2337_v57 = vmul.f32 %v2333_v29, %v2333_v29 }
0x1170   : > { %v2207_v23 = vpop.f32.mrf.mxu1 }
0x1171   : > { %v2211_v25 = vadd.f32 %v2207_v23, %v2123_v21  ;;  %v2316_v44 = vsel %vm1560_vm3, %v2308_v22, 0.0  ;;  %v2341_v30 = vsel %vm1560_vm3, %v2337_v57, 0.0 }
0x1172   : > { %2317 = vadd.xlane.f32.xlu1 %v2316_v44 }
0x1173   : > { %v2298_v27 = vadd.f32 %v2294_v26, %v2211_v25 }
0x1175   : > { %v2305_v28 = vadd.f32 %v5564_v7, %v2298_v27 }
0x1177   : > { %v2309_v61 = vadd.f32 %v2305_v28, %v5478_v58 }
0x1179   : > { %v2319_v47 = vsel %vm1560_vm3, %v2309_v61, 0.0 }
0x117a   : > { %2320 = vadd.xlane.f32.xlu2 %v2319_v47 }
0x1182   : > { %2342 = vadd.xlane.f32.xlu2 %v2341_v30 }
0x11e5   : > { %v2318_v31 = vpop.xlane.xlu1 %2317 }
0x11e6   : > { %v2331_v32 = vmul.f32 %v5593_v43, %v2318_v31 }
0x11e8   : > { %v5625_v1 = vsub.f32 %v2308_v22, %v2331_v32 }
0x11ea   : > { %v2339_v52 = vmul.f32 %v5625_v1, %v5625_v1 }
0x11ec   : > { %v2347_v7 = vsel %vm1560_vm3, %v2339_v52, 0.0 }
0x11ed   : > { %2348 = vadd.xlane.f32.xlu2 %v2347_v7  ;;  %v2321_v58 = vpop.xlane.xlu2 %2320 }
0x11ee   : > { %v2332_v14 = vmul.f32 %v5593_v43, %v2321_v58 }
0x11f0   : > { %v5631_v33 = vsub.f32 %v2309_v61, %v2332_v14 }
0x11f2   : > { %v2340_v2 = vmul.f32 %v5631_v33, %v5631_v33 }
0x11f4   : > { %v2350_v34 = vsel %vm1560_vm3, %v2340_v2, 0.0 }
0x11f5   : > { %v2343_v35 = vpop.xlane.xlu2 %2342  ;;  %2351 = vadd.xlane.f32.xlu0 %v2350_v34 }
0x11f6   : > { %v2360_v39 = vmul.f32 %v5600_v38, %v2343_v35 }
0x11f8   : > { %4534 = vrsqrt.f32 %v2360_v39  ;;  %vm2371_vm14 = vcmp.eq.f32.partialorder %v2360_v39, inf  ;;  %v2374_v43 = vand.u32 2147483648, %v2360_v39  ;;  %vm2373_vm15 = vcmp.eq.f32.partialorder %v2360_v39, 0.0 }
0x11fe   : > { %v4535_v40 = vpop.eup %4534 }
0x11ff   : > { %v2365_v46 = vmul.f32 %v4535_v40, %v2360_v39 }
0x1201   : > { %v2366_v48 = vmul.f32 %v4535_v40, %v2365_v46 }
0x1203   : > { %v2367_v50 = vmul.f32 0.5, %v2366_v48 }
0x1205   : > { %v2368_v51 = vsub.f32 1.5, %v2367_v50 }
0x1207   : > { %v2369_v11 = vmul.f32 %v4535_v40, %v2368_v51 }
0x1209   : > { %v2370_v53 = vmul.f32 %v2369_v11, %v2360_v39 }
0x120b   : > { %v2372_v54 = vsel %vm2371_vm14, %v2360_v39, %v2370_v53 }
0x120c   : > { %v2375_v55 = vsel %vm2373_vm15, %v2374_v43, %v2372_v54 }
0x120d   : > { %v2412_v24 = vadd.f32 0.001, %v2375_v55 }
0x120f   : > { %4536 = vrcp.f32 %v2412_v24  ;;  %v2427_v37 = vand.u32 2147483648, %v2412_v24  ;;  %v2425_v60 = vand.u32 2147483647, %v2412_v24  ;;  %vm2421_vm2 = vweird.f32 %v2412_v24 }
0x1211   : > { %v2428_v45 = vor.u32 1.1754944e-38, %v2427_v37  ;;  %vm2426_vm4 = vcmp.eq.f32.partialorder %v2425_v60, 8.507059e+37 }
0x1215   : > { %v4537_v56 = vpop.eup %4536 }
0x1216   : > { %v2417_v59 = vmul.f32 %v4537_v56, %v2412_v24  ;;  %vm2422_vm1 = vweird.f32 %v4537_v56 }
0x1217   : > { %vm2423_vm0 = vmor %vm2421_vm2, %vm2422_vm1 }
0x1218   : > { %v2418_v36 = vsub.f32 1.0, %v2417_v59 }
0x121a   : > { %v2419_v49 = vmul.f32 %v4537_v56, %v2418_v36 }
0x121c   : > { %v2420_v62 = vadd.f32 %v4537_v56, %v2419_v49 }
0x121e   : > { %v2424_v63 = vsel %vm2423_vm0, %v4537_v56, %v2420_v62 }
0x121f   : > { %v2429_v0 = vsel %vm2426_vm4, %v2428_v45, %v2424_v63 }
0x1220   : > { %v2430_v5 = vmul.f32 %v2429_v0, %v2333_v29 }
0x1222   : > { %v2479_v6 = vmul.f32 %v5605_v4, %v2430_v5 }
0x1224   : > { %v2486_v9 = vadd.f32 %v5608_v8, %v2479_v6 }
0x1226   : > { %2490 = vst.msk [vmem:[#allocation12] sm:$0xff] %vm1560_vm3, %v2486_v9 }
0x1260   : > { %v2349_v10 = vpop.xlane.xlu2 %2348 }
0x1261   : > { %v2362_v12 = vmul.f32 %v5600_v38, %v2349_v10 }
0x1263   : > { %4538 = vrsqrt.f32 %v2362_v12  ;;  %vm2395_vm5 = vcmp.eq.f32.partialorder %v2362_v12, inf  ;;  %v2398_v44 = vand.u32 2147483648, %v2362_v12  ;;  %vm2397_vm6 = vcmp.eq.f32.partialorder %v2362_v12, 0.0 }
0x1268   : > { %v2352_v13 = vpop.xlane.xlu0 %2351 }
0x1269   : > { %v4539_v15 = vpop.eup %4538  ;;  %v2363_v16 = vmul.f32 %v5600_v38, %v2352_v13 }
0x126a   : > { %v2389_v17 = vmul.f32 %v4539_v15, %v2362_v12 }
0x126b   : > { %4540 = vrsqrt.f32 %v2363_v16  ;;  %vm2407_vm7 = vcmp.eq.f32.partialorder %v2363_v16, inf  ;;  %v2410_v29 = vand.u32 2147483648, %v2363_v16  ;;  %vm2409_vm8 = vcmp.eq.f32.partialorder %v2363_v16, 0.0 }
0x126c   : > { %v2390_v18 = vmul.f32 %v4539_v15, %v2389_v17 }
0x126e   : > { %v2391_v19 = vmul.f32 0.5, %v2390_v18 }
0x1270   : > { %v2392_v20 = vsub.f32 1.5, %v2391_v19 }
0x1271   : > { %v4541_v3 = vpop.eup %4540 }
0x1272   : > { %v2393_v21 = vmul.f32 %v4539_v15, %v2392_v20  ;;  %v2401_v22 = vmul.f32 %v4541_v3, %v2363_v16 }
0x1274   : > { %v2394_v23 = vmul.f32 %v2393_v21, %v2362_v12  ;;  %v2402_v25 = vmul.f32 %v4541_v3, %v2401_v22 }
0x1276   : > { %v2396_v42 = vsel %vm2395_vm5, %v2362_v12, %v2394_v23  ;;  %v2403_v26 = vmul.f32 0.5, %v2402_v25 }
0x1277   : > { %v2399_v27 = vsel %vm2397_vm6, %v2398_v44, %v2396_v42 }
0x1278   : > { %v2414_v41 = vadd.f32 0.001, %v2399_v27  ;;  %v2404_v28 = vsub.f32 1.5, %v2403_v26 }
0x127a   : > { %4542 = vrcp.f32 %v2414_v41  ;;  %v2405_v38 = vmul.f32 %v4541_v3, %v2404_v28  ;;  %v2457_v7 = vand.u32 2147483648, %v2414_v41  ;;  %v2455_v14 = vand.u32 2147483647, %v2414_v41 }
0x127b   : > { %vm2451_vm10 = vweird.f32 %v2414_v41 }
0x127c   : > { %v2406_v61 = vmul.f32 %v2405_v38, %v2363_v16  ;;  %v2458_v34 = vor.u32 1.1754944e-38, %v2457_v7  ;;  %vm2456_vm12 = vcmp.eq.f32.partialorder %v2455_v14, 8.507059e+37 }
0x127e   : > { %v2408_v47 = vsel %vm2407_vm7, %v2363_v16, %v2406_v61 }
0x127f   : > { %v2411_v30 = vsel %vm2409_vm8, %v2410_v29, %v2408_v47 }
0x1280   : > { %v4543_v57 = vpop.eup %4542  ;;  %v2415_v32 = vadd.f32 0.001, %v2411_v30 }
0x1281   : > { %v2447_v31 = vmul.f32 %v4543_v57, %v2414_v41  ;;  %vm2452_vm9 = vweird.f32 %v4543_v57 }
0x1282   : > { %4544 = vrcp.f32 %v2415_v32  ;;  %vm2453_vm11 = vmor %vm2451_vm10, %vm2452_vm9  ;;  %v2472_v11 = vand.u32 2147483648, %v2415_v32  ;;  %v2470_v43 = vand.u32 2147483647, %v2415_v32  ;;  %vm2466_vm14 = vweird.f32 %v2415_v32 }
0x1283   : > { %v2448_v52 = vsub.f32 1.0, %v2447_v31 }
0x1284   : > { %v2473_v24 = vor.u32 1.1754944e-38, %v2472_v11  ;;  %vm2471_vm1 = vcmp.eq.f32.partialorder %v2470_v43, 8.507059e+37 }
0x1285   : > { %v2449_v58 = vmul.f32 %v4543_v57, %v2448_v52 }
0x1287   : > { %v2450_v2 = vadd.f32 %v4543_v57, %v2449_v58 }
0x1288   : > { %v4545_v35 = vpop.eup %4544 }
0x1289   : > { %v2454_v39 = vsel %vm2453_vm11, %v4543_v57, %v2450_v2  ;;  %v2462_v46 = vmul.f32 %v4545_v35, %v2415_v32  ;;  %vm2467_vm13 = vweird.f32 %v4545_v35 }
0x128a   : > { %v2459_v40 = vsel %vm2456_vm12, %v2458_v34, %v2454_v39  ;;  %vm2468_vm15 = vmor %vm2466_vm14, %vm2467_vm13 }
0x128b   : > { %v2460_v48 = vmul.f32 %v2459_v40, %v5625_v1  ;;  %v2463_v50 = vsub.f32 1.0, %v2462_v46 }
0x128d   : > { %v2481_v51 = vmul.f32 %v5605_v4, %v2460_v48  ;;  %v2464_v53 = vmul.f32 %v4545_v35, %v2463_v50 }
0x128f   : > { %v2488_v54 = vadd.f32 %v5608_v8, %v2481_v51  ;;  %v2465_v55 = vadd.f32 %v4545_v35, %v2464_v53 }
0x1291   : > { %2492 = vst.msk [vmem:[#allocation12 + $0x10] sm:$0xff] %vm1560_vm3, %v2488_v54  ;;  %v2469_v56 = vsel %vm2468_vm15, %v4545_v35, %v2465_v55 }
0x1292   : > { %v2474_v59 = vsel %vm2471_vm1, %v2473_v24, %v2469_v56 }
0x1293   : > { %v2475_v1 = vmul.f32 %v2474_v59, %v5631_v33 }
0x1295   : > { %v2482_v36 = vmul.f32 %v5605_v4, %v2475_v1 }
0x1297   : > { %v2489_v37 = vadd.f32 %v5608_v8, %v2482_v36 }
0x1299   : > { %2493 = vst.msk [vmem:[#allocation12 + $0x18] sm:$0xff] %vm1560_vm3, %v2489_v37 }
0x129a PF: > { %v4259_v49 = vld [vmem:[%s5285_s9 + $0x8] sm:$0xff]  ;;  %v4258_v62 = vld [vmem:[%s5285_s9] sm:$0xff]  ;;  %v2498_v4 = vld [vmem:[#allocation5] sm:$0xff]  ;;  %vm2530_vm3 = vcmask 261120   ;;  %vm2596_vm2 = vcmask 64512   ;;  %s4987_s28 = smov 120  }
0x129b   : > { %v4261_v60 = vld [vmem:[%s815_s14 + $0x8] sm:$0xff]  ;;  %v4260_v45 = vld [vmem:[%s815_s14] sm:$0xff]  ;;  %2543 = vmatpush.bf16.msra.mxu0 %v4259_v49  ;;  %s4988_s22 = smov 96   ;;  %s4989_s9 = smov 112   ;;  %vm2648_vm0 = vcmask 1043456  }
0x129c   : > { %v5656_v63 = vld [vmem:[#allocation12] sm:$0xff]  ;;  %v5658_v33 = vld [vmem:[#allocation12 + $0x8] sm:$0xff]  ;;  %2577 = vmatpush.bf16.msra.mxu1 %v4261_v60  ;;  %v2499_v8 = vld [vmem:[#allocation5 + $0x8] sm:$0xff]  ;;  %s4990_s14 = smov 88   ;;  %s4991_s29 = smov 104  }
0x129d   : > { %v2516_v0 = vpack.c.bf16 %v5658_v33, %v5656_v63  ;;  %v2500_v5 = vpack.c.bf16 %v2499_v8, %v2498_v4  ;;  %v5691_v34 = vld [vmem:[#allocation12 + $0x10] sm:$0xff]  ;;  %s4992_s20 = smov 80   ;;  %s4993_s10 = smov 72  }
0x129e   : > { %v2509_v4 = vld [vmem:[%s5319_s4] sm:$0xf]  ;;  %s6103_s13 = sld [smem:[#allocation21_spill]] }
0x129f   : > { %2544 = vmatpush.bf16.msra.mxu0 %v4258_v62  ;;  %v5709_v8 = vsel %vm2648_vm0, %v2509_v4, 0 }
0x12a0   : > { %2578 = vmatpush.bf16.msra.mxu1 %v4260_v45  ;;  %v5693_v35 = vld [vmem:[#allocation12 + $0x18] sm:$0xff] }
0x12a1   : > { %v2517_v39 = vpack.c.bf16 %v5693_v35, %v5691_v34 }
0x12a2   : > { %4180 = vmatmul.msk.bf16.vlgmr.msra.gmra.mxu0 %vm2530_vm3, %v2516_v0 }
0x12a3   : > { %4190 = vmatmul.msk.bf16.vlgmr.msra.gmra.mxu1 %vm2530_vm3, %v2500_v5 }
0x12a4   : > { %p4318_p4 = scmp.eq.s32.totalorder %s6103_s13, 1 }
0x12b2   : > { %4181 = vmatmul.msk.bf16.gmra.mxu0 %vm2530_vm3, %v2517_v39 }
0x131f   : > { %v2546_v6 = vpop.f32.mrf.mxu0 }
0x1320   : > { %v2580_v9 = vpop.f32.mrf.mxu1  ;;  %v2585_v16 = vpack.c.bf16 %v2546_v6, %v2546_v6 }
0x1321   : > { %v2589_v10 = vpack.c.bf16 %v2580_v9, %v2580_v9 }
0x1322   : > { %v2593_v19 = vunpack.c.l.b16 %v2585_v16 }
0x1323   : > { %v2641_v12 = vunpack.c.l.b16 %v2589_v10  ;;  %v2601_v13 = vsel %vm2596_vm2, %v2589_v10, 0 }
0x1324   : > { %2610 = vmatpush.bf16.xpose.msra.mxu2 %v2601_v13 }
0x1325   : > { %v5665_v15 = vpack.c.b16 %v2641_v12, %v2641_v12 }
0x1327   : > { %2669 = vrot.lane.b32.xlu1 %v5665_v15, %s4987_s28  ;;  %v2548_v17 = vpop.f32.mrf.mxu0 }
0x1328   : > { %v2586_v18 = vpack.c.bf16 %v2548_v17, %v2548_v17 }
0x132a   : > { %v2594_v20 = vunpack.c.l.b16 %v2586_v18 }
0x132c   : > { %v2595_v3 = vpack.c.b16 %v2594_v20, %v2593_v19 }
0x132e   : > { %2667 = vrot.lane.b32.xlu2 %v2595_v3, %s4987_s28  ;;  %4191 = vmatmul.msk.bf16.vlgmr.msra.gmra.mxu2 %vm2596_vm2, %v2595_v3 }
0x132f   : > { %v2551_v1 = vpop.f32.mrf.mxu0 }
0x1330   : > { %v2587_v36 = vpack.c.bf16 %v2551_v1, %v2551_v1 }
0x1332   : > { %v2963_v49 = vunpack.c.l.b16 %v2587_v36 }
0x1337   : > { %v2553_v37 = vpop.f32.mrf.mxu0 }
0x1338   : > { %v2588_v60 = vpack.c.bf16 %v2553_v37, %v2553_v37 }
0x133a   : > { %v2964_v62 = vunpack.c.l.b16 %v2588_v60 }
0x133c   : > { %v5705_v45 = vpack.c.b16 %v2964_v62, %v2963_v49 }
0x1388   : > { %v2668_v23 = vpop.permute.xlu2 %2667 }
0x1399   : > { %v2670_v21 = vpop.permute.xlu1 %2669 }
0x139a   : > { %v2675_v22 = vsel %vm2596_vm2, %v2670_v21, 0 }
0x139b   : > { %2684 = vmatpush.bf16.xpose.msra.mxu3 %v2675_v22 }
0x13a2   : > { %4193 = vmatmul.msk.bf16.vlgmr.msra.gmra.mxu3 %vm2596_vm2, %v2668_v23 }
0x13a3   : > { %2770 = vmatpush.bf16.msrb.mxu3 %v5709_v8 }
0x13b1   : > { %v2612_v25 = vpop.f32.mrf.mxu2 }
0x13b2   : > { %v2617_v44 = vsel %vm2596_vm2, %v2612_v25, -inf }
0x13b3   : > { %2618 = vmax.xlane.f32.xlu0 %v2617_v44 }
0x13b9   : > { %v2614_v42 = vpop.f32.mrf.mxu2 }
0x13ba   : > { %v2620_v26 = vsel %vm2596_vm2, %v2614_v42, -inf }
0x13bb   : > { %2621 = vmax.xlane.f32.xlu0 %v2620_v26 }
0x13cf   : > { %2643 = vrot.lane.b32.xlu0 %v5665_v15, %s4988_s22 }
0x13d7   : > { %2777 = vrot.lane.b32.xlu0 %v2595_v3, %s4989_s9 }
0x1425   : > { %v5678_v27 = vpop.f32.mrf.mxu3 }
0x1426   : > { %v2619_v41 = vpop.xlane.xlu0 %2618  ;;  %v2691_v2 = vsel %vm2596_vm2, %v5678_v27, -inf }
0x1427   : > { %v2623_v28 = vsub.f32 %v2612_v25, %v2619_v41 }
0x1429   : > { %v2625_v38 = vmul.f32 1.442695, %v2623_v28 }
0x142b   : > { %4553 = vpow2.f32 %v2625_v38 }
0x142d   : > { %v5680_v61 = vpop.f32.mrf.mxu3 }
0x142e   : > { %v2694_v29 = vsel %vm2596_vm2, %v5680_v61, -inf  ;;  %v2622_v47 = vpop.xlane.xlu0 %2621 }
0x142f   : > { %2695 = vmax.xlane.f32.xlu0 %v2694_v29  ;;  %v2624_v57 = vsub.f32 %v2614_v42, %v2622_v47 }
0x1431   : > { %v4554_v30 = vpop.eup %4553  ;;  %v2627_v31 = vmul.f32 1.442695, %v2624_v57 }
0x1432   : > { %v2629_v32 = vsel %vm2596_vm2, %v4554_v30, 0.0 }
0x1433   : > { %4555 = vpow2.f32 %v2627_v31  ;;  %2630 = vadd.xlane.f32.xlu1 %v2629_v32 }
0x1439   : > { %v4556_v52 = vpop.eup %4555 }
0x143a   : > { %v2632_v7 = vsel %vm2596_vm2, %v4556_v52, 0.0 }
0x143b   : > { %2633 = vadd.xlane.f32.xlu2 %v2632_v7 }
0x1441   : > { %v2644_v58 = vpop.permute.xlu0 %2643 }
0x1442   : > { %v2650_v14 = vsel %vm2648_vm0, %v2644_v58, 0  ;;  %v2510_v58 = vld [vmem:[%s5319_s4 + $0x4] sm:$0xf] }
0x1443   : > { %2659 = vmatpush.bf16.msrb.mxu0 %v2650_v14  ;;  %v2741_v14 = vsel %vm2648_vm0, %v2510_v58, 0 }
0x1444   : > { %2750 = vmatpush.bf16.msrb.mxu2 %v2741_v14 }
0x1449   : > { %v2778_v55 = vpop.permute.xlu0 %2777 }
0x1453   : > { %2779 = vrot.lane.b32.xlu2 %v5665_v15, %s4989_s9 }
0x147c   : > { %2692 = vmax.xlane.f32.xlu2 %v2691_v2  ;;  %v2511_v2 = vld [vmem:[%s5319_s4 + $0x8] sm:$0xf] }
0x147d   : > { %v2851_v39 = vsel %vm2648_vm0, %v2511_v2, 0 }
0x147e   : > { %2860 = vmatpush.bf16.msra.mxu2 %v2851_v39 }
0x1494   : > { %2714 = vrot.lane.b32.xlu2 %v5665_v15, %s4990_s14 }
0x149c   : > { %2869 = vrot.lane.b32.xlu2 %v2595_v3, %s4991_s29 }
0x14a2   : > { %v2696_v16 = vpop.xlane.xlu0 %2695 }
0x14a3   : > { %v2698_v17 = vsub.f32 %v5680_v61, %v2696_v16 }
0x14a5   : > { %v2701_v20 = vmul.f32 1.442695, %v2698_v17 }
0x14a6   : > { %v2631_v40 = vpop.xlane.xlu1 %2630 }
0x14a7   : > { %4557 = vrcp.f32 %v2631_v40 }
0x14ad   : > { %v4558_v48 = vpop.eup %4557 }
0x14ae   : > { %v2634_v46 = vpop.xlane.xlu2 %2633  ;;  %v2637_v51 = vmul.f32 %v4558_v48, %v4554_v30 }
0x14af   : > { %4559 = vrcp.f32 %v2634_v46 }
0x14b5   : > { %v4560_v50 = vpop.eup %4559 }
0x14b6   : > { %v2638_v11 = vmul.f32 %v4560_v50, %v4556_v52  ;;  %v2780_v53 = vpop.permute.xlu2 %2779 }
0x14b7   : > { %v2785_v43 = vsel %vm2596_vm2, %v2780_v53, 0  ;;  %v2582_v53 = vpop.f32.mrf.mxu1 }
0x14b8   : > { %2794 = vmatpush.bf16.xpose.msra.mxu0 %v2785_v43  ;;  %v2639_v54 = vpack.c.bf16 %v2638_v11, %v2637_v51  ;;  %v2590_v36 = vpack.c.bf16 %v2582_v53, %v2582_v53 }
0x14ba   : > { %4192 = vmatmul.msk.bf16.vlgmr.msrb.gmra.mxu0 %vm2596_vm2, %v2639_v54  ;;  %v2970_v60 = vsel %vm2596_vm2, %v2590_v36, 0 }
0x14ca   : > { %4197 = vmatmul.msk.bf16.vlgmr.msra.gmra.mxu0 %vm2596_vm2, %v2778_v55 }
0x14ef   : > { %v2693_v24 = vpop.xlane.xlu2 %2692 }
0x14f0   : > { %v2697_v9 = vsub.f32 %v5678_v27, %v2693_v24 }
0x14f2   : > { %v2699_v13 = vmul.f32 1.442695, %v2697_v9 }
0x14f4   : > { %4561 = vpow2.f32 %v2699_v13 }
0x14f5   : > { %4563 = vpow2.f32 %v2701_v20 }
0x14f7   : > { %v2715_v56 = vpop.permute.xlu2 %2714 }
0x14f8   : > { %v2720_v59 = vsel %vm2648_vm0, %v2715_v56, 0 }
0x14f9   : > { %2729 = vmatpush.bf16.msrb.mxu1 %v2720_v59 }
0x14fa   : > { %v4562_v3 = vpop.eup %4561 }
0x14fb   : > { %v2703_v21 = vsel %vm2596_vm2, %v4562_v3, 0.0  ;;  %v4564_v22 = vpop.eup %4563 }
0x14fc   : > { %v2706_v23 = vsel %vm2596_vm2, %v4564_v22, 0.0 }
0x14ff   : > { %v2870_v1 = vpop.permute.xlu2 %2869 }
0x1537   : > { %v2661_v0 = vpop.f32.mrf.mxu0 }
0x153f   : > { %v2663_v5 = vpop.f32.mrf.mxu0 }
0x1540   : > { %v2666_v6 = vpack.c.bf16 %v2663_v5, %v2661_v0 }
0x1542   : > { %4196 = vmatmul.msk.bf16.vlgmr.msrb.gmra.mxu3 %vm2596_vm2, %v2666_v6 }
0x1547   : > { %v2796_v10 = vpop.f32.mrf.mxu0 }
0x1548   : > { %v2801_v12 = vsel %vm2596_vm2, %v2796_v10, -inf }
0x1549   : > { %2802 = vmax.xlane.f32.xlu1 %v2801_v12 }
0x154f   : > { %v2798_v18 = vpop.f32.mrf.mxu0 }
0x1550   : > { %v2804_v19 = vsel %vm2596_vm2, %v2798_v18, -inf }
0x1551   : > { %2805 = vmax.xlane.f32.xlu1 %v2804_v19 }
0x1559   : > { %2704 = vadd.xlane.f32.xlu1 %v2703_v21 }
0x1561   : > { %2707 = vadd.xlane.f32.xlu1 %v2706_v23  ;;  %v3010_v23 = vunpack.c.l.b16 %v2590_v36 }
0x15bc   : > { %v2803_v25 = vpop.xlane.xlu1 %2802 }
0x15bd   : > { %v2807_v44 = vsub.f32 %v2796_v10, %v2803_v25  ;;  %v5745_v25 = vpack.c.b16 %v3010_v23, %v3010_v23 }
0x15bf   : > { %v2809_v42 = vmul.f32 1.442695, %v2807_v44 }
0x15c1   : > { %4565 = vpow2.f32 %v2809_v42 }
0x15c4   : > { %v2806_v26 = vpop.xlane.xlu1 %2805 }
0x15c5   : > { %v2808_v27 = vsub.f32 %v2798_v18, %v2806_v26  ;;  %v2772_v9 = vpop.f32.mrf.mxu3 }
0x15c7   : > { %v4566_v41 = vpop.eup %4565  ;;  %v2811_v28 = vmul.f32 1.442695, %v2808_v27 }
0x15c8   : > { %v2813_v38 = vsel %vm2596_vm2, %v4566_v41, 0.0 }
0x15c9   : > { %4567 = vpow2.f32 %v2811_v28  ;;  %2814 = vadd.xlane.f32.xlu1 %v2813_v38 }
0x15cc   : > { %v2705_v61 = vpop.xlane.xlu1 %2704 }
0x15cd   : > { %4569 = vrcp.f32 %v2705_v61  ;;  %v2774_v16 = vpop.f32.mrf.mxu3 }
0x15cf   : > { %v4568_v29 = vpop.eup %4567 }
0x15d0   : > { %v2816_v47 = vsel %vm2596_vm2, %v4568_v29, 0.0 }
0x15d1   : > { %2817 = vadd.xlane.f32.xlu0 %v2816_v47 }
0x15d3   : > { %v4570_v30 = vpop.eup %4569 }
0x15d4   : > { %v2708_v57 = vpop.xlane.xlu1 %2707  ;;  %v2711_v32 = vmul.f32 %v4570_v30, %v4562_v3 }
0x15d5   : > { %4571 = vrcp.f32 %v2708_v57 }
0x15db   : > { %v4572_v31 = vpop.eup %4571 }
0x15dc   : > { %v2712_v52 = vmul.f32 %v4572_v31, %v4564_v22 }
0x15de   : > { %v2713_v7 = vpack.c.bf16 %v2712_v52, %v2711_v32 }
0x15e0   : > { %4194 = vmatmul.msk.bf16.vlgmr.msrb.gmra.mxu1 %vm2596_vm2, %v2713_v7 }
0x15e2   : > { %2824 = vrot.lane.b32.xlu1 %v5665_v15, %s4992_s20 }
0x15e5   : > { %2871 = vrot.lane.b32.xlu0 %v5665_v15, %s4991_s29 }
0x163c   : > { %v2815_v46 = vpop.xlane.xlu1 %2814 }
0x1644   : > { %v2818_v40 = vpop.xlane.xlu0 %2817 }
0x1645   : > { %4573 = vrcp.f32 %v2818_v40 }
0x1646   : > { %4575 = vrcp.f32 %v2815_v46 }
0x164b   : > { %v4574_v48 = vpop.eup %4573 }
0x164c   : > { %v4576_v50 = vpop.eup %4575  ;;  %v2822_v51 = vmul.f32 %v4574_v48, %v4568_v29 }
0x164d   : > { %v2821_v43 = vmul.f32 %v4576_v50, %v4566_v41 }
0x164f   : > { %v2823_v55 = vpack.c.bf16 %v2822_v51, %v2821_v43 }
0x1654   : > { %v2825_v11 = vpop.permute.xlu1 %2824 }
0x1655   : > { %v2830_v54 = vsel %vm2648_vm0, %v2825_v11, 0 }
0x1656   : > { %2839 = vmatpush.bf16.msra.mxu1 %v2830_v54 }
0x1657   : > { %v2872_v24 = vpop.permute.xlu0 %2871 }
0x1658   : > { %v2877_v56 = vsel %vm2596_vm2, %v2872_v24, 0 }
0x1659   : > { %4198 = vmatmul.msk.bf16.vlgmr.msra.gmra.mxu1 %vm2596_vm2, %v2823_v55  ;;  %2886 = vmatpush.bf16.xpose.msra.mxu3 %v2877_v56 }
0x165d   : > { %v2731_v59 = vpop.f32.mrf.mxu1 }
0x1660   : > { %4200 = vmatmul.msk.bf16.vlgmr.msra.gmra.mxu3 %vm2596_vm2, %v2870_v1 }
0x1665   : > { %v2733_v37 = vpop.f32.mrf.mxu1 }
0x1666   : > { %v2736_v49 = vpack.c.bf16 %v2733_v37, %v2731_v59 }
0x1668   : > { %4195 = vmatmul.msk.bf16.vlgmr.msrb.gmra.mxu2 %vm2596_vm2, %v2736_v49 }
0x1669   : > { %2979 = vmatpush.bf16.xpose.msrb.mxu2 %v2970_v60 }
0x16d6   : > { %v2841_v62 = vpop.f32.mrf.mxu1 }
0x16de   : > { %v2843_v4 = vpop.f32.mrf.mxu1 }
0x16df   : > { %v2846_v0 = vpack.c.bf16 %v2843_v4, %v2841_v62 }
0x16e1   : > { %4199 = vmatmul.msk.bf16.vlgmr.msra.gmra.mxu2 %vm2596_vm2, %v2846_v0 }
0x16e2   : > { %3115 = vmatpush.bf16.msra.mxu2 %v2741_v14 }
0x16e3   : > { %v2888_v29 = vpop.f32.mrf.mxu3 }
0x16e4   : > { %v2893_v57 = vsel %vm2596_vm2, %v2888_v29, -inf }
0x16eb   : > { %v2752_v5 = vpop.f32.mrf.mxu2  ;;  %v2890_v31 = vpop.f32.mrf.mxu3 }
0x16ec   : > { %v2773_v10 = vadd.f32 %v2772_v9, %v2752_v5  ;;  %v2896_v7 = vsel %vm2596_vm2, %v2890_v31, -inf }
0x16f1   : > { %4203 = vmatmul.msk.bf16.vlgmr.msrb.gmra.mxu2 %vm2596_vm2, %v5705_v45 }
0x16f2   : > { %3219 = vmatpush.bf16.msrb.mxu2 %v2851_v39 }
0x16f3   : > { %v2754_v6 = vpop.f32.mrf.mxu2 }
0x16f4   : > { %v2775_v17 = vadd.f32 %v2774_v16, %v2754_v6 }
0x1764   : > { %v2862_v12 = vpop.f32.mrf.mxu2 }
0x1765   : > { %v5739_v13 = vadd.f32 %v2862_v12, %v2773_v10 }
0x176c   : > { %v2864_v18 = vpop.f32.mrf.mxu2 }
0x176d   : > { %v5741_v19 = vadd.f32 %v2864_v18, %v2775_v17 }
0x1774   : > { %v2981_v20 = vpop.f32.mrf.mxu2 }
0x1775   : > { %v2986_v3 = vsel %vm2596_vm2, %v2981_v20, -inf }
0x1776   : > { %2987 = vmax.xlane.f32.xlu2 %v2986_v3 }
0x177c   : > { %v2983_v21 = vpop.f32.mrf.mxu2 }
0x177d   : > { %v2989_v22 = vsel %vm2596_vm2, %v2983_v21, -inf }
0x177e   : > { %2990 = vmax.xlane.f32.xlu0 %v2989_v22 }
0x1792   : > { %3012 = vrot.lane.b32.xlu0 %v5745_v25, %s4988_s22 }
0x179a   : > { %3037 = vrot.lane.b32.xlu0 %v5745_v25, %s4987_s28 }
0x17a2   : > { %3141 = vrot.lane.b32.xlu0 %v5745_v25, %s4989_s9 }
0x17aa   : > { %3230 = vrot.lane.b32.xlu0 %v5745_v25, %s4991_s29 }
0x17b2   : > { %3228 = vrot.lane.b32.xlu0 %v5705_v45, %s4991_s29 }
0x17e9   : > { %v2988_v44 = vpop.xlane.xlu2 %2987 }
0x17ea   : > { %v2992_v42 = vsub.f32 %v2981_v20, %v2988_v44 }
0x17ec   : > { %v2994_v26 = vmul.f32 1.442695, %v2992_v42 }
0x17ee   : > { %4577 = vpow2.f32 %v2994_v26 }
0x17f1   : > { %v2991_v27 = vpop.xlane.xlu0 %2990 }
0x17f2   : > { %v2993_v41 = vsub.f32 %v2983_v21, %v2991_v27  ;;  %v2512_v21 = vld [vmem:[%s5319_s4 + $0xc] sm:$0xf] }
0x17f3   : > { %v5783_v22 = vsel %vm2648_vm0, %v2512_v21, 0 }
0x17f4   : > { %v4578_v28 = vpop.eup %4577  ;;  %v2996_v38 = vmul.f32 1.442695, %v2993_v41  ;;  %2952 = vmatpush.bf16.msrb.mxu1 %v5783_v22 }
0x17f5   : > { %v2998_v61 = vsel %vm2596_vm2, %v4578_v28, 0.0 }
0x17f6   : > { %4579 = vpow2.f32 %v2996_v38  ;;  %2999 = vadd.xlane.f32.xlu1 %v2998_v61 }
0x17fc   : > { %v4580_v47 = vpop.eup %4579 }
0x17fd   : > { %v3001_v30 = vsel %vm2596_vm2, %v4580_v47, 0.0 }
0x17fe   : > { %2894 = vmax.xlane.f32.xlu1 %v2893_v57  ;;  %3002 = vadd.xlane.f32.xlu2 %v3001_v30 }
0x1804   : > { %v3013_v32 = vpop.permute.xlu0 %3012 }
0x1805   : > { %v3018_v52 = vsel %vm2648_vm0, %v3013_v32, 0 }
0x1806   : > { %2897 = vmax.xlane.f32.xlu2 %v2896_v7  ;;  %3027 = vmatpush.bf16.msrb.mxu3 %v3018_v52 }
0x180a   : > { %3132 = vmatpush.bf16.msra.mxu3 %v5709_v8 }
0x180c   : > { %v3038_v58 = vpop.permute.xlu0 %3037 }
0x180d   : > { %v3043_v16 = vsel %vm2596_vm2, %v3038_v58, 0 }
0x1814   : > { %v3142_v2 = vpop.permute.xlu0 %3141 }
0x1815   : > { %v3147_v17 = vsel %vm2596_vm2, %v3142_v2, 0 }
0x181c   : > { %v3231_v54 = vpop.permute.xlu0 %3230 }
0x181d   : > { %v3236_v59 = vsel %vm2596_vm2, %v3231_v54, 0 }
0x1824   : > { %v3229_v18 = vpop.permute.xlu0 %3228 }
0x1869   : > { %v3000_v14 = vpop.xlane.xlu1 %2999 }
0x186a   : > { %4581 = vrcp.f32 %v3000_v14 }
0x1870   : > { %v4582_v50 = vpop.eup %4581 }
0x1871   : > { %v2895_v39 = vpop.xlane.xlu1 %2894  ;;  %v3003_v40 = vpop.xlane.xlu2 %3002  ;;  %v3006_v11 = vmul.f32 %v4582_v50, %v4578_v28 }
0x1872   : > { %v2899_v46 = vsub.f32 %v2888_v29, %v2895_v39  ;;  %4583 = vrcp.f32 %v3003_v40 }
0x1874   : > { %v2901_v48 = vmul.f32 1.442695, %v2899_v46 }
0x1876   : > { %4585 = vpow2.f32 %v2901_v48 }
0x1878   : > { %v4584_v51 = vpop.eup %4583 }
0x1879   : > { %v3007_v53 = vmul.f32 %v4584_v51, %v4580_v47  ;;  %v2898_v43 = vpop.xlane.xlu2 %2897 }
0x187a   : > { %v2900_v55 = vsub.f32 %v2890_v31, %v2898_v43 }
0x187b   : > { %v3008_v24 = vpack.c.bf16 %v3007_v53, %v3006_v11 }
0x187c   : > { %v4586_v56 = vpop.eup %4585  ;;  %v2903_v8 = vmul.f32 1.442695, %v2900_v55 }
0x187d   : > { %4204 = vmatmul.msk.bf16.vlgmr.msrb.gmra.mxu3 %vm2596_vm2, %v3008_v24  ;;  %v2905_v1 = vsel %vm2596_vm2, %v4586_v56, 0.0 }
0x187e   : > { %4587 = vpow2.f32 %v2903_v8  ;;  %3245 = vmatpush.bf16.xpose.msrb.mxu3 %v3236_v59  ;;  %2906 = vadd.xlane.f32.xlu1 %v2905_v1 }
0x1884   : > { %v4588_v36 = vpop.eup %4587 }
0x1885   : > { %v2908_v37 = vsel %vm2596_vm2, %v4588_v36, 0.0 }
0x1886   : > { %2909 = vadd.xlane.f32.xlu2 %v2908_v37 }
0x1897   : > { %2916 = vrot.lane.b32.xlu1 %v5665_v15, %s4993_s10 }
0x189e   : > { %3035 = vrot.lane.b32.xlu2 %v5705_v45, %s4987_s28  ;;  %s6104_s28 = sld [smem:[#allocation43_spill]] }
0x189f   : > { %3139 = vrot.lane.b32.xlu1 %v5705_v45, %s4989_s9  ;;  %s4997_s9 = smov 128  }
0x18a4   : > { %s3809_s22 = sshll.u32 %s6104_s28, 4  ;;  %s3810_s22 = int_to_ptr.hbm [resolvable:$true] %s3809_s22 }
0x18f1   : > { %v2907_v60 = vpop.xlane.xlu1 %2906 }
0x18f9   : > { %v2910_v49 = vpop.xlane.xlu2 %2909 }
0x18fa   : > { %4589 = vrcp.f32 %v2910_v49 }
0x18fb   : > { %4591 = vrcp.f32 %v2907_v60 }
0x1900   : > { %v3029_v62 = vpop.f32.mrf.mxu3  ;;  %v4590_v4 = vpop.eup %4589 }
0x1901   : > { %v4592_v0 = vpop.eup %4591  ;;  %v2914_v5 = vmul.f32 %v4590_v4, %v4588_v36  ;;  %v3036_v20 = vpop.permute.xlu2 %3035 }
0x1902   : > { %v2913_v12 = vmul.f32 %v4592_v0, %v4586_v56 }
0x1904   : > { %v2915_v45 = vpack.c.bf16 %v2914_v5, %v2913_v12 }
0x1908   : > { %v3031_v6 = vpop.f32.mrf.mxu3 }
0x1909   : > { %v3034_v9 = vpack.c.bf16 %v3031_v6, %v3029_v62  ;;  %v2917_v10 = vpop.permute.xlu1 %2916 }
0x190a   : > { %v2922_v15 = vsel %vm2648_vm0, %v2917_v10, 0 }
0x190b   : > { %2931 = vmatpush.bf16.msrb.mxu0 %v2922_v15  ;;  %4208 = vmatmul.msk.bf16.vlgmr.msra.gmra.mxu3 %vm2596_vm2, %v3034_v9 }
0x190e   : > { %4201 = vmatmul.msk.bf16.vlgmr.msrb.gmra.mxu0 %vm2596_vm2, %v2915_v45 }
0x190f   : > { %3052 = vmatpush.bf16.xpose.msra.mxu0 %v3043_v16 }
0x1911   : > { %v3140_v3 = vpop.permute.xlu1 %3139 }
0x1917   : > { %3156 = vmatpush.bf16.xpose.msrb.mxu0 %v3147_v17  ;;  %v5816_v17 = vld [vmem:[%s981_s5] ss:$0 sm:$0xff] }
0x191b   : > { %4212 = vmatmul.msk.bf16.vlgmr.msrb.gmra.mxu3 %vm2596_vm2, %v3229_v18 }
0x191e   : > { %4205 = vmatmul.msk.bf16.vlgmr.msra.gmra.mxu0 %vm2596_vm2, %v3036_v20 }
0x192e   : > { %4209 = vmatmul.msk.bf16.vlgmr.msrb.gmra.mxu0 %vm2596_vm2, %v3140_v3 }
0x198b   : > { %v2933_v23 = vpop.f32.mrf.mxu0 }
0x198e   : > { %v5786_v44 = vpop.f32.mrf.mxu3 }
0x1993   : > { %v2935_v42 = vpop.f32.mrf.mxu0 }
0x1994   : > { %v2938_v26 = vpack.c.bf16 %v2935_v42, %v2933_v23 }
0x1996   : > { %4202 = vmatmul.msk.bf16.vlgmr.msrb.gmra.mxu1 %vm2596_vm2, %v2938_v26  ;;  %v5790_v28 = vpop.f32.mrf.mxu3 }
0x199b   : > { %v3054_v27 = vpop.f32.mrf.mxu0 }
0x199c   : > { %v3059_v41 = vsel %vm2596_vm2, %v3054_v27, -inf }
0x199d   : > { %3060 = vmax.xlane.f32.xlu2 %v3059_v41 }
0x199e   : > { %v3247_v29 = vpop.f32.mrf.mxu3 }
0x199f   : > { %v3252_v30 = vsel %vm2596_vm2, %v3247_v29, -inf }
0x19a3   : > { %v3056_v38 = vpop.f32.mrf.mxu0 }
0x19a4   : > { %v3062_v61 = vsel %vm2596_vm2, %v3056_v38, -inf }
0x19a5   : > { %3063 = vmax.xlane.f32.xlu1 %v3062_v61 }
0x19a6   : > { %v3249_v31 = vpop.f32.mrf.mxu3 }
0x19a7   : > { %v3255_v7 = vsel %vm2596_vm2, %v3249_v31, -inf }
0x19ab   : > { %v3158_v47 = vpop.f32.mrf.mxu0 }
0x19ac   : > { %v3163_v57 = vsel %vm2596_vm2, %v3158_v47, -inf }
0x19ad   : > { %3164 = vmax.xlane.f32.xlu0 %v3163_v57  ;;  %3253 = vmax.xlane.f32.xlu1 %v3252_v30 }
0x19b3   : > { %v3160_v32 = vpop.f32.mrf.mxu0 }
0x19b4   : > { %v3166_v52 = vsel %vm2596_vm2, %v3160_v32, -inf }
0x19b5   : > { %3167 = vmax.xlane.f32.xlu2 %v3166_v52  ;;  %3256 = vmax.xlane.f32.xlu0 %v3255_v7 }
0x19c9   : > { %3082 = vrot.lane.b32.xlu0 %v5745_v25, %s4990_s14  ;;  %s4998_s14 = smov 8  }
0x1a10   : > { %v3061_v58 = vpop.xlane.xlu2 %3060 }
0x1a11   : > { %v3065_v14 = vsub.f32 %v3054_v27, %v3061_v58 }
0x1a13   : > { %v3067_v2 = vmul.f32 1.442695, %v3065_v14  ;;  %v2954_v16 = vpop.f32.mrf.mxu1 }
0x1a14   : > { %v2959_v45 = vadd.f32 %v2954_v16, %v5739_v13 }
0x1a15   : > { %4593 = vpow2.f32 %v3067_v2 }
0x1a16   : > { %v3320_v18 = vadd.f32 %v5816_v17, %v2959_v45 }
0x1a18   : > { %v3064_v39 = vpop.xlane.xlu1 %3063  ;;  %v3324_v20 = vadd.f32 %v3320_v18, %v5656_v63 }
0x1a19   : > { %v3066_v40 = vsub.f32 %v3056_v38, %v3064_v39 }
0x1a1a   : > { %v3328_v3 = vsel %vm2530_vm3, %v3324_v20, 0.0 }
0x1a1b   : > { %v4594_v46 = vpop.eup %4593  ;;  %v3069_v48 = vmul.f32 1.442695, %v3066_v40  ;;  %v2956_v21 = vpop.f32.mrf.mxu1 }
0x1a1c   : > { %v3071_v50 = vsel %vm2596_vm2, %v4594_v46, 0.0  ;;  %v2960_v23 = vadd.f32 %v2956_v21, %v5741_v19 }
0x1a1d   : > { %4595 = vpow2.f32 %v3069_v48  ;;  %3072 = vadd.xlane.f32.xlu2 %v3071_v50 }
0x1a20   : > { %v3165_v51 = vpop.xlane.xlu0 %3164  ;;  %v3254_v55 = vpop.xlane.xlu1 %3253 }
0x1a21   : > { %v3169_v11 = vsub.f32 %v3158_v47, %v3165_v51  ;;  %v3258_v1 = vsub.f32 %v3247_v29, %v3254_v55 }
0x1a23   : > { %v4596_v53 = vpop.eup %4595  ;;  %v3171_v43 = vmul.f32 1.442695, %v3169_v11  ;;  %v3260_v62 = vmul.f32 1.442695, %v3258_v1 }
0x1a24   : > { %v3074_v54 = vsel %vm2596_vm2, %v4596_v53, 0.0 }
0x1a25   : > { %3075 = vadd.xlane.f32.xlu1 %v3074_v54  ;;  %4597 = vpow2.f32 %v3171_v43 }
0x1a28   : > { %v3168_v24 = vpop.xlane.xlu2 %3167  ;;  %v3257_v56 = vpop.xlane.xlu0 %3256 }
0x1a29   : > { %v3170_v8 = vsub.f32 %v3160_v32, %v3168_v24  ;;  %v3259_v59 = vsub.f32 %v3249_v31, %v3257_v56 }
0x1a2b   : > { %v3173_v36 = vmul.f32 1.442695, %v3170_v8  ;;  %v3262_v37 = vmul.f32 1.442695, %v3259_v59  ;;  %v4598_v49 = vpop.eup %4597 }
0x1a2c   : > { %v3175_v60 = vsel %vm2596_vm2, %v4598_v49, 0.0 }
0x1a2d   : > { %4599 = vpow2.f32 %v3173_v36  ;;  %3176 = vadd.xlane.f32.xlu2 %v3175_v60 }
0x1a2e   : > { %4601 = vpow2.f32 %v3262_v37 }
0x1a2f   : > { %4603 = vpow2.f32 %v3260_v62 }
0x1a33   : > { %v4600_v4 = vpop.eup %4599 }
0x1a34   : > { %v4602_v0 = vpop.eup %4601  ;;  %v3178_v5 = vsel %vm2596_vm2, %v4600_v4, 0.0 }
0x1a35   : > { %3179 = vadd.xlane.f32.xlu1 %v3178_v5  ;;  %v3267_v6 = vsel %vm2596_vm2, %v4602_v0, 0.0  ;;  %v4604_v9 = vpop.eup %4603 }
0x1a36   : > { %3268 = vadd.xlane.f32.xlu0 %v3267_v6  ;;  %v3264_v15 = vsel %vm2596_vm2, %v4604_v9, 0.0 }
0x1a3b   : > { %v3083_v10 = vpop.permute.xlu0 %3082 }
0x1a3c   : > { %v3088_v12 = vsel %vm2648_vm0, %v3083_v10, 0 }
0x1a3d   : > { %3265 = vadd.xlane.f32.xlu1 %v3264_v15  ;;  %3097 = vmatpush.bf16.msra.mxu1 %v3088_v12 }
0x1a45   : > { %3186 = vrot.lane.b32.xlu2 %v5745_v25, %s4992_s20 }
0x1a56   : > { %3275 = vrot.lane.b32.xlu1 %v5745_v25, %s4993_s10  ;;  %v3321_v25 = vadd.f32 %v5816_v17, %v2960_v23 }
0x1a58   : > { %v5824_v13 = vadd.f32 %v3321_v25, %v5658_v33 }
0x1a5a   : > { %v3331_v42 = vsel %vm2530_vm3, %v5824_v13, 0.0 }
0x1a6e   : > { %3329 = vadd.xlane.f32.xlu2 %v3328_v3 }
0x1a80   : > { %3332 = vadd.xlane.f32.xlu1 %v3331_v42 }
0x1a90   : > { %v3073_v26 = vpop.xlane.xlu2 %3072 }
0x1a91   : > { %4605 = vrcp.f32 %v3073_v26 }
0x1a97   : > { %v4606_v63 = vpop.eup %4605 }
0x1a98   : > { %v3076_v27 = vpop.xlane.xlu1 %3075  ;;  %v3079_v38 = vmul.f32 %v4606_v63, %v4594_v46  ;;  %v4994_v46 = vmov 32.0  }
0x1a99   : > { %4607 = vrcp.f32 %v3076_v27 }
0x1a9f   : > { %v4608_v41 = vpop.eup %4607 }
0x1aa0   : > { %v3080_v61 = vmul.f32 %v4608_v41, %v4596_v53  ;;  %v3177_v29 = vpop.xlane.xlu2 %3176 }
0x1aa1   : > { %4609 = vrcp.f32 %v3177_v29 }
0x1aa2   : > { %v3081_v47 = vpack.c.bf16 %v3080_v61, %v3079_v38 }
0x1aa4   : > { %4206 = vmatmul.msk.bf16.vlgmr.msra.gmra.mxu1 %vm2596_vm2, %v3081_v47 }
0x1aa7   : > { %v4610_v30 = vpop.eup %4609 }
0x1aa8   : > { %v3180_v19 = vpop.xlane.xlu1 %3179  ;;  %v3187_v33 = vpop.permute.xlu2 %3186  ;;  %v3183_v32 = vmul.f32 %v4610_v30, %v4598_v49 }
0x1aa9   : > { %4611 = vrcp.f32 %v3180_v19  ;;  %v3192_v57 = vsel %vm2648_vm0, %v3187_v33, 0  ;;  %v3269_v14 = vpop.xlane.xlu0 %3268  ;;  %v4995_v19 = vmov 31.0  }
0x1aaa   : > { %3201 = vmatpush.bf16.msrb.mxu1 %v3192_v57 }
0x1aae   : > { %3308 = vmatpush.bf16.msra.mxu1 %v5783_v22 }
0x1aaf   : > { %v4612_v31 = vpop.eup %4611 }
0x1ab0   : > { %v3184_v52 = vmul.f32 %v4612_v31, %v4600_v4  ;;  %v3266_v58 = vpop.xlane.xlu1 %3265 }
0x1ab1   : > { %4613 = vrcp.f32 %v3266_v58 }
0x1ab2   : > { %v3185_v7 = vpack.c.bf16 %v3184_v52, %v3183_v32  ;;  %4615 = vrcp.f32 %v3269_v14 }
0x1ab3   : > { %4617 = vrcp.f32 %v4994_v46 }
0x1ab4   : > { %4210 = vmatmul.msk.bf16.vlgmr.msrb.gmra.mxu1 %vm2596_vm2, %v3185_v7  ;;  %4619 = vrcp.f32 %v4995_v19 }
0x1ab7   : > { %v4614_v2 = vpop.eup %4613 }
0x1ab8   : > { %v4616_v39 = vpop.eup %4615  ;;  %v3272_v40 = vmul.f32 %v4614_v2, %v4604_v9 }
0x1ab9   : > { %v3273_v50 = vmul.f32 %v4616_v39, %v4602_v0  ;;  %v4618_v11 = vpop.eup %4617 }
0x1aba   : > { %v3341_v53 = vmul.f32 32.0, %v4618_v11  ;;  %vm3345_vm4 = vweird.f32 %v4618_v11  ;;  %v4620_v33 = vpop.eup %4619 }
0x1abb   : > { %v3274_v51 = vpack.c.bf16 %v3273_v50, %v3272_v40  ;;  %v3372_v57 = vmul.f32 31.0, %v4620_v33  ;;  %vm3376_vm5 = vweird.f32 %v4620_v33 }
0x1abc   : > { %v3342_v43 = vsub.f32 1.0, %v3341_v53 }
0x1abd   : > { %v3373_v30 = vsub.f32 1.0, %v3372_v57 }
0x1abe   : > { %v3343_v54 = vmul.f32 %v4618_v11, %v3342_v43  ;;  %v4263_v43 = vld [vmem:[%s835_s24 + $0x8] sm:$0xff] }
0x1ac0   : > { %v3344_v55 = vadd.f32 %v4618_v11, %v3343_v54 }
0x1ac2   : > { %v5834_v24 = vsel %vm3345_vm4, %v4618_v11, %v3344_v55  ;;  %v4262_v55 = vld [vmem:[%s835_s24] sm:$0xff]  ;;  %s6097_s24 = sld [smem:[#allocation35_spill]] }
0x1ac8   : > { %v3276_v48 = vpop.permute.xlu1 %3275  ;;  %s6098_s6 = scalar_lea.vmem %s6097_s24, %s5257_s0  ;;  %s4996_s0 = smov [#allocation12]  }
0x1ac9   : > { %v3281_v22 = vsel %vm2648_vm0, %v3276_v48, 0  ;;  %v5886_v57 = vld [vmem:[%s6098_s6] ss:$0 sm:$0xff] }
0x1aca   : > { %3290 = vmatpush.bf16.msra.mxu0 %v3281_v22 }
0x1acd   : > { %4213 = vmatmul.msk.bf16.vlgmr.msra.gmra.mxu0 %vm2596_vm2, %v3274_v51 }
0x1ae1   : > { %v3330_v56 = vpop.xlane.xlu2 %3329 }
0x1ae2   : > { %v3347_v8 = vmul.f32 %v5834_v24, %v3330_v56 }
0x1ae4   : > { %v5837_v59 = vsub.f32 %v3324_v20, %v3347_v8 }
0x1ae6   : > { %v3355_v1 = vmul.f32 %v5837_v59, %v5837_v59 }
0x1ae8   : > { %v3359_v36 = vsel %vm2530_vm3, %v3355_v1, 0.0 }
0x1ae9   : > { %3360 = vadd.xlane.f32.xlu2 %v3359_v36 }
0x1af3   : > { %v3333_v27 = vpop.xlane.xlu1 %3332 }
0x1af4   : > { %v3348_v38 = vmul.f32 %v5834_v24, %v3333_v27 }
0x1af6   : > { %v5854_v29 = vsub.f32 %v5824_v13, %v3348_v38 }
0x1b21   : > { %v3099_v37 = vpop.f32.mrf.mxu1 }
0x1b29   : > { %v3101_v49 = vpop.f32.mrf.mxu1 }
0x1b2a   : > { %v3104_v60 = vpack.c.bf16 %v3101_v49, %v3099_v37 }
0x1b2c   : > { %4207 = vmatmul.msk.bf16.vlgmr.msra.gmra.mxu2 %vm2596_vm2, %v3104_v60 }
0x1b2d   : > { %3553 = vmatpush.bf16.msra.mxu2 %v4263_v43 }
0x1b31   : > { %v3203_v62 = vpop.f32.mrf.mxu1  ;;  %3554 = vmatpush.bf16.msra.mxu2 %v4262_v55 }
0x1b39   : > { %v3205_v4 = vpop.f32.mrf.mxu1 }
0x1b3a   : > { %v3208_v0 = vpack.c.bf16 %v3205_v4, %v3203_v62 }
0x1b3c   : > { %4211 = vmatmul.msk.bf16.vlgmr.msrb.gmra.mxu2 %vm2596_vm2, %v3208_v0 }
0x1b4a   : > { %v3292_v5 = vpop.f32.mrf.mxu0 }
0x1b52   : > { %v3294_v6 = vpop.f32.mrf.mxu0 }
0x1b53   : > { %v3297_v9 = vpack.c.bf16 %v3294_v6, %v3292_v5 }
0x1b55   : > { %4214 = vmatmul.msk.bf16.vlgmr.msra.gmra.mxu1 %vm2596_vm2, %v3297_v9 }
0x1b5c   : > { %v3361_v13 = vpop.xlane.xlu2 %3360 }
0x1baf   : > { %v3117_v10 = vpop.f32.mrf.mxu2 }
0x1bb0   : > { %v3135_v16 = vadd.f32 %v5786_v44, %v3117_v10 }
0x1bb7   : > { %v3119_v12 = vpop.f32.mrf.mxu2 }
0x1bb8   : > { %v3137_v23 = vadd.f32 %v5790_v28, %v3119_v12 }
0x1bbf   : > { %v3221_v15 = vpop.f32.mrf.mxu2 }
0x1bc0   : > { %v3226_v45 = vadd.f32 %v3221_v15, %v3135_v16 }
0x1bc7   : > { %v3223_v21 = vpop.f32.mrf.mxu2 }
0x1bc8   : > { %v3227_v42 = vadd.f32 %v3223_v21, %v3137_v23 }
0x1bd2   : > { %v3310_v18 = vpop.f32.mrf.mxu1 }
0x1bd3   : > { %v3315_v20 = vadd.f32 %v3310_v18, %v3226_v45 }
0x1bd5   : > { %v3322_v3 = vadd.f32 %v5816_v17, %v3315_v20 }
0x1bd7   : > { %v3326_v25 = vadd.f32 %v3322_v3, %v5691_v34  ;;  %v3356_v34 = vmul.f32 %v5854_v29, %v5854_v29 }
0x1bd9   : > { %v3334_v26 = vsel %vm2530_vm3, %v3326_v25, 0.0  ;;  %v3362_v47 = vsel %vm2530_vm3, %v3356_v34, 0.0 }
0x1bda   : > { %3335 = vadd.xlane.f32.xlu0 %v3334_v26  ;;  %v3312_v63 = vpop.f32.mrf.mxu1 }
0x1bdb   : > { %v3316_v41 = vadd.f32 %v3312_v63, %v3227_v42 }
0x1bdd   : > { %v3323_v44 = vadd.f32 %v5816_v17, %v3316_v41  ;;  %v3374_v17 = vmul.f32 %v4620_v33, %v3373_v30 }
0x1bdf   : > { %v3327_v61 = vadd.f32 %v3323_v44, %v5693_v35  ;;  %v3375_v31 = vadd.f32 %v4620_v33, %v3374_v17 }
0x1be1   : > { %v3337_v28 = vsel %vm2530_vm3, %v3327_v61, 0.0  ;;  %v5860_v35 = vsel %vm3376_vm5, %v4620_v33, %v3375_v31 }
0x1be2   : > { %3338 = vadd.xlane.f32.xlu0 %v3337_v28  ;;  %v3378_v32 = vmul.f32 %v5860_v35, %v3361_v13 }
0x1be4   : > { %4621 = vrsqrt.f32 %v3378_v32  ;;  %vm3389_vm6 = vcmp.eq.f32.partialorder %v3378_v32, inf  ;;  %v3392_v1 = vand.u32 2147483648, %v3378_v32  ;;  %vm3391_vm7 = vcmp.eq.f32.partialorder %v3378_v32, 0.0 }
0x1bea   : > { %3363 = vadd.xlane.f32.xlu0 %v3362_v47  ;;  %v4622_v52 = vpop.eup %4621 }
0x1beb   : > { %v3383_v7 = vmul.f32 %v4622_v52, %v3378_v32 }
0x1bed   : > { %v3384_v58 = vmul.f32 %v4622_v52, %v3383_v7 }
0x1bef   : > { %v3385_v14 = vmul.f32 0.5, %v3384_v58 }
0x1bf1   : > { %v3386_v40 = vsub.f32 1.5, %v3385_v14 }
0x1bf3   : > { %v3387_v50 = vmul.f32 %v4622_v52, %v3386_v40 }
0x1bf5   : > { %v3388_v53 = vmul.f32 %v3387_v50, %v3378_v32 }
0x1bf7   : > { %v3390_v8 = vsel %vm3389_vm6, %v3378_v32, %v3388_v53 }
0x1bf8   : > { %v3393_v49 = vsel %vm3391_vm7, %v3392_v1, %v3390_v8 }
0x1bf9   : > { %v3430_v62 = vadd.f32 0.001, %v3393_v49 }
0x1bfb   : > { %v3445_v42 = vand.u32 2147483648, %v3430_v62  ;;  %vm3439_vm11 = vweird.f32 %v3430_v62  ;;  %v3443_v26 = vand.u32 2147483647, %v3430_v62 }
0x1bfd   : > { %v3446_v38 = vor.u32 1.1754944e-38, %v3445_v42  ;;  %vm3444_vm13 = vcmp.eq.f32.partialorder %v3443_v26, 8.507059e+37  ;;  %v4267_v26 = vld [vmem:[%s5311_s3 + $0x18] sm:$0xff] }
0x1bfe   : > { %3610 = vmatpush.bf16.msra.mxu3 %v4267_v26 }
0x1c4d   : > { %v3336_v2 = vpop.xlane.xlu0 %3335 }
0x1c4e   : > { %v3349_v39 = vmul.f32 %v5834_v24, %v3336_v2 }
0x1c50   : > { %v5864_v46 = vsub.f32 %v3326_v25, %v3349_v39 }
0x1c52   : > { %v3357_v48 = vmul.f32 %v5864_v46, %v5864_v46 }
0x1c54   : > { %v3365_v22 = vsel %vm2530_vm3, %v3357_v48, 0.0 }
0x1c55   : > { %3366 = vadd.xlane.f32.xlu2 %v3365_v22  ;;  %v3339_v51 = vpop.xlane.xlu0 %3338 }
0x1c56   : > { %v3350_v11 = vmul.f32 %v5834_v24, %v3339_v51 }
0x1c58   : > { %v5872_v54 = vsub.f32 %v3327_v61, %v3350_v11 }
0x1c5a   : > { %v3358_v56 = vmul.f32 %v5872_v54, %v5872_v54 }
0x1c5c   : > { %v3368_v36 = vsel %vm2530_vm3, %v3358_v56, 0.0 }
0x1c5d   : > { %3369 = vadd.xlane.f32.xlu0 %v3368_v36  ;;  %v3364_v37 = vpop.xlane.xlu0 %3363 }
0x1c5e   : > { %v3379_v60 = vmul.f32 %v5860_v35, %v3364_v37 }
0x1c60   : > { %4623 = vrsqrt.f32 %v3379_v60  ;;  %vm3401_vm8 = vcmp.eq.f32.partialorder %v3379_v60, inf  ;;  %v3404_v45 = vand.u32 2147483648, %v3379_v60  ;;  %vm3403_vm9 = vcmp.eq.f32.partialorder %v3379_v60, 0.0 }
0x1c61   : > { %4625 = vrcp.f32 %v3430_v62 }
0x1c66   : > { %v4624_v4 = vpop.eup %4623 }
0x1c67   : > { %v3395_v0 = vmul.f32 %v4624_v4, %v3379_v60  ;;  %v4626_v6 = vpop.eup %4625 }
0x1c68   : > { %v3435_v12 = vmul.f32 %v4626_v6, %v3430_v62  ;;  %vm3440_vm10 = vweird.f32 %v4626_v6 }
0x1c69   : > { %v3396_v5 = vmul.f32 %v4624_v4, %v3395_v0  ;;  %vm3441_vm12 = vmor %vm3439_vm11, %vm3440_vm10 }
0x1c6a   : > { %v3436_v18 = vsub.f32 1.0, %v3435_v12 }
0x1c6b   : > { %v3397_v9 = vmul.f32 0.5, %v3396_v5 }
0x1c6c   : > { %v3437_v23 = vmul.f32 %v4626_v6, %v3436_v18 }
0x1c6d   : > { %v3398_v10 = vsub.f32 1.5, %v3397_v9 }
0x1c6e   : > { %v3438_v25 = vadd.f32 %v4626_v6, %v3437_v23 }
0x1c6f   : > { %v3399_v15 = vmul.f32 %v4624_v4, %v3398_v10 }
0x1c70   : > { %v3442_v63 = vsel %vm3441_vm12, %v4626_v6, %v3438_v25 }
0x1c71   : > { %v3400_v16 = vmul.f32 %v3399_v15, %v3379_v60  ;;  %v3447_v61 = vsel %vm3444_vm13, %v3446_v38, %v3442_v63 }
0x1c72   : > { %v3448_v19 = vmul.f32 %v3447_v61, %v5837_v59  ;;  %v5895_v59 = vld [vmem:[%s987_s17] ss:$0 sm:$0xff]  ;;  %v4266_v61 = vld [vmem:[%s5311_s3 + $0x10] sm:$0xff] }
0x1c73   : > { %v3402_v20 = vsel %vm3401_vm8, %v3379_v60, %v3400_v16  ;;  %3611 = vmatpush.bf16.msra.mxu3 %v4266_v61 }
0x1c74   : > { %v3405_v3 = vsel %vm3403_vm9, %v3404_v45, %v3402_v20  ;;  %v3497_v32 = vmul.f32 %v5886_v57, %v3448_v19 }
0x1c75   : > { %v3431_v21 = vadd.f32 0.001, %v3405_v3 }
0x1c76   : > { %v5899_v7 = vadd.f32 %v5895_v59, %v3497_v32  ;;  %v4264_v32 = vld [vmem:[%s5311_s3] sm:$0xff] }
0x1c77   : > { %4627 = vrcp.f32 %v3431_v21  ;;  %v3460_v28 = vand.u32 2147483648, %v3431_v21  ;;  %v3458_v47 = vand.u32 2147483647, %v3431_v21  ;;  %vm3454_vm15 = vweird.f32 %v3431_v21 }
0x1c79   : > { %v3461_v30 = vor.u32 1.1754944e-38, %v3460_v28  ;;  %vm3459_vm2 = vcmp.eq.f32.partialorder %v3458_v47, 8.507059e+37 }
0x1c7d   : > { %v4628_v27 = vpop.eup %4627 }
0x1c7e   : > { %v3450_v41 = vmul.f32 %v4628_v27, %v3431_v21  ;;  %vm3455_vm14 = vweird.f32 %v4628_v27 }
0x1c7f   : > { %vm3456_vm1 = vmor %vm3454_vm15, %vm3455_vm14  ;;  %vm3599_vm15 = vcmask 523264  }
0x1c80   : > { %v3451_v44 = vsub.f32 1.0, %v3450_v41 }
0x1c82   : > { %v3452_v34 = vmul.f32 %v4628_v27, %v3451_v44 }
0x1c84   : > { %v3453_v33 = vadd.f32 %v4628_v27, %v3452_v34 }
0x1c86   : > { %v3457_v17 = vsel %vm3456_vm1, %v4628_v27, %v3453_v33 }
0x1c87   : > { %v3462_v31 = vsel %vm3459_vm2, %v3461_v30, %v3457_v17  ;;  %v4265_v30 = vld [vmem:[%s5311_s3 + $0x8] sm:$0xff] }
0x1c88   : > { %v3463_v13 = vmul.f32 %v3462_v31, %v5854_v29  ;;  %3612 = vmatpush.bf16.msra.mxu3 %v4265_v30 }
0x1c8a   : > { %v3498_v52 = vmul.f32 %v5886_v57, %v3463_v13 }
0x1c8c   : > { %v5902_v58 = vadd.f32 %v5895_v59, %v3498_v52  ;;  %3613 = vmatpush.bf16.msra.mxu3 %v4264_v32 }
0x1c8e   : > { %v3524_v14 = vpack.c.bf16 %v5902_v58, %v5899_v7 }
0x1c90   : > { %4223 = vmatmul.msk.bf16.vlgmr.msra.gmra.mxu2 %vm2530_vm3, %v3524_v14 }
0x1cc8   : > { %v3367_v29 = vpop.xlane.xlu2 %3366 }
0x1cc9   : > { %v3380_v2 = vmul.f32 %v5860_v35, %v3367_v29 }
0x1ccb   : > { %4629 = vrsqrt.f32 %v3380_v2  ;;  %vm3413_vm0 = vcmp.eq.f32.partialorder %v3380_v2, inf  ;;  %v3416_v1 = vand.u32 2147483648, %v3380_v2  ;;  %vm3415_vm4 = vcmp.eq.f32.partialorder %v3380_v2, 0.0 }
0x1cd0   : > { %v3370_v39 = vpop.xlane.xlu0 %3369 }
0x1cd1   : > { %v4630_v40 = vpop.eup %4629  ;;  %v3381_v48 = vmul.f32 %v5860_v35, %v3370_v39 }
0x1cd2   : > { %v3407_v50 = vmul.f32 %v4630_v40, %v3380_v2 }
0x1cd3   : > { %4631 = vrsqrt.f32 %v3381_v48  ;;  %vm3425_vm5 = vcmp.eq.f32.partialorder %v3381_v48, inf  ;;  %v3428_v5 = vand.u32 2147483648, %v3381_v48  ;;  %vm3427_vm6 = vcmp.eq.f32.partialorder %v3381_v48, 0.0 }
0x1cd4   : > { %v3408_v22 = vmul.f32 %v4630_v40, %v3407_v50 }
0x1cd6   : > { %v3409_v51 = vmul.f32 0.5, %v3408_v22 }
0x1cd8   : > { %v3410_v11 = vsub.f32 1.5, %v3409_v51 }
0x1cd9   : > { %v4632_v53 = vpop.eup %4631 }
0x1cda   : > { %v3411_v43 = vmul.f32 %v4630_v40, %v3410_v11  ;;  %v3419_v55 = vmul.f32 %v4632_v53, %v3381_v48 }
0x1cdc   : > { %v3412_v56 = vmul.f32 %v3411_v43, %v3380_v2  ;;  %v3420_v8 = vmul.f32 %v4632_v53, %v3419_v55 }
0x1cde   : > { %v3414_v36 = vsel %vm3413_vm0, %v3380_v2, %v3412_v56  ;;  %v3421_v37 = vmul.f32 0.5, %v3420_v8  ;;  %v4550_v56 = vld [vmem:[%s998_s18] ss:$0 sm:$0xff] }
0x1cdf   : > { %v3417_v49 = vsel %vm3415_vm4, %v3416_v1, %v3414_v36 }
0x1ce0   : > { %v3422_v60 = vsub.f32 1.5, %v3421_v37  ;;  %v3432_v62 = vadd.f32 0.001, %v3417_v49 }
0x1ce2   : > { %v3423_v4 = vmul.f32 %v4632_v53, %v3422_v60  ;;  %4633 = vrcp.f32 %v3432_v62  ;;  %v3475_v18 = vand.u32 2147483648, %v3432_v62  ;;  %vm3469_vm8 = vweird.f32 %v3432_v62 }
0x1ce3   : > { %v3473_v3 = vand.u32 2147483647, %v3432_v62 }
0x1ce4   : > { %v3424_v0 = vmul.f32 %v3423_v4, %v3381_v48  ;;  %v3476_v42 = vor.u32 1.1754944e-38, %v3475_v18 }
0x1ce5   : > { %vm3474_vm10 = vcmp.eq.f32.partialorder %v3473_v3, 8.507059e+37 }
0x1ce6   : > { %v3426_v6 = vsel %vm3425_vm5, %v3381_v48, %v3424_v0 }
0x1ce7   : > { %v3429_v9 = vsel %vm3427_vm6, %v3428_v5, %v3426_v6 }
0x1ce8   : > { %v4634_v10 = vpop.eup %4633  ;;  %v3433_v12 = vadd.f32 0.001, %v3429_v9 }
0x1ce9   : > { %v3465_v15 = vmul.f32 %v4634_v10, %v3432_v62  ;;  %vm3470_vm7 = vweird.f32 %v4634_v10 }
0x1cea   : > { %4635 = vrcp.f32 %v3433_v12  ;;  %vm3471_vm9 = vmor %vm3469_vm8, %vm3470_vm7  ;;  %v3490_v41 = vand.u32 2147483648, %v3433_v12  ;;  %v3488_v44 = vand.u32 2147483647, %v3433_v12  ;;  %vm3484_vm12 = vweird.f32 %v3433_v12 }
0x1ceb   : > { %v3466_v16 = vsub.f32 1.0, %v3465_v15 }
0x1cec   : > { %v3491_v47 = vor.u32 1.1754944e-38, %v3490_v41  ;;  %vm3489_vm14 = vcmp.eq.f32.partialorder %v3488_v44, 8.507059e+37 }
0x1ced   : > { %v3467_v45 = vmul.f32 %v4634_v10, %v3466_v16 }
0x1cef   : > { %v3468_v20 = vadd.f32 %v4634_v10, %v3467_v45 }
0x1cf0   : > { %v4636_v21 = vpop.eup %4635 }
0x1cf1   : > { %v3472_v23 = vsel %vm3471_vm9, %v4634_v10, %v3468_v20  ;;  %v3480_v25 = vmul.f32 %v4636_v21, %v3433_v12  ;;  %vm3485_vm11 = vweird.f32 %v4636_v21 }
0x1cf2   : > { %v3477_v63 = vsel %vm3474_vm10, %v3476_v42, %v3472_v23  ;;  %vm3486_vm13 = vmor %vm3484_vm12, %vm3485_vm11 }
0x1cf3   : > { %v3481_v27 = vsub.f32 1.0, %v3480_v25  ;;  %v3478_v28 = vmul.f32 %v3477_v63, %v5864_v46 }
0x1cf5   : > { %v3482_v38 = vmul.f32 %v4636_v21, %v3481_v27  ;;  %v3499_v31 = vmul.f32 %v5886_v57, %v3478_v28 }
0x1cf7   : > { %v3483_v34 = vadd.f32 %v4636_v21, %v3482_v38  ;;  %v3506_v46 = vadd.f32 %v5895_v59, %v3499_v31 }
0x1cf9   : > { %v3487_v19 = vsel %vm3486_vm13, %v4636_v21, %v3483_v34 }
0x1cfa   : > { %v3492_v33 = vsel %vm3489_vm14, %v3491_v47, %v3487_v19 }
0x1cfb   : > { %v3493_v17 = vmul.f32 %v3492_v33, %v5872_v54  ;;  %v4549_v54 = vld [vmem:[%s990_s1] ss:$0 sm:$0xff] }
0x1cfd   : > { %v3500_v13 = vmul.f32 %v5886_v57, %v3493_v17 }
0x1cff   : > { %v3507_v52 = vadd.f32 %v5895_v59, %v3500_v13 }
0x1d01   : > { %v3525_v14 = vpack.c.bf16 %v3507_v52, %v3506_v46 }
0x1d03   : > { %4224 = vmatmul.msk.bf16.gmra.mxu2 %vm2530_vm3, %v3525_v14 }
0x1d13   : > { %v3556_v29 = vpop.f32.mrf.mxu2 }
0x1d14   : > { %v3557_v2 = vadd.f32 %v4549_v54, %v3556_v29 }
0x1d16   : > { %v3566_v57 = vmax.f32 %v3557_v2, 0.0 }
0x1d1b   : > { %v3558_v39 = vpop.f32.mrf.mxu2 }
0x1d1c   : > { %v3559_v40 = vadd.f32 %v4549_v54, %v3558_v39 }
0x1d1e   : > { %v3567_v48 = vmax.f32 %v3559_v40, 0.0 }
0x1d20   : > { %v3570_v50 = vpack.c.bf16 %v3567_v48, %v3566_v57 }
0x1d22   : > { %4241 = vmatmul.msk.bf16.vlgmr.msra.gmra.mxu3 %vm3599_vm15, %v3570_v50 }
0x1d86   : > { %v3561_v59 = vpop.f32.mrf.mxu2 }
0x1d87   : > { %v3562_v22 = vadd.f32 %v4549_v54, %v3561_v59 }
0x1d89   : > { %v3568_v53 = vmax.f32 %v3562_v22, 0.0 }
0x1d8e   : > { %v3563_v51 = vpop.f32.mrf.mxu2 }
0x1d8f   : > { %v3564_v11 = vadd.f32 %v4549_v54, %v3563_v51 }
0x1d91   : > { %v3569_v43 = vmax.f32 %v3564_v11, 0.0 }
0x1d93   : > { %v3571_v55 = vpack.c.bf16 %v3569_v43, %v3568_v53 }
0x1d95   : > { %4242 = vmatmul.msk.bf16.gmra.mxu3 %vm3599_vm15, %v3571_v55 }
0x1da5   : > { %v3615_v8 = vpop.f32.mrf.mxu3 }
0x1da6   : > { %v3616_v1 = vadd.f32 %v4550_v56, %v3615_v8 }
0x1da8   : > { %v3625_v36 = vadd.f32 %v3616_v1, %v5899_v7 }
0x1daa   : > { %v3629_v37 = vsel %vm2530_vm3, %v3625_v36, 0.0 }
0x1dab   : > { %3630 = vadd.xlane.f32.xlu1 %v3629_v37 }
0x1dad   : > { %v3617_v49 = vpop.f32.mrf.mxu3 }
0x1dae   : > { %v3618_v60 = vadd.f32 %v4550_v56, %v3617_v49 }
0x1db0   : > { %v3626_v62 = vadd.f32 %v3618_v60, %v5902_v58 }
0x1db2   : > { %v3632_v4 = vsel %vm2530_vm3, %v3626_v62, 0.0 }
0x1db3   : > { %3633 = vadd.xlane.f32.xlu2 %v3632_v4 }
0x1e18   : > { %v3620_v0 = vpop.f32.mrf.mxu3 }
0x1e19   : > { %v3621_v5 = vadd.f32 %v4550_v56, %v3620_v0 }
0x1e1b   : > { %v3627_v6 = vadd.f32 %v3621_v5, %v3506_v46 }
0x1e1d   : > { %v3635_v9 = vsel %vm2530_vm3, %v3627_v6, 0.0 }
0x1e1e   : > { %v3631_v10 = vpop.xlane.xlu1 %3630  ;;  %3636 = vadd.xlane.f32.xlu0 %v3635_v9 }
0x1e1f   : > { %v3641_v12 = vmul.f32 %v3631_v10, %v5834_v24 }
0x1e20   : > { %v3622_v7 = vpop.f32.mrf.mxu3 }
0x1e21   : > { %v5936_v15 = vsub.f32 %v3625_v36, %v3641_v12  ;;  %v3623_v16 = vadd.f32 %v4550_v56, %v3622_v7  ;;  %v5972_v7 = vld [vmem:[%s1001_s11] ss:$0 sm:$0xff]  ;;  %s3807_s11 = sshll.u32 %s4996_s0, 4  ;;  %s3808_s11 = int_to_ptr.vmem [resolvable:$true] %s3807_s11 }
0x1e23   : > { %v3649_v45 = vmul.f32 %v5936_v15, %v5936_v15  ;;  %v3628_v58 = vadd.f32 %v3623_v16, %v3507_v52 }
0x1e25   : > { %v3653_v18 = vsel %vm2530_vm3, %v3649_v45, 0.0  ;;  %v3638_v20 = vsel %vm2530_vm3, %v3628_v58, 0.0 }
0x1e26   : > { %v3634_v3 = vpop.xlane.xlu2 %3633  ;;  %3654 = vadd.xlane.f32.xlu2 %v3653_v18  ;;  %3639 = vadd.xlane.f32.xlu1 %v3638_v20 }
0x1e27   : > { %v3642_v21 = vmul.f32 %v3634_v3, %v5834_v24 }
0x1e29   : > { %v5943_v23 = vsub.f32 %v3626_v62, %v3642_v21 }
0x1e2b   : > { %v3650_v25 = vmul.f32 %v5943_v23, %v5943_v23 }
0x1e2d   : > { %v3656_v42 = vsel %vm2530_vm3, %v3650_v25, 0.0 }
0x1e2e   : > { %3657 = vadd.xlane.f32.xlu0 %v3656_v42 }
0x1e91   : > { %v3637_v26 = vpop.xlane.xlu0 %3636 }
0x1e92   : > { %v3643_v27 = vmul.f32 %v3637_v26, %v5834_v24 }
0x1e94   : > { %v5949_v63 = vsub.f32 %v3627_v6, %v3643_v27  ;;  %v5964_v6 = vld [vmem:[%s844_s12] ss:$0 sm:$0xff] }
0x1e96   : > { %v3651_v41 = vmul.f32 %v5949_v63, %v5949_v63 }
0x1e98   : > { %v3659_v38 = vsel %vm2530_vm3, %v3651_v41, 0.0 }
0x1e99   : > { %v3655_v44 = vpop.xlane.xlu2 %3654  ;;  %v3640_v61 = vpop.xlane.xlu1 %3639  ;;  %3660 = vadd.xlane.f32.xlu1 %v3659_v38 }
0x1e9a   : > { %v3665_v28 = vmul.f32 %v3655_v44, %v5860_v35  ;;  %v3644_v34 = vmul.f32 %v3640_v61, %v5834_v24 }
0x1e9c   : > { %4637 = vrsqrt.f32 %v3665_v28  ;;  %v5956_v47 = vsub.f32 %v3628_v58, %v3644_v34  ;;  %vm3676_vm1 = vcmp.eq.f32.partialorder %v3665_v28, inf  ;;  %v3679_v39 = vand.u32 2147483648, %v3665_v28 }
0x1e9d   : > { %vm3678_vm2 = vcmp.eq.f32.partialorder %v3665_v28, 0.0 }
0x1e9e   : > { %v3652_v19 = vmul.f32 %v5956_v47, %v5956_v47 }
0x1ea0   : > { %v3662_v33 = vsel %vm2530_vm3, %v3652_v19, 0.0 }
0x1ea1   : > { %v3658_v30 = vpop.xlane.xlu0 %3657  ;;  %3663 = vadd.xlane.f32.xlu2 %v3662_v33 }
0x1ea2   : > { %v4638_v17 = vpop.eup %4637  ;;  %v3666_v31 = vmul.f32 %v3658_v30, %v5860_v35 }
0x1ea3   : > { %v3670_v13 = vmul.f32 %v4638_v17, %v3665_v28 }
0x1ea4   : > { %4639 = vrsqrt.f32 %v3666_v31  ;;  %vm3688_vm0 = vcmp.eq.f32.partialorder %v3666_v31, inf  ;;  %v3691_v11 = vand.u32 2147483648, %v3666_v31  ;;  %vm3690_vm4 = vcmp.eq.f32.partialorder %v3666_v31, 0.0 }
0x1ea5   : > { %v3671_v32 = vmul.f32 %v4638_v17, %v3670_v13 }
0x1ea7   : > { %v3672_v46 = vmul.f32 0.5, %v3671_v32 }
0x1ea9   : > { %v3673_v52 = vsub.f32 1.5, %v3672_v46 }
0x1eaa   : > { %v4640_v14 = vpop.eup %4639 }
0x1eab   : > { %v3674_v24 = vmul.f32 %v4638_v17, %v3673_v52  ;;  %v3682_v29 = vmul.f32 %v4640_v14, %v3666_v31 }
0x1ead   : > { %v3675_v54 = vmul.f32 %v3674_v24, %v3665_v28  ;;  %v3683_v2 = vmul.f32 %v4640_v14, %v3682_v29 }
0x1eaf   : > { %v3677_v40 = vsel %vm3676_vm1, %v3665_v28, %v3675_v54  ;;  %v3684_v57 = vmul.f32 0.5, %v3683_v2 }
0x1eb0   : > { %v3680_v48 = vsel %vm3678_vm2, %v3679_v39, %v3677_v40 }
0x1eb1   : > { %v3717_v50 = vadd.f32 0.001, %v3680_v48  ;;  %v3685_v59 = vsub.f32 1.5, %v3684_v57 }
0x1eb3   : > { %4641 = vrcp.f32 %v3717_v50  ;;  %v3686_v22 = vmul.f32 %v4640_v14, %v3685_v59  ;;  %v3732_v36 = vand.u32 2147483648, %v3717_v50  ;;  %v3730_v49 = vand.u32 2147483647, %v3717_v50 }
0x1eb4   : > { %vm3726_vm6 = vweird.f32 %v3717_v50 }
0x1eb5   : > { %v3687_v51 = vmul.f32 %v3686_v22, %v3666_v31  ;;  %v3733_v4 = vor.u32 1.1754944e-38, %v3732_v36  ;;  %vm3731_vm8 = vcmp.eq.f32.partialorder %v3730_v49, 8.507059e+37 }
0x1eb7   : > { %v3689_v53 = vsel %vm3688_vm0, %v3666_v31, %v3687_v51 }
0x1eb8   : > { %v3692_v43 = vsel %vm3690_vm4, %v3691_v11, %v3689_v53 }
0x1eb9   : > { %v4642_v55 = vpop.eup %4641  ;;  %v3718_v56 = vadd.f32 0.001, %v3692_v43 }
0x1eba   : > { %v3722_v8 = vmul.f32 %v4642_v55, %v3717_v50  ;;  %vm3727_vm5 = vweird.f32 %v4642_v55 }
0x1ebb   : > { %4643 = vrcp.f32 %v3718_v56  ;;  %vm3728_vm7 = vmor %vm3726_vm6, %vm3727_vm5  ;;  %v3747_v16 = vand.u32 2147483648, %v3718_v56  ;;  %v3745_v58 = vand.u32 2147483647, %v3718_v56  ;;  %vm3741_vm10 = vweird.f32 %v3718_v56 }
0x1ebc   : > { %v3723_v1 = vsub.f32 1.0, %v3722_v8 }
0x1ebd   : > { %v3748_v21 = vor.u32 1.1754944e-38, %v3747_v16  ;;  %vm3746_vm12 = vcmp.eq.f32.partialorder %v3745_v58, 8.507059e+37 }
0x1ebe   : > { %v3724_v37 = vmul.f32 %v4642_v55, %v3723_v1 }
0x1ec0   : > { %v3725_v60 = vadd.f32 %v4642_v55, %v3724_v37 }
0x1ec1   : > { %v4644_v62 = vpop.eup %4643 }
0x1ec2   : > { %v3737_v0 = vmul.f32 %v4644_v62, %v3718_v56  ;;  %v3729_v5 = vsel %vm3728_vm7, %v4642_v55, %v3725_v60  ;;  %vm3742_vm9 = vweird.f32 %v4644_v62 }
0x1ec3   : > { %v3734_v9 = vsel %vm3731_vm8, %v3733_v4, %v3729_v5  ;;  %vm3743_vm11 = vmor %vm3741_vm10, %vm3742_vm9 }
0x1ec4   : > { %v3735_v10 = vmul.f32 %v3734_v9, %v5936_v15  ;;  %v3738_v12 = vsub.f32 1.0, %v3737_v0 }
0x1ec6   : > { %v3739_v45 = vmul.f32 %v4644_v62, %v3738_v12  ;;  %v3784_v18 = vmul.f32 %v5964_v6, %v3735_v10 }
0x1ec8   : > { %v3740_v20 = vadd.f32 %v4644_v62, %v3739_v45  ;;  %v3791_v3 = vadd.f32 %v5972_v7, %v3784_v18 }
0x1eca   : > { %v3744_v15 = vsel %vm3743_vm11, %v4644_v62, %v3740_v20  ;;  %3795 = vst.msk [vmem:[#allocation12] sm:$0xff] %vm2530_vm3, %v3791_v3 }
0x1ecb   : > { %v3749_v25 = vsel %vm3746_vm12, %v3748_v21, %v3744_v15 }
0x1ecc   : > { %v3750_v42 = vmul.f32 %v3749_v25, %v5943_v23 }
0x1ece   : > { %v3785_v26 = vmul.f32 %v5964_v6, %v3750_v42 }
0x1ed0   : > { %v3792_v27 = vadd.f32 %v5972_v7, %v3785_v26 }
0x1ed2   : > { %3796 = vst.msk [vmem:[#allocation12 + $0x8] sm:$0xff] %vm2530_vm3, %v3792_v27 }
0x1f0c   : > { %v3661_v41 = vpop.xlane.xlu1 %3660 }
0x1f0d   : > { %v3667_v38 = vmul.f32 %v3661_v41, %v5860_v35 }
0x1f0f   : > { %4645 = vrsqrt.f32 %v3667_v38  ;;  %vm3700_vm13 = vcmp.eq.f32.partialorder %v3667_v38, inf  ;;  %v3703_v32 = vand.u32 2147483648, %v3667_v38  ;;  %vm3702_vm14 = vcmp.eq.f32.partialorder %v3667_v38, 0.0 }
0x1f14   : > { %v3664_v61 = vpop.xlane.xlu2 %3663 }
0x1f15   : > { %v4646_v44 = vpop.eup %4645  ;;  %v3668_v34 = vmul.f32 %v3664_v61, %v5860_v35 }
0x1f16   : > { %v3694_v28 = vmul.f32 %v4646_v44, %v3667_v38 }
0x1f17   : > { %4647 = vrsqrt.f32 %v3668_v34  ;;  %vm3712_vm15 = vcmp.eq.f32.partialorder %v3668_v34, inf  ;;  %v3715_v39 = vand.u32 2147483648, %v3668_v34  ;;  %vm3714_vm1 = vcmp.eq.f32.partialorder %v3668_v34, 0.0 }
0x1f18   : > { %v3695_v19 = vmul.f32 %v4646_v44, %v3694_v28 }
0x1f1a   : > { %v3696_v33 = vmul.f32 0.5, %v3695_v19 }
0x1f1c   : > { %v3697_v30 = vsub.f32 1.5, %v3696_v33 }
0x1f1d   : > { %v4648_v23 = vpop.eup %4647 }
0x1f1e   : > { %v3698_v17 = vmul.f32 %v4646_v44, %v3697_v30  ;;  %v3706_v31 = vmul.f32 %v4648_v23, %v3668_v34 }
0x1f20   : > { %v3699_v13 = vmul.f32 %v3698_v17, %v3667_v38  ;;  %v3707_v46 = vmul.f32 %v4648_v23, %v3706_v31 }
0x1f22   : > { %v3701_v52 = vsel %vm3700_vm13, %v3667_v38, %v3699_v13  ;;  %v3708_v24 = vmul.f32 0.5, %v3707_v46 }
0x1f23   : > { %v3704_v14 = vsel %vm3702_vm14, %v3703_v32, %v3701_v52 }
0x1f24   : > { %v3719_v29 = vadd.f32 0.001, %v3704_v14  ;;  %v3709_v54 = vsub.f32 1.5, %v3708_v24 }
0x1f26   : > { %4649 = vrcp.f32 %v3719_v29  ;;  %v3710_v2 = vmul.f32 %v4648_v23, %v3709_v54  ;;  %v3762_v51 = vand.u32 2147483648, %v3719_v29  ;;  %v3760_v53 = vand.u32 2147483647, %v3719_v29 }
0x1f27   : > { %vm3756_vm0 = vweird.f32 %v3719_v29 }
0x1f28   : > { %v3711_v35 = vmul.f32 %v3710_v2, %v3668_v34  ;;  %v3763_v55 = vor.u32 1.1754944e-38, %v3762_v51  ;;  %vm3761_vm5 = vcmp.eq.f32.partialorder %v3760_v53, 8.507059e+37 }
0x1f2a   : > { %v3713_v40 = vsel %vm3712_vm15, %v3668_v34, %v3711_v35 }
0x1f2b   : > { %v3716_v48 = vsel %vm3714_vm1, %v3715_v39, %v3713_v40 }
0x1f2c   : > { %v4650_v57 = vpop.eup %4649  ;;  %v3720_v59 = vadd.f32 0.001, %v3716_v48 }
0x1f2d   : > { %v3752_v50 = vmul.f32 %v4650_v57, %v3719_v29  ;;  %vm3757_vm2 = vweird.f32 %v4650_v57 }
0x1f2e   : > { %4651 = vrcp.f32 %v3720_v59  ;;  %vm3758_vm4 = vmor %vm3756_vm0, %vm3757_vm2  ;;  %v3777_v60 = vand.u32 2147483648, %v3720_v59  ;;  %v3775_v0 = vand.u32 2147483647, %v3720_v59  ;;  %vm3771_vm7 = vweird.f32 %v3720_v59 }
0x1f2f   : > { %v3753_v22 = vsub.f32 1.0, %v3752_v50 }
0x1f30   : > { %v3778_v10 = vor.u32 1.1754944e-38, %v3777_v60  ;;  %vm3776_vm9 = vcmp.eq.f32.partialorder %v3775_v0, 8.507059e+37 }
0x1f31   : > { %v3754_v11 = vmul.f32 %v4650_v57, %v3753_v22 }
0x1f33   : > { %v3755_v43 = vadd.f32 %v4650_v57, %v3754_v11 }
0x1f34   : > { %v4652_v56 = vpop.eup %4651 }
0x1f35   : > { %v3759_v8 = vsel %vm3758_vm4, %v4650_v57, %v3755_v43  ;;  %v3767_v1 = vmul.f32 %v4652_v56, %v3720_v59  ;;  %vm3772_vm6 = vweird.f32 %v4652_v56 }
0x1f36   : > { %v3764_v36 = vsel %vm3761_vm5, %v3763_v55, %v3759_v8  ;;  %vm3773_vm8 = vmor %vm3771_vm7, %vm3772_vm6 }
0x1f37   : > { %v3765_v37 = vmul.f32 %v3764_v36, %v5949_v63  ;;  %v3768_v49 = vsub.f32 1.0, %v3767_v1 }
0x1f39   : > { %v3786_v62 = vmul.f32 %v5964_v6, %v3765_v37  ;;  %v3769_v4 = vmul.f32 %v4652_v56, %v3768_v49 }
0x1f3b   : > { %v3793_v5 = vadd.f32 %v5972_v7, %v3786_v62  ;;  %v3770_v9 = vadd.f32 %v4652_v56, %v3769_v4 }
0x1f3d   : > { %3797 = vst.msk [vmem:[#allocation12 + $0x10] sm:$0xff] %vm2530_vm3, %v3793_v5  ;;  %v3774_v12 = vsel %vm3773_vm8, %v4652_v56, %v3770_v9 }
0x1f3e   : > { %v3779_v16 = vsel %vm3776_vm9, %v3778_v10, %v3774_v12 }
0x1f3f   : > { %v3780_v63 = vmul.f32 %v3779_v16, %v5956_v47 }
0x1f41   : > { %v3787_v45 = vmul.f32 %v5964_v6, %v3780_v63 }
0x1f43   : > { %v3794_v58 = vadd.f32 %v5972_v7, %v3787_v45 }
0x1f45   : > { %3798 = vst.msk [vmem:[#allocation12 + $0x18] sm:$0xff] %vm2530_vm3, %v3794_v58 }
0x1f46   : > { %4287 = dma.vmem_to_hbm [thread:$0]  (%p4318_p4), %s3808_s11, 512, %s3810_s22, [#allocation4], %s4997_s9, %s4997_s9, %s4998_s14  }
0x1f47   : > { %4928 = dma.done.wait (%p4318_p4), [#allocation4], 512  }
0x1f48   : > { %4930 = vsyncadd (%p4318_p4), [#allocation4], 4294966784 }
0x1f49 PF: > { %s6105_s29 = sld [smem:[#allocation20_spill]] }
0x1f4a   : > { %s6106_s0 = sld [smem:[#allocation17_spill]] }
0x1f4b   : > { %s6107_s30 = sld [smem:[#allocation18_spill]] }
0x1f4c   : > { %s6108_s20 = sld [smem:[#allocation23_spill]] }
0x1f4d   : > { %s6109_s21 = sld [smem:[#allocation19_spill]] }
0x1f4e   : > { %s6110_s1 = sld [smem:[#allocation22_spill]] }
0x1f4f   : > { %s32_s22 = sadd.s32 1, %s6105_s29  }
0x1f50   : > { %p29_p5 = scmp.ge.s32.totalorder %s32_s22, 4  }
0x1f52   :  { %31 = sbr.rel (!%p29_p5) target bundleno = 26 (0x1a), region = 230 }
0x1f57   :  { %3826 = vsyncpa [#allocation3], 1 }
0x1f58   :  { %3828 = vsyncpa [#allocation3 + $0x1], 1 }
0x1f59   :  { %3829 = vsyncpa [#allocation6], 1 }
0x1f5a   :  { %3830 = vsyncpa [#allocation4], 1 }
0x1f5b   :  { %3832 = vsyncpa [#allocation4 + $0x1], 1 }

</bundles_post_ra>
